<compile_context>
chip_gen: v5e
topology: v5e:2x2
jax: 0.10.0
libtpu: 0.0.40
codegen_flags: <defaults>
</compile_context>

<pallas_src>
import numpy as np
import jax
import jax.numpy as jnp
from jax import lax
from jax.experimental import pallas as pl
from jax.experimental.pallas import tpu as pltpu

START_TAG = '<START>'
STOP_TAG = '<STOP>'
tag_to_ix = {'B-VN': 0, 'I-VN': 1, 'B-VV': 2, 'I-VV': 3, 'B-VT': 4, 'I-VT': 5,
             'B-VRC': 6, 'I-VRC': 7, 'B-VC': 8, 'I-VC': 9, 'B-VP': 10, 'I-VP': 11,
             'B-VAT': 12, 'I-VAT': 13, 'B-VAV': 14, 'I-VAV': 15, 'B-VR': 16,
             'I-VR': 17, 'B-VF': 18, 'I-VF': 19, 'O': 20, START_TAG: 21, STOP_TAG: 22}
TAGSET = len(tag_to_ix)           # 23
START_IDX = tag_to_ix[START_TAG]  # 21
STOP_IDX = tag_to_ix[STOP_TAG]    # 22
TAG_PAD = 128                     # lane-padded tag width


# ----------------------------------------------------------------------------
# Pallas kernel: BiLSTM + hidden2tag + Viterbi forward + on-device backtracking
# ----------------------------------------------------------------------------
def bilstm_crf_kernel(embeds_ref,                      # (S, E)   bf16
                      wcat_ref, bcat_ref,              # (E, 8H) bf16, (1, 8H) f32
                      whh_ref,                         # (2H, 8H) bf16 block-diagonal
                      h0_ref, c0_ref,                  # (1, 2H) bf16, (1, 2H) f32
                      wtagf_ref, wtagb_ref, btag_ref,  # (H,P) bf16, (H,P) bf16, (1,P) f32
                      transA_ref, transB_ref,          # (T,P) f32 [next,prev] / [prev,next]
                      stoprow_ref,                     # (1,P) f32
                      path_ref, score_ref, start_ref,  # outputs: (1,S) i32, (1,1) f32, (1,1) i32
                      xproj_scr, hf_scr, hb_scr, feats_scr):
    S = embeds_ref.shape[0]
    H = c0_ref.shape[1] // 2
    G = 4 * H                                   # gate width per direction
    G2 = 2 * G                                  # both directions (= 8H lanes)
    T, P = transA_ref.shape                     # real tags / lane-padded width
    f32 = jnp.float32
    bf16 = jnp.bfloat16

    # ---- hoisted input projection for BOTH directions: one (S,E)@(E,8H) matmul ----
    xproj_scr[...] = (jnp.dot(embeds_ref[...], wcat_ref[...],
                              preferred_element_type=f32) + bcat_ref[...])

    whh = whh_ref[...]                                        # (2H, 8H) block-diag
    glane = lax.broadcasted_iota(jnp.int32, (1, G2), 1)
    fwd_lane = glane < G                                      # forward-direction gate lanes
    g_gate = (((glane >= 2 * H) & (glane < 3 * H)) |
              ((glane >= G + 2 * H) & (glane < G + 3 * H)))   # tanh'd cell-gate lanes

    h_cat = h0_ref[...]                                       # (1, 2H) bf16  [hf | hb]
    c_cat = c0_ref[...]                                       # (1, 2H) f32   [cf | cb]

    # ---- fused fwd+bwd recurrence, fully unrolled (S is compile-time constant) ----
    for t in range(S):
        tb = S - 1 - t
        # [x_t fwd-gate proj | x_{S-1-t} bwd-gate proj] via one lane select
        xrow = jnp.where(fwd_lane,
                         xproj_scr[pl.ds(t, 1), :],
                         xproj_scr[pl.ds(tb, 1), :])          # (1, 8H)
        g = xrow + jnp.dot(h_cat, whh, preferred_element_type=f32)
        sig = pl.reciprocal(1.0 + jnp.exp(-g), approx=True)   # one EUP pass each
        tnh = jnp.tanh(g)
        act = jnp.where(g_gate, tnh, sig)                     # (1, 8H)
        # PyTorch gate order per direction: i, f, g, o
        i_cat = jnp.concatenate([act[:, 0:H], act[:, G:G + H]], axis=1)
        f_cat = jnp.concatenate([act[:, H:2 * H], act[:, G + H:G + 2 * H]], axis=1)
        gg_cat = jnp.concatenate([act[:, 2 * H:3 * H], act[:, G + 2 * H:G + 3 * H]], axis=1)
        o_cat = jnp.concatenate([act[:, 3 * H:4 * H], act[:, G + 3 * H:G + 4 * H]], axis=1)
        c_cat = f_cat * c_cat + i_cat * gg_cat                # (1, 2H) f32
        h_f32 = o_cat * jnp.tanh(c_cat)                       # single tanh for both dirs
        hf_scr[pl.ds(t, 1), :] = h_f32[:, 0:H]
        hb_scr[pl.ds(tb, 1), :] = h_f32[:, H:2 * H]
        h_cat = h_f32.astype(bf16)                            # carry h in bf16

    # ---- hidden2tag (concat handled implicitly by the split, lane-padded weight) ----
    feats_scr[...] = (
        jnp.dot(hf_scr[...].astype(bf16), wtagf_ref[...], preferred_element_type=f32)
        + jnp.dot(hb_scr[...].astype(bf16), wtagb_ref[...], preferred_element_type=f32)
        + btag_ref[...])                                      # (S, P); pad lanes = -1e4

    # ---- Viterbi forward pass: alternate row/column orientation each step ----
    transA = transA_ref[...]                                  # [next(sub), prev(lane)]
    transB = transB_ref[...]                                  # [prev(sub), next(lane)]
    lane_TP = lax.broadcasted_iota(jnp.int32, (T, P), 1)
    sub_TP = lax.broadcasted_iota(jnp.int32, (T, P), 0)
    diag_TP = lane_TP == sub_TP
    lane_1P = lax.broadcasted_iota(jnp.int32, (1, P), 1)
    sub_T1 = lax.broadcasted_iota(jnp.int32, (T, 1), 0)

    fv = jnp.where(lane_1P == START_IDX, 0.0, -10000.0).astype(f32)   # (1, P) row
    bptrs = []
    for t in range(S):
        frow = feats_scr[pl.ds(t, 1), :]                      # (1, P)
        if t % 2 == 0:
            # consumes fv as a row (prev on lanes), produces a column (next on sublanes)
            fcol = jnp.sum(jnp.where(diag_TP, frow, 0.0),
                           axis=1, keepdims=True)             # (T,1), off the fv chain
            ntv = fv + transA                                 # (T, P)
            maxv = jnp.max(ntv, axis=1, keepdims=True)        # (T, 1)
            bptrs.append(jnp.min(jnp.where(ntv >= maxv, lane_TP, P),
                                 axis=1, keepdims=True))      # (T,1) first-argmax prev
            fv = maxv + fcol                                  # (T, 1) column
        else:
            # consumes fv as a column (prev on sublanes), produces a row (next on lanes)
            ntv = fv + transB                                 # (T, P)
            maxv = jnp.max(ntv, axis=0, keepdims=True)        # (1, P)
            bptrs.append(jnp.min(jnp.where(ntv >= maxv, sub_TP, T),
                                 axis=0, keepdims=True))      # (1,P) first-argmax prev
            fv = maxv + frow                                  # (1, P) row

    if S % 2 == 1:
        # odd S ends on a column; convert once (off the per-step chain) to a row
        fv = jnp.max(jnp.where(diag_TP, fv, -1e9), axis=0, keepdims=True)

    terminal = fv + stoprow_ref[...]                          # (1, P); pad lanes << real
    term_max = jnp.max(terminal, axis=1, keepdims=True)       # (1, 1)
    best = jnp.min(jnp.where(terminal >= term_max, lane_1P, P),
                   axis=1, keepdims=True)                     # (1, 1) int32
    score_ref[...] = term_max

    # ---- on-device backtracking: path accumulated in one lane-dense (1,S) row ----
    s_lane = lax.broadcasted_iota(jnp.int32, (1, S), 1)
    path = jnp.zeros((1, S), jnp.int32)
    cur = best
    for t in range(S - 1, -1, -1):
        path = jnp.where(s_lane == t, cur, path)              # path[t] = cur
        bp = bptrs[t]
        if t % 2 == 0:                                        # (T,1): next tag on sublanes
            cur = jnp.max(jnp.where(sub_T1 == cur, bp, 0), axis=0, keepdims=True)
        else:                                                 # (1,P): next tag on lanes
            cur = jnp.max(jnp.where(lane_1P == cur, bp, 0), axis=1, keepdims=True)
    path_ref[...] = path
    start_ref[...] = cur                                      # must equal START_IDX


def run_pallas(embeds, wcat, bcat, whh, h0cat, c0cat,
               wtagf, wtagb, btag, transA, transB, stoprow):
    S = embeds.shape[0]
    H = c0cat.shape[1] // 2
    P = transA.shape[1]
    vmem = lambda: pl.BlockSpec(memory_space=pltpu.MemorySpace.VMEM)
    return pl.pallas_call(
        bilstm_crf_kernel,
        out_shape=(jax.ShapeDtypeStruct((1, S), jnp.int32),    # best path (tag per token)
                   jax.ShapeDtypeStruct((1, 1), jnp.float32),  # path score
                   jax.ShapeDtypeStruct((1, 1), jnp.int32)),   # start-tag check
        in_specs=[vmem() for _ in range(12)],
        out_specs=(vmem(), vmem(), vmem()),
        scratch_shapes=[pltpu.VMEM((S, 8 * H), jnp.float32),   # hoisted input projection
                        pltpu.VMEM((S, H), jnp.float32),       # forward hidden states
                        pltpu.VMEM((S, H), jnp.float32),       # backward hidden states
                        pltpu.VMEM((S, P), jnp.float32)],      # lstm features (lane-padded)
    )(embeds, wcat, bcat, whh, h0cat, c0cat,
      wtagf, wtagb, btag, transA, transB, stoprow)


# ----------------------------------------------------------------------------
# Parameter setup (deterministic, mirrors nn.Module shapes) + forward wrapper
# ----------------------------------------------------------------------------
def init_params(key, vocab_size, emb_dim, hidden_dim, tagset):
    H = hidden_dim // 2
    ks = jax.random.split(key, 16)
    sc = 1.0 / np.sqrt(H)
    sl = 1.0 / np.sqrt(hidden_dim)

    def unif(k, shape, s):
        return jax.random.uniform(k, shape, jnp.float32, minval=-s, maxval=s)

    p = {}
    p['embedding'] = jax.random.normal(ks[0], (vocab_size, emb_dim), jnp.float32)
    p['w_ih_f'] = unif(ks[1], (4 * H, emb_dim), sc)
    p['w_hh_f'] = unif(ks[2], (4 * H, H), sc)
    p['b_ih_f'] = unif(ks[3], (4 * H,), sc)
    p['b_hh_f'] = unif(ks[4], (4 * H,), sc)
    p['w_ih_b'] = unif(ks[5], (4 * H, emb_dim), sc)
    p['w_hh_b'] = unif(ks[6], (4 * H, H), sc)
    p['b_ih_b'] = unif(ks[7], (4 * H,), sc)
    p['b_hh_b'] = unif(ks[8], (4 * H,), sc)
    p['w_tag'] = unif(ks[9], (tagset, hidden_dim), sl)
    p['b_tag'] = unif(ks[10], (tagset,), sl)
    trans = jax.random.normal(ks[11], (tagset, tagset), jnp.float32)
    trans = trans.at[START_IDX, :].set(-10000.0)
    trans = trans.at[:, STOP_IDX].set(-10000.0)
    p['transitions'] = trans
    # deterministic stand-in for init_hidden()'s torch.randn
    p['h0'] = jax.random.normal(ks[12], (2, 1, H), jnp.float32)
    p['c0'] = jax.random.normal(ks[13], (2, 1, H), jnp.float32)
    return p


def bilstm_crf_forward(sentence, params, hidden_dim):
    H = hidden_dim // 2
    T = params['transitions'].shape[0]
    P = TAG_PAD
    f32 = jnp.float32
    bf16 = jnp.bfloat16

    embeds = jnp.take(params['embedding'], sentence, axis=0).astype(bf16)      # (S, E)
    wcat = jnp.concatenate([params['w_ih_f'].T, params['w_ih_b'].T],
                           axis=1).astype(bf16)                                # (E, 8H)
    bcat = jnp.concatenate([params['b_ih_f'] + params['b_hh_f'],
                            params['b_ih_b'] + params['b_hh_b']]
                           ).reshape(1, -1).astype(f32)                        # (1, 8H)
    # block-diagonal recurrent weight: [hf|hb] @ whh = [hf@Whf | hb@Whb]
    whh = jnp.zeros((2 * H, 8 * H), f32)
    whh = whh.at[:H, :4 * H].set(params['w_hh_f'].T)
    whh = whh.at[H:, 4 * H:].set(params['w_hh_b'].T)
    whh = whh.astype(bf16)                                                     # (2H, 8H)
    h0cat = jnp.concatenate([params['h0'][0], params['h0'][1]], axis=1).astype(bf16)
    c0cat = jnp.concatenate([params['c0'][0], params['c0'][1]], axis=1).astype(f32)

    wtagT = params['w_tag'].T.astype(f32)                                      # (2H, T)
    wtagf = jnp.zeros((H, P), f32).at[:, :T].set(wtagT[:H]).astype(bf16)
    wtagb = jnp.zeros((H, P), f32).at[:, :T].set(wtagT[H:]).astype(bf16)
    btag = jnp.full((1, P), -10000.0, f32).at[0, :T].set(params['b_tag'])
    trans = params['transitions'].astype(f32)
    transA = jnp.full((T, P), -10000.0, f32).at[:, :T].set(trans)              # [next, prev]
    transB = jnp.full((T, P), -10000.0, f32).at[:, :T].set(trans.T)            # [prev, next]
    stoprow = jnp.full((1, P), -10000.0, f32).at[0, :T].set(trans[STOP_IDX])

    path_idx, score, start = run_pallas(embeds, wcat, bcat, whh, h0cat, c0cat,
                                        wtagf, wtagb, btag, transA, transB, stoprow)
    path_idx, score, start = jax.block_until_ready((path_idx, score, start))

    path = [int(v) for v in np.asarray(path_idx)[0]]
    start = int(np.asarray(start)[0, 0])
    assert start == START_IDX, start
    return float(np.asarray(score)[0, 0]), path


# ----------------------------------------------------------------------------
# Pure numpy f32 reference (mirrors the PyTorch forward) for a correctness check
# ----------------------------------------------------------------------------
def ref_forward(sent, P, hidden_dim):
    H = hidden_dim // 2
    T = P['transitions'].shape[0]
    emb = P['embedding'][sent]
    S = emb.shape[0]

    def run_dir(xs, h, c, wih, whh, bih, bhh):
        outs = []
        for x in xs:
            g = wih @ x + bih + whh @ h + bhh
            i = 1.0 / (1.0 + np.exp(-g[0:H]))
            f = 1.0 / (1.0 + np.exp(-g[H:2 * H]))
            gg = np.tanh(g[2 * H:3 * H])
            o = 1.0 / (1.0 + np.exp(-g[3 * H:4 * H]))
            c = f * c + i * gg
            h = o * np.tanh(c)
            outs.append(h)
        return np.stack(outs)

    hf = run_dir(list(emb), P['h0'][0, 0], P['c0'][0, 0],
                 P['w_ih_f'], P['w_hh_f'], P['b_ih_f'], P['b_hh_f'])
    hb = run_dir(list(emb[::-1]), P['h0'][1, 0], P['c0'][1, 0],
                 P['w_ih_b'], P['w_hh_b'], P['b_ih_b'], P['b_hh_b'])[::-1]
    lstm_out = np.concatenate([hf, hb], axis=1)
    feats = lstm_out @ P['w_tag'].T + P['b_tag']

    trans = P['transitions']
    fv = np.full((T,), -10000.0, np.float32)
    fv[START_IDX] = 0.0
    bptrs = []
    for t in range(S):
        ntv = trans + fv[None, :]
        best_prev = np.argmax(ntv, axis=1)
        fv = ntv[np.arange(T), best_prev] + feats[t]
        bptrs.append(best_prev)
    term = fv + trans[STOP_IDX]
    best = int(np.argmax(term))
    score = float(term[best])
    path = [best]
    for bp in reversed(bptrs):
        best = int(bp[best])
        path.append(best)
    start = path.pop()
    assert start == START_IDX
    path.reverse()
    return score, path, feats


def path_score_np(feats, trans, path):
    """Viterbi objective of a given path under f32 feats/transitions."""
    s = trans[path[0], START_IDX] + feats[0, path[0]]
    for i in range(1, len(path)):
        s += trans[path[i], path[i - 1]] + feats[i, path[i]]
    s += trans[STOP_IDX, path[-1]]
    return float(s)


if __name__ == "__main__":
    VOCAB, EMB, HIDDEN, SEQ = 30, 32, 32, 8
    key = jax.random.PRNGKey(0)
    k_param, k_sent = jax.random.split(key)
    params = init_params(k_param, VOCAB, EMB, HIDDEN, TAGSET)
    sentence = jax.random.randint(k_sent, (SEQ,), 0, VOCAB, dtype=jnp.int32)

    score, path = bilstm_crf_forward(sentence, params, HIDDEN)

    # sanity check against a full-f32 numpy reference of the same forward pass.
    # the kernel runs its matmuls in bf16 on the MXU, so the score check is
    # tolerance-based and a differing path is accepted iff it is near-optimal.
    np_params = {k: np.asarray(v) for k, v in params.items()}
    ref_score, ref_path, ref_feats = ref_forward(np.asarray(sentence), np_params, HIDDEN)

    tol = 0.3 + 2e-2 * abs(ref_score)
    assert abs(score - ref_score) <= tol, (score, ref_score)
    if path != ref_path:
        alt = path_score_np(ref_feats, np_params['transitions'], path)
        assert alt >= ref_score - tol, (path, ref_path, alt, ref_score)

    print("KERNEL_OK")
</pallas_src>

<mosaic_0001>
module attributes {stable_mosaic.version = 11 : i64} {
  func.func @bilstm_crf_kernel(%arg0: memref<8x32xbf16, #tpu.memory_space<vmem>>, %arg1: memref<32x128xbf16, #tpu.memory_space<vmem>>, %arg2: memref<1x128xf32, #tpu.memory_space<vmem>>, %arg3: memref<32x128xbf16, #tpu.memory_space<vmem>>, %arg4: memref<1x32xbf16, #tpu.memory_space<vmem>>, %arg5: memref<1x32xf32, #tpu.memory_space<vmem>>, %arg6: memref<16x128xbf16, #tpu.memory_space<vmem>>, %arg7: memref<16x128xbf16, #tpu.memory_space<vmem>>, %arg8: memref<1x128xf32, #tpu.memory_space<vmem>>, %arg9: memref<23x128xf32, #tpu.memory_space<vmem>>, %arg10: memref<23x128xf32, #tpu.memory_space<vmem>>, %arg11: memref<1x128xf32, #tpu.memory_space<vmem>>, %arg12: memref<1x8xi32, #tpu.memory_space<vmem>>, %arg13: memref<1x1xf32, #tpu.memory_space<vmem>>, %arg14: memref<1x1xi32, #tpu.memory_space<vmem>>, %arg15: memref<8x128xf32, #tpu.memory_space<vmem>>, %arg16: memref<8x16xf32, #tpu.memory_space<vmem>>, %arg17: memref<8x16xf32, #tpu.memory_space<vmem>>, %arg18: memref<8x128xf32, #tpu.memory_space<vmem>>) attributes {dimension_semantics = [], scalar_prefetch = 0 : i64, scratch_operands = 4 : i64, tpu.core_type = #tpu.core_type<tc>} {
    %c0 = arith.constant 0 : index
    %c0_0 = arith.constant 0 : index
    %0 = vector.load %arg0[%c0, %c0_0] : memref<8x32xbf16, #tpu.memory_space<vmem>>, vector<8x32xbf16>
    %c0_1 = arith.constant 0 : index
    %c0_2 = arith.constant 0 : index
    %1 = vector.load %arg1[%c0_1, %c0_2] : memref<32x128xbf16, #tpu.memory_space<vmem>>, vector<32x128xbf16>
    %cst = arith.constant dense<0.000000e+00> : vector<8x128xf32>
    %2 = tpu.matmul %0, %1, %cst {dimension_numbers = #tpu.dot_dimension_numbers<[1], [0], [0], [1], [0, 0, 1, 1], [], []>} : vector<8x32xbf16>, vector<32x128xbf16>, vector<8x128xf32> -> vector<8x128xf32>
    %c0_3 = arith.constant 0 : index
    %c0_4 = arith.constant 0 : index
    %3 = vector.load %arg2[%c0_3, %c0_4] : memref<1x128xf32, #tpu.memory_space<vmem>>, vector<1x128xf32>
    %4 = vector.broadcast %3 : vector<1x128xf32> to vector<8x128xf32>
    %5 = arith.addf %2, %4 : vector<8x128xf32>
    %c0_5 = arith.constant 0 : index
    %c0_6 = arith.constant 0 : index
    %6 = vector.load %arg15[%c0_5, %c0_6] : memref<8x128xf32, #tpu.memory_space<vmem>>, vector<8x128xf32>
    tpu.vector_store %arg15[%c0_5, %c0_6], %5 {strides = array<i32>} : memref<8x128xf32, #tpu.memory_space<vmem>>, vector<8x128xf32>,
    %c0_7 = arith.constant 0 : index
    %c0_8 = arith.constant 0 : index
    %7 = vector.load %arg3[%c0_7, %c0_8] : memref<32x128xbf16, #tpu.memory_space<vmem>>, vector<32x128xbf16>
    %8 = tpu.iota {dimensions = array<i32: 1>} : vector<1x128xi32>
    %c64_i32 = arith.constant 64 : i32
    %9 = vector.broadcast %c64_i32 : i32 to vector<1x128xi32>
    %10 = arith.cmpi slt, %8, %9 : vector<1x128xi32>
    %c32_i32 = arith.constant 32 : i32
    %11 = vector.broadcast %c32_i32 : i32 to vector<1x128xi32>
    %12 = arith.cmpi sge, %8, %11 : vector<1x128xi32>
    %c48_i32 = arith.constant 48 : i32
    %13 = vector.broadcast %c48_i32 : i32 to vector<1x128xi32>
    %14 = arith.cmpi slt, %8, %13 : vector<1x128xi32>
    %15 = arith.andi %12, %14 : vector<1x128xi1>
    %c96_i32 = arith.constant 96 : i32
    %16 = vector.broadcast %c96_i32 : i32 to vector<1x128xi32>
    %17 = arith.cmpi sge, %8, %16 : vector<1x128xi32>
    %c112_i32 = arith.constant 112 : i32
    %18 = vector.broadcast %c112_i32 : i32 to vector<1x128xi32>
    %19 = arith.cmpi slt, %8, %18 : vector<1x128xi32>
    %20 = arith.andi %17, %19 : vector<1x128xi1>
    %21 = arith.ori %15, %20 : vector<1x128xi1>
    %c0_9 = arith.constant 0 : index
    %c0_10 = arith.constant 0 : index
    %22 = vector.load %arg4[%c0_9, %c0_10] : memref<1x32xbf16, #tpu.memory_space<vmem>>, vector<1x32xbf16>
    %c0_11 = arith.constant 0 : index
    %c0_12 = arith.constant 0 : index
    %23 = vector.load %arg5[%c0_11, %c0_12] : memref<1x32xf32, #tpu.memory_space<vmem>>, vector<1x32xf32>
    %c0_13 = arith.constant 0 : index
    %c0_14 = arith.constant 0 : index
    %24 = vector.load %arg15[%c0_13, %c0_14] : memref<8x128xf32, #tpu.memory_space<vmem>>, vector<1x128xf32>
    %c7 = arith.constant 7 : index
    %c0_15 = arith.constant 0 : index
    %25 = vector.load %arg15[%c7, %c0_15] : memref<8x128xf32, #tpu.memory_space<vmem>>, vector<1x128xf32>
    %26 = arith.select %10, %24, %25 : vector<1x128xi1>, vector<1x128xf32>
    %cst_16 = arith.constant dense<0.000000e+00> : vector<1x128xf32>
    %27 = tpu.matmul %22, %7, %cst_16 {dimension_numbers = #tpu.dot_dimension_numbers<[1], [0], [0], [1], [0, 0, 1, 1], [], []>} : vector<1x32xbf16>, vector<32x128xbf16>, vector<1x128xf32> -> vector<1x128xf32>
    %28 = arith.addf %26, %27 : vector<1x128xf32>
    %cst_17 = arith.constant 0.000000e+00 : f32
    %29 = vector.broadcast %cst_17 : f32 to vector<1x128xf32>
    %30 = arith.subf %29, %28 : vector<1x128xf32>
    %31 = math.exp %30 : vector<1x128xf32>
    %cst_18 = arith.constant 1.000000e+00 : f32
    %32 = vector.broadcast %cst_18 : f32 to vector<1x128xf32>
    %33 = arith.addf %32, %31 : vector<1x128xf32>
    %34 = tpu.reciprocal %33 {approx = true} : vector<1x128xf32> -> vector<1x128xf32>
    %35 = math.tanh %28 : vector<1x128xf32>
    %36 = arith.select %21, %35, %34 : vector<1x128xi1>, vector<1x128xf32>
    %37 = vector.extract_strided_slice %36 {offsets = [0, 0], sizes = [1, 16], strides = [1, 1]} : vector<1x128xf32> to vector<1x16xf32>
    %38 = vector.extract_strided_slice %36 {offsets = [0, 64], sizes = [1, 16], strides = [1, 1]} : vector<1x128xf32> to vector<1x16xf32>
    %39 = tpu.concatenate %37, %38 in 1 : vector<1x16xf32>, vector<1x16xf32> -> vector<1x32xf32>
    %40 = vector.extract_strided_slice %36 {offsets = [0, 16], sizes = [1, 16], strides = [1, 1]} : vector<1x128xf32> to vector<1x16xf32>
    %41 = vector.extract_strided_slice %36 {offsets = [0, 80], sizes = [1, 16], strides = [1, 1]} : vector<1x128xf32> to vector<1x16xf32>
    %42 = tpu.concatenate %40, %41 in 1 : vector<1x16xf32>, vector<1x16xf32> -> vector<1x32xf32>
    %43 = vector.extract_strided_slice %36 {offsets = [0, 32], sizes = [1, 16], strides = [1, 1]} : vector<1x128xf32> to vector<1x16xf32>
    %44 = vector.extract_strided_slice %36 {offsets = [0, 96], sizes = [1, 16], strides = [1, 1]} : vector<1x128xf32> to vector<1x16xf32>
    %45 = tpu.concatenate %43, %44 in 1 : vector<1x16xf32>, vector<1x16xf32> -> vector<1x32xf32>
    %46 = vector.extract_strided_slice %36 {offsets = [0, 48], sizes = [1, 16], strides = [1, 1]} : vector<1x128xf32> to vector<1x16xf32>
    %47 = vector.extract_strided_slice %36 {offsets = [0, 112], sizes = [1, 16], strides = [1, 1]} : vector<1x128xf32> to vector<1x16xf32>
    %48 = tpu.concatenate %46, %47 in 1 : vector<1x16xf32>, vector<1x16xf32> -> vector<1x32xf32>
    %49 = arith.mulf %42, %23 : vector<1x32xf32>
    %50 = arith.mulf %39, %45 : vector<1x32xf32>
    %51 = arith.addf %49, %50 : vector<1x32xf32>
    %52 = math.tanh %51 : vector<1x32xf32>
    %53 = arith.mulf %48, %52 : vector<1x32xf32>
    %54 = vector.extract_strided_slice %53 {offsets = [0, 0], sizes = [1, 16], strides = [1, 1]} : vector<1x32xf32> to vector<1x16xf32>
    %c0_19 = arith.constant 0 : index
    %c0_20 = arith.constant 0 : index
    %55 = vector.load %arg16[%c0_19, %c0_20] : memref<8x16xf32, #tpu.memory_space<vmem>>, vector<1x16xf32>
    tpu.vector_store %arg16[%c0_19, %c0_20], %54 {strides = array<i32>} : memref<8x16xf32, #tpu.memory_space<vmem>>, vector<1x16xf32>,
    %56 = vector.extract_strided_slice %53 {offsets = [0, 16], sizes = [1, 16], strides = [1, 1]} : vector<1x32xf32> to vector<1x16xf32>
    %c7_21 = arith.constant 7 : index
    %c0_22 = arith.constant 0 : index
    %57 = vector.load %arg17[%c7_21, %c0_22] : memref<8x16xf32, #tpu.memory_space<vmem>>, vector<1x16xf32>
    tpu.vector_store %arg17[%c7_21, %c0_22], %56 {strides = array<i32>} : memref<8x16xf32, #tpu.memory_space<vmem>>, vector<1x16xf32>,
    %58 = arith.truncf %53 : vector<1x32xf32> to vector<1x32xbf16>
    %c1 = arith.constant 1 : index
    %c0_23 = arith.constant 0 : index
    %59 = vector.load %arg15[%c1, %c0_23] : memref<8x128xf32, #tpu.memory_space<vmem>>, vector<1x128xf32>
    %c6 = arith.constant 6 : index
    %c0_24 = arith.constant 0 : index
    %60 = vector.load %arg15[%c6, %c0_24] : memref<8x128xf32, #tpu.memory_space<vmem>>, vector<1x128xf32>
    %61 = arith.select %10, %59, %60 : vector<1x128xi1>, vector<1x128xf32>
    %cst_25 = arith.constant dense<0.000000e+00> : vector<1x128xf32>
    %62 = tpu.matmul %58, %7, %cst_25 {dimension_numbers = #tpu.dot_dimension_numbers<[1], [0], [0], [1], [0, 0, 1, 1], [], []>} : vector<1x32xbf16>, vector<32x128xbf16>, vector<1x128xf32> -> vector<1x128xf32>
    %63 = arith.addf %61, %62 : vector<1x128xf32>
    %cst_26 = arith.constant 0.000000e+00 : f32
    %64 = vector.broadcast %cst_26 : f32 to vector<1x128xf32>
    %65 = arith.subf %64, %63 : vector<1x128xf32>
    %66 = math.exp %65 : vector<1x128xf32>
    %cst_27 = arith.constant 1.000000e+00 : f32
    %67 = vector.broadcast %cst_27 : f32 to vector<1x128xf32>
    %68 = arith.addf %67, %66 : vector<1x128xf32>
    %69 = tpu.reciprocal %68 {approx = true} : vector<1x128xf32> -> vector<1x128xf32>
    %70 = math.tanh %63 : vector<1x128xf32>
    %71 = arith.select %21, %70, %69 : vector<1x128xi1>, vector<1x128xf32>
    %72 = vector.extract_strided_slice %71 {offsets = [0, 0], sizes = [1, 16], strides = [1, 1]} : vector<1x128xf32> to vector<1x16xf32>
    %73 = vector.extract_strided_slice %71 {offsets = [0, 64], sizes = [1, 16], strides = [1, 1]} : vector<1x128xf32> to vector<1x16xf32>
    %74 = tpu.concatenate %72, %73 in 1 : vector<1x16xf32>, vector<1x16xf32> -> vector<1x32xf32>
    %75 = vector.extract_strided_slice %71 {offsets = [0, 16], sizes = [1, 16], strides = [1, 1]} : vector<1x128xf32> to vector<1x16xf32>
    %76 = vector.extract_strided_slice %71 {offsets = [0, 80], sizes = [1, 16], strides = [1, 1]} : vector<1x128xf32> to vector<1x16xf32>
    %77 = tpu.concatenate %75, %76 in 1 : vector<1x16xf32>, vector<1x16xf32> -> vector<1x32xf32>
    %78 = vector.extract_strided_slice %71 {offsets = [0, 32], sizes = [1, 16], strides = [1, 1]} : vector<1x128xf32> to vector<1x16xf32>
    %79 = vector.extract_strided_slice %71 {offsets = [0, 96], sizes = [1, 16], strides = [1, 1]} : vector<1x128xf32> to vector<1x16xf32>
    %80 = tpu.concatenate %78, %79 in 1 : vector<1x16xf32>, vector<1x16xf32> -> vector<1x32xf32>
    %81 = vector.extract_strided_slice %71 {offsets = [0, 48], sizes = [1, 16], strides = [1, 1]} : vector<1x128xf32> to vector<1x16xf32>
    %82 = vector.extract_strided_slice %71 {offsets = [0, 112], sizes = [1, 16], strides = [1, 1]} : vector<1x128xf32> to vector<1x16xf32>
    %83 = tpu.concatenate %81, %82 in 1 : vector<1x16xf32>, vector<1x16xf32> -> vector<1x32xf32>
    %84 = arith.mulf %77, %51 : vector<1x32xf32>
    %85 = arith.mulf %74, %80 : vector<1x32xf32>
    %86 = arith.addf %84, %85 : vector<1x32xf32>
    %87 = math.tanh %86 : vector<1x32xf32>
    %88 = arith.mulf %83, %87 : vector<1x32xf32>
    %89 = vector.extract_strided_slice %88 {offsets = [0, 0], sizes = [1, 16], strides = [1, 1]} : vector<1x32xf32> to vector<1x16xf32>
    %c1_28 = arith.constant 1 : index
    %c0_29 = arith.constant 0 : index
    %90 = vector.load %arg16[%c1_28, %c0_29] : memref<8x16xf32, #tpu.memory_space<vmem>>, vector<1x16xf32>
    tpu.vector_store %arg16[%c1_28, %c0_29], %89 {strides = array<i32>} : memref<8x16xf32, #tpu.memory_space<vmem>>, vector<1x16xf32>,
    %91 = vector.extract_strided_slice %88 {offsets = [0, 16], sizes = [1, 16], strides = [1, 1]} : vector<1x32xf32> to vector<1x16xf32>
    %c6_30 = arith.constant 6 : index
    %c0_31 = arith.constant 0 : index
    %92 = vector.load %arg17[%c6_30, %c0_31] : memref<8x16xf32, #tpu.memory_space<vmem>>, vector<1x16xf32>
    tpu.vector_store %arg17[%c6_30, %c0_31], %91 {strides = array<i32>} : memref<8x16xf32, #tpu.memory_space<vmem>>, vector<1x16xf32>,
    %93 = arith.truncf %88 : vector<1x32xf32> to vector<1x32xbf16>
    %c2 = arith.constant 2 : index
    %c0_32 = arith.constant 0 : index
    %94 = vector.load %arg15[%c2, %c0_32] : memref<8x128xf32, #tpu.memory_space<vmem>>, vector<1x128xf32>
    %c5 = arith.constant 5 : index
    %c0_33 = arith.constant 0 : index
    %95 = vector.load %arg15[%c5, %c0_33] : memref<8x128xf32, #tpu.memory_space<vmem>>, vector<1x128xf32>
    %96 = arith.select %10, %94, %95 : vector<1x128xi1>, vector<1x128xf32>
    %cst_34 = arith.constant dense<0.000000e+00> : vector<1x128xf32>
    %97 = tpu.matmul %93, %7, %cst_34 {dimension_numbers = #tpu.dot_dimension_numbers<[1], [0], [0], [1], [0, 0, 1, 1], [], []>} : vector<1x32xbf16>, vector<32x128xbf16>, vector<1x128xf32> -> vector<1x128xf32>
    %98 = arith.addf %96, %97 : vector<1x128xf32>
    %cst_35 = arith.constant 0.000000e+00 : f32
    %99 = vector.broadcast %cst_35 : f32 to vector<1x128xf32>
    %100 = arith.subf %99, %98 : vector<1x128xf32>
    %101 = math.exp %100 : vector<1x128xf32>
    %cst_36 = arith.constant 1.000000e+00 : f32
    %102 = vector.broadcast %cst_36 : f32 to vector<1x128xf32>
    %103 = arith.addf %102, %101 : vector<1x128xf32>
    %104 = tpu.reciprocal %103 {approx = true} : vector<1x128xf32> -> vector<1x128xf32>
    %105 = math.tanh %98 : vector<1x128xf32>
    %106 = arith.select %21, %105, %104 : vector<1x128xi1>, vector<1x128xf32>
    %107 = vector.extract_strided_slice %106 {offsets = [0, 0], sizes = [1, 16], strides = [1, 1]} : vector<1x128xf32> to vector<1x16xf32>
    %108 = vector.extract_strided_slice %106 {offsets = [0, 64], sizes = [1, 16], strides = [1, 1]} : vector<1x128xf32> to vector<1x16xf32>
    %109 = tpu.concatenate %107, %108 in 1 : vector<1x16xf32>, vector<1x16xf32> -> vector<1x32xf32>
    %110 = vector.extract_strided_slice %106 {offsets = [0, 16], sizes = [1, 16], strides = [1, 1]} : vector<1x128xf32> to vector<1x16xf32>
    %111 = vector.extract_strided_slice %106 {offsets = [0, 80], sizes = [1, 16], strides = [1, 1]} : vector<1x128xf32> to vector<1x16xf32>
    %112 = tpu.concatenate %110, %111 in 1 : vector<1x16xf32>, vector<1x16xf32> -> vector<1x32xf32>
    %113 = vector.extract_strided_slice %106 {offsets = [0, 32], sizes = [1, 16], strides = [1, 1]} : vector<1x128xf32> to vector<1x16xf32>
    %114 = vector.extract_strided_slice %106 {offsets = [0, 96], sizes = [1, 16], strides = [1, 1]} : vector<1x128xf32> to vector<1x16xf32>
    %115 = tpu.concatenate %113, %114 in 1 : vector<1x16xf32>, vector<1x16xf32> -> vector<1x32xf32>
    %116 = vector.extract_strided_slice %106 {offsets = [0, 48], sizes = [1, 16], strides = [1, 1]} : vector<1x128xf32> to vector<1x16xf32>
    %117 = vector.extract_strided_slice %106 {offsets = [0, 112], sizes = [1, 16], strides = [1, 1]} : vector<1x128xf32> to vector<1x16xf32>
    %118 = tpu.concatenate %116, %117 in 1 : vector<1x16xf32>, vector<1x16xf32> -> vector<1x32xf32>
    %119 = arith.mulf %112, %86 : vector<1x32xf32>
    %120 = arith.mulf %109, %115 : vector<1x32xf32>
    %121 = arith.addf %119, %120 : vector<1x32xf32>
    %122 = math.tanh %121 : vector<1x32xf32>
    %123 = arith.mulf %118, %122 : vector<1x32xf32>
    %124 = vector.extract_strided_slice %123 {offsets = [0, 0], sizes = [1, 16], strides = [1, 1]} : vector<1x32xf32> to vector<1x16xf32>
    %c2_37 = arith.constant 2 : index
    %c0_38 = arith.constant 0 : index
    %125 = vector.load %arg16[%c2_37, %c0_38] : memref<8x16xf32, #tpu.memory_space<vmem>>, vector<1x16xf32>
    tpu.vector_store %arg16[%c2_37, %c0_38], %124 {strides = array<i32>} : memref<8x16xf32, #tpu.memory_space<vmem>>, vector<1x16xf32>,
    %126 = vector.extract_strided_slice %123 {offsets = [0, 16], sizes = [1, 16], strides = [1, 1]} : vector<1x32xf32> to vector<1x16xf32>
    %c5_39 = arith.constant 5 : index
    %c0_40 = arith.constant 0 : index
    %127 = vector.load %arg17[%c5_39, %c0_40] : memref<8x16xf32, #tpu.memory_space<vmem>>, vector<1x16xf32>
    tpu.vector_store %arg17[%c5_39, %c0_40], %126 {strides = array<i32>} : memref<8x16xf32, #tpu.memory_space<vmem>>, vector<1x16xf32>,
    %128 = arith.truncf %123 : vector<1x32xf32> to vector<1x32xbf16>
    %c3 = arith.constant 3 : index
    %c0_41 = arith.constant 0 : index
    %129 = vector.load %arg15[%c3, %c0_41] : memref<8x128xf32, #tpu.memory_space<vmem>>, vector<1x128xf32>
    %c4 = arith.constant 4 : index
    %c0_42 = arith.constant 0 : index
    %130 = vector.load %arg15[%c4, %c0_42] : memref<8x128xf32, #tpu.memory_space<vmem>>, vector<1x128xf32>
    %131 = arith.select %10, %129, %130 : vector<1x128xi1>, vector<1x128xf32>
    %cst_43 = arith.constant dense<0.000000e+00> : vector<1x128xf32>
    %132 = tpu.matmul %128, %7, %cst_43 {dimension_numbers = #tpu.dot_dimension_numbers<[1], [0], [0], [1], [0, 0, 1, 1], [], []>} : vector<1x32xbf16>, vector<32x128xbf16>, vector<1x128xf32> -> vector<1x128xf32>
    %133 = arith.addf %131, %132 : vector<1x128xf32>
    %cst_44 = arith.constant 0.000000e+00 : f32
    %134 = vector.broadcast %cst_44 : f32 to vector<1x128xf32>
    %135 = arith.subf %134, %133 : vector<1x128xf32>
    %136 = math.exp %135 : vector<1x128xf32>
    %cst_45 = arith.constant 1.000000e+00 : f32
    %137 = vector.broadcast %cst_45 : f32 to vector<1x128xf32>
    %138 = arith.addf %137, %136 : vector<1x128xf32>
    %139 = tpu.reciprocal %138 {approx = true} : vector<1x128xf32> -> vector<1x128xf32>
    %140 = math.tanh %133 : vector<1x128xf32>
    %141 = arith.select %21, %140, %139 : vector<1x128xi1>, vector<1x128xf32>
    %142 = vector.extract_strided_slice %141 {offsets = [0, 0], sizes = [1, 16], strides = [1, 1]} : vector<1x128xf32> to vector<1x16xf32>
    %143 = vector.extract_strided_slice %141 {offsets = [0, 64], sizes = [1, 16], strides = [1, 1]} : vector<1x128xf32> to vector<1x16xf32>
    %144 = tpu.concatenate %142, %143 in 1 : vector<1x16xf32>, vector<1x16xf32> -> vector<1x32xf32>
    %145 = vector.extract_strided_slice %141 {offsets = [0, 16], sizes = [1, 16], strides = [1, 1]} : vector<1x128xf32> to vector<1x16xf32>
    %146 = vector.extract_strided_slice %141 {offsets = [0, 80], sizes = [1, 16], strides = [1, 1]} : vector<1x128xf32> to vector<1x16xf32>
    %147 = tpu.concatenate %145, %146 in 1 : vector<1x16xf32>, vector<1x16xf32> -> vector<1x32xf32>
    %148 = vector.extract_strided_slice %141 {offsets = [0, 32], sizes = [1, 16], strides = [1, 1]} : vector<1x128xf32> to vector<1x16xf32>
    %149 = vector.extract_strided_slice %141 {offsets = [0, 96], sizes = [1, 16], strides = [1, 1]} : vector<1x128xf32> to vector<1x16xf32>
    %150 = tpu.concatenate %148, %149 in 1 : vector<1x16xf32>, vector<1x16xf32> -> vector<1x32xf32>
    %151 = vector.extract_strided_slice %141 {offsets = [0, 48], sizes = [1, 16], strides = [1, 1]} : vector<1x128xf32> to vector<1x16xf32>
    %152 = vector.extract_strided_slice %141 {offsets = [0, 112], sizes = [1, 16], strides = [1, 1]} : vector<1x128xf32> to vector<1x16xf32>
    %153 = tpu.concatenate %151, %152 in 1 : vector<1x16xf32>, vector<1x16xf32> -> vector<1x32xf32>
    %154 = arith.mulf %147, %121 : vector<1x32xf32>
    %155 = arith.mulf %144, %150 : vector<1x32xf32>
    %156 = arith.addf %154, %155 : vector<1x32xf32>
    %157 = math.tanh %156 : vector<1x32xf32>
    %158 = arith.mulf %153, %157 : vector<1x32xf32>
    %159 = vector.extract_strided_slice %158 {offsets = [0, 0], sizes = [1, 16], strides = [1, 1]} : vector<1x32xf32> to vector<1x16xf32>
    %c3_46 = arith.constant 3 : index
    %c0_47 = arith.constant 0 : index
    %160 = vector.load %arg16[%c3_46, %c0_47] : memref<8x16xf32, #tpu.memory_space<vmem>>, vector<1x16xf32>
    tpu.vector_store %arg16[%c3_46, %c0_47], %159 {strides = array<i32>} : memref<8x16xf32, #tpu.memory_space<vmem>>, vector<1x16xf32>,
    %161 = vector.extract_strided_slice %158 {offsets = [0, 16], sizes = [1, 16], strides = [1, 1]} : vector<1x32xf32> to vector<1x16xf32>
    %c4_48 = arith.constant 4 : index
    %c0_49 = arith.constant 0 : index
    %162 = vector.load %arg17[%c4_48, %c0_49] : memref<8x16xf32, #tpu.memory_space<vmem>>, vector<1x16xf32>
    tpu.vector_store %arg17[%c4_48, %c0_49], %161 {strides = array<i32>} : memref<8x16xf32, #tpu.memory_space<vmem>>, vector<1x16xf32>,
    %163 = arith.truncf %158 : vector<1x32xf32> to vector<1x32xbf16>
    %c4_50 = arith.constant 4 : index
    %c0_51 = arith.constant 0 : index
    %164 = vector.load %arg15[%c4_50, %c0_51] : memref<8x128xf32, #tpu.memory_space<vmem>>, vector<1x128xf32>
    %c3_52 = arith.constant 3 : index
    %c0_53 = arith.constant 0 : index
    %165 = vector.load %arg15[%c3_52, %c0_53] : memref<8x128xf32, #tpu.memory_space<vmem>>, vector<1x128xf32>
    %166 = arith.select %10, %164, %165 : vector<1x128xi1>, vector<1x128xf32>
    %cst_54 = arith.constant dense<0.000000e+00> : vector<1x128xf32>
    %167 = tpu.matmul %163, %7, %cst_54 {dimension_numbers = #tpu.dot_dimension_numbers<[1], [0], [0], [1], [0, 0, 1, 1], [], []>} : vector<1x32xbf16>, vector<32x128xbf16>, vector<1x128xf32> -> vector<1x128xf32>
    %168 = arith.addf %166, %167 : vector<1x128xf32>
    %cst_55 = arith.constant 0.000000e+00 : f32
    %169 = vector.broadcast %cst_55 : f32 to vector<1x128xf32>
    %170 = arith.subf %169, %168 : vector<1x128xf32>
    %171 = math.exp %170 : vector<1x128xf32>
    %cst_56 = arith.constant 1.000000e+00 : f32
    %172 = vector.broadcast %cst_56 : f32 to vector<1x128xf32>
    %173 = arith.addf %172, %171 : vector<1x128xf32>
    %174 = tpu.reciprocal %173 {approx = true} : vector<1x128xf32> -> vector<1x128xf32>
    %175 = math.tanh %168 : vector<1x128xf32>
    %176 = arith.select %21, %175, %174 : vector<1x128xi1>, vector<1x128xf32>
    %177 = vector.extract_strided_slice %176 {offsets = [0, 0], sizes = [1, 16], strides = [1, 1]} : vector<1x128xf32> to vector<1x16xf32>
    %178 = vector.extract_strided_slice %176 {offsets = [0, 64], sizes = [1, 16], strides = [1, 1]} : vector<1x128xf32> to vector<1x16xf32>
    %179 = tpu.concatenate %177, %178 in 1 : vector<1x16xf32>, vector<1x16xf32> -> vector<1x32xf32>
    %180 = vector.extract_strided_slice %176 {offsets = [0, 16], sizes = [1, 16], strides = [1, 1]} : vector<1x128xf32> to vector<1x16xf32>
    %181 = vector.extract_strided_slice %176 {offsets = [0, 80], sizes = [1, 16], strides = [1, 1]} : vector<1x128xf32> to vector<1x16xf32>
    %182 = tpu.concatenate %180, %181 in 1 : vector<1x16xf32>, vector<1x16xf32> -> vector<1x32xf32>
    %183 = vector.extract_strided_slice %176 {offsets = [0, 32], sizes = [1, 16], strides = [1, 1]} : vector<1x128xf32> to vector<1x16xf32>
    %184 = vector.extract_strided_slice %176 {offsets = [0, 96], sizes = [1, 16], strides = [1, 1]} : vector<1x128xf32> to vector<1x16xf32>
    %185 = tpu.concatenate %183, %184 in 1 : vector<1x16xf32>, vector<1x16xf32> -> vector<1x32xf32>
    %186 = vector.extract_strided_slice %176 {offsets = [0, 48], sizes = [1, 16], strides = [1, 1]} : vector<1x128xf32> to vector<1x16xf32>
    %187 = vector.extract_strided_slice %176 {offsets = [0, 112], sizes = [1, 16], strides = [1, 1]} : vector<1x128xf32> to vector<1x16xf32>
    %188 = tpu.concatenate %186, %187 in 1 : vector<1x16xf32>, vector<1x16xf32> -> vector<1x32xf32>
    %189 = arith.mulf %182, %156 : vector<1x32xf32>
    %190 = arith.mulf %179, %185 : vector<1x32xf32>
    %191 = arith.addf %189, %190 : vector<1x32xf32>
    %192 = math.tanh %191 : vector<1x32xf32>
    %193 = arith.mulf %188, %192 : vector<1x32xf32>
    %194 = vector.extract_strided_slice %193 {offsets = [0, 0], sizes = [1, 16], strides = [1, 1]} : vector<1x32xf32> to vector<1x16xf32>
    %c4_57 = arith.constant 4 : index
    %c0_58 = arith.constant 0 : index
    %195 = vector.load %arg16[%c4_57, %c0_58] : memref<8x16xf32, #tpu.memory_space<vmem>>, vector<1x16xf32>
    tpu.vector_store %arg16[%c4_57, %c0_58], %194 {strides = array<i32>} : memref<8x16xf32, #tpu.memory_space<vmem>>, vector<1x16xf32>,
    %196 = vector.extract_strided_slice %193 {offsets = [0, 16], sizes = [1, 16], strides = [1, 1]} : vector<1x32xf32> to vector<1x16xf32>
    %c3_59 = arith.constant 3 : index
    %c0_60 = arith.constant 0 : index
    %197 = vector.load %arg17[%c3_59, %c0_60] : memref<8x16xf32, #tpu.memory_space<vmem>>, vector<1x16xf32>
    tpu.vector_store %arg17[%c3_59, %c0_60], %196 {strides = array<i32>} : memref<8x16xf32, #tpu.memory_space<vmem>>, vector<1x16xf32>,
    %198 = arith.truncf %193 : vector<1x32xf32> to vector<1x32xbf16>
    %c5_61 = arith.constant 5 : index
    %c0_62 = arith.constant 0 : index
    %199 = vector.load %arg15[%c5_61, %c0_62] : memref<8x128xf32, #tpu.memory_space<vmem>>, vector<1x128xf32>
    %c2_63 = arith.constant 2 : index
    %c0_64 = arith.constant 0 : index
    %200 = vector.load %arg15[%c2_63, %c0_64] : memref<8x128xf32, #tpu.memory_space<vmem>>, vector<1x128xf32>
    %201 = arith.select %10, %199, %200 : vector<1x128xi1>, vector<1x128xf32>
    %cst_65 = arith.constant dense<0.000000e+00> : vector<1x128xf32>
    %202 = tpu.matmul %198, %7, %cst_65 {dimension_numbers = #tpu.dot_dimension_numbers<[1], [0], [0], [1], [0, 0, 1, 1], [], []>} : vector<1x32xbf16>, vector<32x128xbf16>, vector<1x128xf32> -> vector<1x128xf32>
    %203 = arith.addf %201, %202 : vector<1x128xf32>
    %cst_66 = arith.constant 0.000000e+00 : f32
    %204 = vector.broadcast %cst_66 : f32 to vector<1x128xf32>
    %205 = arith.subf %204, %203 : vector<1x128xf32>
    %206 = math.exp %205 : vector<1x128xf32>
    %cst_67 = arith.constant 1.000000e+00 : f32
    %207 = vector.broadcast %cst_67 : f32 to vector<1x128xf32>
    %208 = arith.addf %207, %206 : vector<1x128xf32>
    %209 = tpu.reciprocal %208 {approx = true} : vector<1x128xf32> -> vector<1x128xf32>
    %210 = math.tanh %203 : vector<1x128xf32>
    %211 = arith.select %21, %210, %209 : vector<1x128xi1>, vector<1x128xf32>
    %212 = vector.extract_strided_slice %211 {offsets = [0, 0], sizes = [1, 16], strides = [1, 1]} : vector<1x128xf32> to vector<1x16xf32>
    %213 = vector.extract_strided_slice %211 {offsets = [0, 64], sizes = [1, 16], strides = [1, 1]} : vector<1x128xf32> to vector<1x16xf32>
    %214 = tpu.concatenate %212, %213 in 1 : vector<1x16xf32>, vector<1x16xf32> -> vector<1x32xf32>
    %215 = vector.extract_strided_slice %211 {offsets = [0, 16], sizes = [1, 16], strides = [1, 1]} : vector<1x128xf32> to vector<1x16xf32>
    %216 = vector.extract_strided_slice %211 {offsets = [0, 80], sizes = [1, 16], strides = [1, 1]} : vector<1x128xf32> to vector<1x16xf32>
    %217 = tpu.concatenate %215, %216 in 1 : vector<1x16xf32>, vector<1x16xf32> -> vector<1x32xf32>
    %218 = vector.extract_strided_slice %211 {offsets = [0, 32], sizes = [1, 16], strides = [1, 1]} : vector<1x128xf32> to vector<1x16xf32>
    %219 = vector.extract_strided_slice %211 {offsets = [0, 96], sizes = [1, 16], strides = [1, 1]} : vector<1x128xf32> to vector<1x16xf32>
    %220 = tpu.concatenate %218, %219 in 1 : vector<1x16xf32>, vector<1x16xf32> -> vector<1x32xf32>
    %221 = vector.extract_strided_slice %211 {offsets = [0, 48], sizes = [1, 16], strides = [1, 1]} : vector<1x128xf32> to vector<1x16xf32>
    %222 = vector.extract_strided_slice %211 {offsets = [0, 112], sizes = [1, 16], strides = [1, 1]} : vector<1x128xf32> to vector<1x16xf32>
    %223 = tpu.concatenate %221, %222 in 1 : vector<1x16xf32>, vector<1x16xf32> -> vector<1x32xf32>
    %224 = arith.mulf %217, %191 : vector<1x32xf32>
    %225 = arith.mulf %214, %220 : vector<1x32xf32>
    %226 = arith.addf %224, %225 : vector<1x32xf32>
    %227 = math.tanh %226 : vector<1x32xf32>
    %228 = arith.mulf %223, %227 : vector<1x32xf32>
    %229 = vector.extract_strided_slice %228 {offsets = [0, 0], sizes = [1, 16], strides = [1, 1]} : vector<1x32xf32> to vector<1x16xf32>
    %c5_68 = arith.constant 5 : index
    %c0_69 = arith.constant 0 : index
    %230 = vector.load %arg16[%c5_68, %c0_69] : memref<8x16xf32, #tpu.memory_space<vmem>>, vector<1x16xf32>
    tpu.vector_store %arg16[%c5_68, %c0_69], %229 {strides = array<i32>} : memref<8x16xf32, #tpu.memory_space<vmem>>, vector<1x16xf32>,
    %231 = vector.extract_strided_slice %228 {offsets = [0, 16], sizes = [1, 16], strides = [1, 1]} : vector<1x32xf32> to vector<1x16xf32>
    %c2_70 = arith.constant 2 : index
    %c0_71 = arith.constant 0 : index
    %232 = vector.load %arg17[%c2_70, %c0_71] : memref<8x16xf32, #tpu.memory_space<vmem>>, vector<1x16xf32>
    tpu.vector_store %arg17[%c2_70, %c0_71], %231 {strides = array<i32>} : memref<8x16xf32, #tpu.memory_space<vmem>>, vector<1x16xf32>,
    %233 = arith.truncf %228 : vector<1x32xf32> to vector<1x32xbf16>
    %c6_72 = arith.constant 6 : index
    %c0_73 = arith.constant 0 : index
    %234 = vector.load %arg15[%c6_72, %c0_73] : memref<8x128xf32, #tpu.memory_space<vmem>>, vector<1x128xf32>
    %c1_74 = arith.constant 1 : index
    %c0_75 = arith.constant 0 : index
    %235 = vector.load %arg15[%c1_74, %c0_75] : memref<8x128xf32, #tpu.memory_space<vmem>>, vector<1x128xf32>
    %236 = arith.select %10, %234, %235 : vector<1x128xi1>, vector<1x128xf32>
    %cst_76 = arith.constant dense<0.000000e+00> : vector<1x128xf32>
    %237 = tpu.matmul %233, %7, %cst_76 {dimension_numbers = #tpu.dot_dimension_numbers<[1], [0], [0], [1], [0, 0, 1, 1], [], []>} : vector<1x32xbf16>, vector<32x128xbf16>, vector<1x128xf32> -> vector<1x128xf32>
    %238 = arith.addf %236, %237 : vector<1x128xf32>
    %cst_77 = arith.constant 0.000000e+00 : f32
    %239 = vector.broadcast %cst_77 : f32 to vector<1x128xf32>
    %240 = arith.subf %239, %238 : vector<1x128xf32>
    %241 = math.exp %240 : vector<1x128xf32>
    %cst_78 = arith.constant 1.000000e+00 : f32
    %242 = vector.broadcast %cst_78 : f32 to vector<1x128xf32>
    %243 = arith.addf %242, %241 : vector<1x128xf32>
    %244 = tpu.reciprocal %243 {approx = true} : vector<1x128xf32> -> vector<1x128xf32>
    %245 = math.tanh %238 : vector<1x128xf32>
    %246 = arith.select %21, %245, %244 : vector<1x128xi1>, vector<1x128xf32>
    %247 = vector.extract_strided_slice %246 {offsets = [0, 0], sizes = [1, 16], strides = [1, 1]} : vector<1x128xf32> to vector<1x16xf32>
    %248 = vector.extract_strided_slice %246 {offsets = [0, 64], sizes = [1, 16], strides = [1, 1]} : vector<1x128xf32> to vector<1x16xf32>
    %249 = tpu.concatenate %247, %248 in 1 : vector<1x16xf32>, vector<1x16xf32> -> vector<1x32xf32>
    %250 = vector.extract_strided_slice %246 {offsets = [0, 16], sizes = [1, 16], strides = [1, 1]} : vector<1x128xf32> to vector<1x16xf32>
    %251 = vector.extract_strided_slice %246 {offsets = [0, 80], sizes = [1, 16], strides = [1, 1]} : vector<1x128xf32> to vector<1x16xf32>
    %252 = tpu.concatenate %250, %251 in 1 : vector<1x16xf32>, vector<1x16xf32> -> vector<1x32xf32>
    %253 = vector.extract_strided_slice %246 {offsets = [0, 32], sizes = [1, 16], strides = [1, 1]} : vector<1x128xf32> to vector<1x16xf32>
    %254 = vector.extract_strided_slice %246 {offsets = [0, 96], sizes = [1, 16], strides = [1, 1]} : vector<1x128xf32> to vector<1x16xf32>
    %255 = tpu.concatenate %253, %254 in 1 : vector<1x16xf32>, vector<1x16xf32> -> vector<1x32xf32>
    %256 = vector.extract_strided_slice %246 {offsets = [0, 48], sizes = [1, 16], strides = [1, 1]} : vector<1x128xf32> to vector<1x16xf32>
    %257 = vector.extract_strided_slice %246 {offsets = [0, 112], sizes = [1, 16], strides = [1, 1]} : vector<1x128xf32> to vector<1x16xf32>
    %258 = tpu.concatenate %256, %257 in 1 : vector<1x16xf32>, vector<1x16xf32> -> vector<1x32xf32>
    %259 = arith.mulf %252, %226 : vector<1x32xf32>
    %260 = arith.mulf %249, %255 : vector<1x32xf32>
    %261 = arith.addf %259, %260 : vector<1x32xf32>
    %262 = math.tanh %261 : vector<1x32xf32>
    %263 = arith.mulf %258, %262 : vector<1x32xf32>
    %264 = vector.extract_strided_slice %263 {offsets = [0, 0], sizes = [1, 16], strides = [1, 1]} : vector<1x32xf32> to vector<1x16xf32>
    %c6_79 = arith.constant 6 : index
    %c0_80 = arith.constant 0 : index
    %265 = vector.load %arg16[%c6_79, %c0_80] : memref<8x16xf32, #tpu.memory_space<vmem>>, vector<1x16xf32>
    tpu.vector_store %arg16[%c6_79, %c0_80], %264 {strides = array<i32>} : memref<8x16xf32, #tpu.memory_space<vmem>>, vector<1x16xf32>,
    %266 = vector.extract_strided_slice %263 {offsets = [0, 16], sizes = [1, 16], strides = [1, 1]} : vector<1x32xf32> to vector<1x16xf32>
    %c1_81 = arith.constant 1 : index
    %c0_82 = arith.constant 0 : index
    %267 = vector.load %arg17[%c1_81, %c0_82] : memref<8x16xf32, #tpu.memory_space<vmem>>, vector<1x16xf32>
    tpu.vector_store %arg17[%c1_81, %c0_82], %266 {strides = array<i32>} : memref<8x16xf32, #tpu.memory_space<vmem>>, vector<1x16xf32>,
    %268 = arith.truncf %263 : vector<1x32xf32> to vector<1x32xbf16>
    %c7_83 = arith.constant 7 : index
    %c0_84 = arith.constant 0 : index
    %269 = vector.load %arg15[%c7_83, %c0_84] : memref<8x128xf32, #tpu.memory_space<vmem>>, vector<1x128xf32>
    %c0_85 = arith.constant 0 : index
    %c0_86 = arith.constant 0 : index
    %270 = vector.load %arg15[%c0_85, %c0_86] : memref<8x128xf32, #tpu.memory_space<vmem>>, vector<1x128xf32>
    %271 = arith.select %10, %269, %270 : vector<1x128xi1>, vector<1x128xf32>
    %cst_87 = arith.constant dense<0.000000e+00> : vector<1x128xf32>
    %272 = tpu.matmul %268, %7, %cst_87 {dimension_numbers = #tpu.dot_dimension_numbers<[1], [0], [0], [1], [0, 0, 1, 1], [], []>} : vector<1x32xbf16>, vector<32x128xbf16>, vector<1x128xf32> -> vector<1x128xf32>
    %273 = arith.addf %271, %272 : vector<1x128xf32>
    %cst_88 = arith.constant 0.000000e+00 : f32
    %274 = vector.broadcast %cst_88 : f32 to vector<1x128xf32>
    %275 = arith.subf %274, %273 : vector<1x128xf32>
    %276 = math.exp %275 : vector<1x128xf32>
    %cst_89 = arith.constant 1.000000e+00 : f32
    %277 = vector.broadcast %cst_89 : f32 to vector<1x128xf32>
    %278 = arith.addf %277, %276 : vector<1x128xf32>
    %279 = tpu.reciprocal %278 {approx = true} : vector<1x128xf32> -> vector<1x128xf32>
    %280 = math.tanh %273 : vector<1x128xf32>
    %281 = arith.select %21, %280, %279 : vector<1x128xi1>, vector<1x128xf32>
    %282 = vector.extract_strided_slice %281 {offsets = [0, 0], sizes = [1, 16], strides = [1, 1]} : vector<1x128xf32> to vector<1x16xf32>
    %283 = vector.extract_strided_slice %281 {offsets = [0, 64], sizes = [1, 16], strides = [1, 1]} : vector<1x128xf32> to vector<1x16xf32>
    %284 = tpu.concatenate %282, %283 in 1 : vector<1x16xf32>, vector<1x16xf32> -> vector<1x32xf32>
    %285 = vector.extract_strided_slice %281 {offsets = [0, 16], sizes = [1, 16], strides = [1, 1]} : vector<1x128xf32> to vector<1x16xf32>
    %286 = vector.extract_strided_slice %281 {offsets = [0, 80], sizes = [1, 16], strides = [1, 1]} : vector<1x128xf32> to vector<1x16xf32>
    %287 = tpu.concatenate %285, %286 in 1 : vector<1x16xf32>, vector<1x16xf32> -> vector<1x32xf32>
    %288 = vector.extract_strided_slice %281 {offsets = [0, 32], sizes = [1, 16], strides = [1, 1]} : vector<1x128xf32> to vector<1x16xf32>
    %289 = vector.extract_strided_slice %281 {offsets = [0, 96], sizes = [1, 16], strides = [1, 1]} : vector<1x128xf32> to vector<1x16xf32>
    %290 = tpu.concatenate %288, %289 in 1 : vector<1x16xf32>, vector<1x16xf32> -> vector<1x32xf32>
    %291 = vector.extract_strided_slice %281 {offsets = [0, 48], sizes = [1, 16], strides = [1, 1]} : vector<1x128xf32> to vector<1x16xf32>
    %292 = vector.extract_strided_slice %281 {offsets = [0, 112], sizes = [1, 16], strides = [1, 1]} : vector<1x128xf32> to vector<1x16xf32>
    %293 = tpu.concatenate %291, %292 in 1 : vector<1x16xf32>, vector<1x16xf32> -> vector<1x32xf32>
    %294 = arith.mulf %287, %261 : vector<1x32xf32>
    %295 = arith.mulf %284, %290 : vector<1x32xf32>
    %296 = arith.addf %294, %295 : vector<1x32xf32>
    %297 = math.tanh %296 : vector<1x32xf32>
    %298 = arith.mulf %293, %297 : vector<1x32xf32>
    %299 = vector.extract_strided_slice %298 {offsets = [0, 0], sizes = [1, 16], strides = [1, 1]} : vector<1x32xf32> to vector<1x16xf32>
    %c7_90 = arith.constant 7 : index
    %c0_91 = arith.constant 0 : index
    %300 = vector.load %arg16[%c7_90, %c0_91] : memref<8x16xf32, #tpu.memory_space<vmem>>, vector<1x16xf32>
    tpu.vector_store %arg16[%c7_90, %c0_91], %299 {strides = array<i32>} : memref<8x16xf32, #tpu.memory_space<vmem>>, vector<1x16xf32>,
    %301 = vector.extract_strided_slice %298 {offsets = [0, 16], sizes = [1, 16], strides = [1, 1]} : vector<1x32xf32> to vector<1x16xf32>
    %c0_92 = arith.constant 0 : index
    %c0_93 = arith.constant 0 : index
    %302 = vector.load %arg17[%c0_92, %c0_93] : memref<8x16xf32, #tpu.memory_space<vmem>>, vector<1x16xf32>
    tpu.vector_store %arg17[%c0_92, %c0_93], %301 {strides = array<i32>} : memref<8x16xf32, #tpu.memory_space<vmem>>, vector<1x16xf32>,
    %c0_94 = arith.constant 0 : index
    %c0_95 = arith.constant 0 : index
    %303 = vector.load %arg16[%c0_94, %c0_95] : memref<8x16xf32, #tpu.memory_space<vmem>>, vector<8x16xf32>
    %304 = arith.truncf %303 : vector<8x16xf32> to vector<8x16xbf16>
    %c0_96 = arith.constant 0 : index
    %c0_97 = arith.constant 0 : index
    %305 = vector.load %arg6[%c0_96, %c0_97] : memref<16x128xbf16, #tpu.memory_space<vmem>>, vector<16x128xbf16>
    %cst_98 = arith.constant dense<0.000000e+00> : vector<8x128xf32>
    %306 = tpu.matmul %304, %305, %cst_98 {dimension_numbers = #tpu.dot_dimension_numbers<[1], [0], [0], [1], [0, 0, 1, 1], [], []>} : vector<8x16xbf16>, vector<16x128xbf16>, vector<8x128xf32> -> vector<8x128xf32>
    %c0_99 = arith.constant 0 : index
    %c0_100 = arith.constant 0 : index
    %307 = vector.load %arg17[%c0_99, %c0_100] : memref<8x16xf32, #tpu.memory_space<vmem>>, vector<8x16xf32>
    %308 = arith.truncf %307 : vector<8x16xf32> to vector<8x16xbf16>
    %c0_101 = arith.constant 0 : index
    %c0_102 = arith.constant 0 : index
    %309 = vector.load %arg7[%c0_101, %c0_102] : memref<16x128xbf16, #tpu.memory_space<vmem>>, vector<16x128xbf16>
    %cst_103 = arith.constant dense<0.000000e+00> : vector<8x128xf32>
    %310 = tpu.matmul %308, %309, %cst_103 {dimension_numbers = #tpu.dot_dimension_numbers<[1], [0], [0], [1], [0, 0, 1, 1], [], []>} : vector<8x16xbf16>, vector<16x128xbf16>, vector<8x128xf32> -> vector<8x128xf32>
    %311 = arith.addf %306, %310 : vector<8x128xf32>
    %c0_104 = arith.constant 0 : index
    %c0_105 = arith.constant 0 : index
    %312 = vector.load %arg8[%c0_104, %c0_105] : memref<1x128xf32, #tpu.memory_space<vmem>>, vector<1x128xf32>
    %313 = vector.broadcast %312 : vector<1x128xf32> to vector<8x128xf32>
    %314 = arith.addf %311, %313 : vector<8x128xf32>
    %c0_106 = arith.constant 0 : index
    %c0_107 = arith.constant 0 : index
    %315 = vector.load %arg18[%c0_106, %c0_107] : memref<8x128xf32, #tpu.memory_space<vmem>>, vector<8x128xf32>
    tpu.vector_store %arg18[%c0_106, %c0_107], %314 {strides = array<i32>} : memref<8x128xf32, #tpu.memory_space<vmem>>, vector<8x128xf32>,
    %c0_108 = arith.constant 0 : index
    %c0_109 = arith.constant 0 : index
    %316 = vector.load %arg9[%c0_108, %c0_109] : memref<23x128xf32, #tpu.memory_space<vmem>>, vector<23x128xf32>
    %c0_110 = arith.constant 0 : index
    %c0_111 = arith.constant 0 : index
    %317 = vector.load %arg10[%c0_110, %c0_111] : memref<23x128xf32, #tpu.memory_space<vmem>>, vector<23x128xf32>
    %318 = tpu.iota {dimensions = array<i32: 1>} : vector<23x128xi32>
    %319 = tpu.iota {dimensions = array<i32: 0>} : vector<23x128xi32>
    %320 = arith.cmpi eq, %318, %319 : vector<23x128xi32>
    %321 = tpu.iota {dimensions = array<i32: 1>} : vector<1x128xi32>
    %322 = tpu.iota {dimensions = array<i32: 0>} : vector<23x1xi32>
    %c21_i32 = arith.constant 21 : i32
    %323 = vector.broadcast %c21_i32 : i32 to vector<1x128xi32>
    %324 = arith.cmpi eq, %321, %323 : vector<1x128xi32>
    %cst_112 = arith.constant 0.000000e+00 : f32
    %cst_113 = arith.constant -1.000000e+04 : f32
    %325 = vector.broadcast %cst_112 : f32 to vector<1x128xf32>
    %326 = vector.broadcast %cst_113 : f32 to vector<1x128xf32>
    %327 = arith.select %324, %325, %326 : vector<1x128xi1>, vector<1x128xf32>
    %c0_114 = arith.constant 0 : index
    %c0_115 = arith.constant 0 : index
    %328 = vector.load %arg18[%c0_114, %c0_115] : memref<8x128xf32, #tpu.memory_space<vmem>>, vector<1x128xf32>
    %cst_116 = arith.constant 0.000000e+00 : f32
    %329 = vector.shape_cast %328 : vector<1x128xf32> to vector<1x128xf32>
    %330 = vector.broadcast %329 : vector<1x128xf32> to vector<23x128xf32>
    %331 = vector.broadcast %cst_116 : f32 to vector<23x128xf32>
    %332 = arith.select %320, %330, %331 : vector<23x128xi1>, vector<23x128xf32>
    %cst_117 = arith.constant dense<0.000000e+00> : vector<23xf32>
    %333 = vector.multi_reduction <add>, %332, %cst_117 [1] : vector<23x128xf32> to vector<23xf32>
    %334 = vector.shape_cast %333 : vector<23xf32> to vector<23x1xf32>
    %335 = vector.broadcast %327 : vector<1x128xf32> to vector<23x128xf32>
    %336 = arith.addf %335, %316 : vector<23x128xf32>
    %cst_118 = arith.constant dense<0xFF800000> : vector<23xf32>
    %337 = vector.multi_reduction <maximumf>, %336, %cst_118 [1] : vector<23x128xf32> to vector<23xf32>
    %338 = vector.shape_cast %337 : vector<23xf32> to vector<23x1xf32>
    %339 = vector.broadcast %338 : vector<23x1xf32> to vector<23x128xf32>
    %340 = arith.cmpf oge, %336, %339 : vector<23x128xf32>
    %c128_i32 = arith.constant 128 : i32
    %341 = vector.broadcast %c128_i32 : i32 to vector<23x128xi32>
    %342 = arith.select %340, %318, %341 : vector<23x128xi1>, vector<23x128xi32>
    %cst_119 = arith.constant dense<2147483647> : vector<23xi32>
    %343 = vector.multi_reduction <minsi>, %342, %cst_119 [1] : vector<23x128xi32> to vector<23xi32>
    %344 = vector.shape_cast %343 : vector<23xi32> to vector<23x1xi32>
    %345 = arith.addf %338, %334 : vector<23x1xf32>
    %c1_120 = arith.constant 1 : index
    %c0_121 = arith.constant 0 : index
    %346 = vector.load %arg18[%c1_120, %c0_121] : memref<8x128xf32, #tpu.memory_space<vmem>>, vector<1x128xf32>
    %347 = vector.broadcast %345 : vector<23x1xf32> to vector<23x128xf32>
    %348 = arith.addf %347, %317 : vector<23x128xf32>
    %cst_122 = arith.constant dense<0xFF800000> : vector<128xf32>
    %349 = vector.multi_reduction <maximumf>, %348, %cst_122 [0] : vector<23x128xf32> to vector<128xf32>
    %350 = vector.shape_cast %349 : vector<128xf32> to vector<1x128xf32>
    %351 = vector.broadcast %350 : vector<1x128xf32> to vector<23x128xf32>
    %352 = arith.cmpf oge, %348, %351 : vector<23x128xf32>
    %c23_i32 = arith.constant 23 : i32
    %353 = vector.broadcast %c23_i32 : i32 to vector<23x128xi32>
    %354 = arith.select %352, %319, %353 : vector<23x128xi1>, vector<23x128xi32>
    %cst_123 = arith.constant dense<2147483647> : vector<128xi32>
    %355 = vector.multi_reduction <minsi>, %354, %cst_123 [0] : vector<23x128xi32> to vector<128xi32>
    %356 = vector.shape_cast %355 : vector<128xi32> to vector<1x128xi32>
    %357 = arith.addf %350, %346 : vector<1x128xf32>
    %c2_124 = arith.constant 2 : index
    %c0_125 = arith.constant 0 : index
    %358 = vector.load %arg18[%c2_124, %c0_125] : memref<8x128xf32, #tpu.memory_space<vmem>>, vector<1x128xf32>
    %cst_126 = arith.constant 0.000000e+00 : f32
    %359 = vector.shape_cast %358 : vector<1x128xf32> to vector<1x128xf32>
    %360 = vector.broadcast %359 : vector<1x128xf32> to vector<23x128xf32>
    %361 = vector.broadcast %cst_126 : f32 to vector<23x128xf32>
    %362 = arith.select %320, %360, %361 : vector<23x128xi1>, vector<23x128xf32>
    %cst_127 = arith.constant dense<0.000000e+00> : vector<23xf32>
    %363 = vector.multi_reduction <add>, %362, %cst_127 [1] : vector<23x128xf32> to vector<23xf32>
    %364 = vector.shape_cast %363 : vector<23xf32> to vector<23x1xf32>
    %365 = vector.broadcast %357 : vector<1x128xf32> to vector<23x128xf32>
    %366 = arith.addf %365, %316 : vector<23x128xf32>
    %cst_128 = arith.constant dense<0xFF800000> : vector<23xf32>
    %367 = vector.multi_reduction <maximumf>, %366, %cst_128 [1] : vector<23x128xf32> to vector<23xf32>
    %368 = vector.shape_cast %367 : vector<23xf32> to vector<23x1xf32>
    %369 = vector.broadcast %368 : vector<23x1xf32> to vector<23x128xf32>
    %370 = arith.cmpf oge, %366, %369 : vector<23x128xf32>
    %c128_i32_129 = arith.constant 128 : i32
    %371 = vector.broadcast %c128_i32_129 : i32 to vector<23x128xi32>
    %372 = arith.select %370, %318, %371 : vector<23x128xi1>, vector<23x128xi32>
    %cst_130 = arith.constant dense<2147483647> : vector<23xi32>
    %373 = vector.multi_reduction <minsi>, %372, %cst_130 [1] : vector<23x128xi32> to vector<23xi32>
    %374 = vector.shape_cast %373 : vector<23xi32> to vector<23x1xi32>
    %375 = arith.addf %368, %364 : vector<23x1xf32>
    %c3_131 = arith.constant 3 : index
    %c0_132 = arith.constant 0 : index
    %376 = vector.load %arg18[%c3_131, %c0_132] : memref<8x128xf32, #tpu.memory_space<vmem>>, vector<1x128xf32>
    %377 = vector.broadcast %375 : vector<23x1xf32> to vector<23x128xf32>
    %378 = arith.addf %377, %317 : vector<23x128xf32>
    %cst_133 = arith.constant dense<0xFF800000> : vector<128xf32>
    %379 = vector.multi_reduction <maximumf>, %378, %cst_133 [0] : vector<23x128xf32> to vector<128xf32>
    %380 = vector.shape_cast %379 : vector<128xf32> to vector<1x128xf32>
    %381 = vector.broadcast %380 : vector<1x128xf32> to vector<23x128xf32>
    %382 = arith.cmpf oge, %378, %381 : vector<23x128xf32>
    %c23_i32_134 = arith.constant 23 : i32
    %383 = vector.broadcast %c23_i32_134 : i32 to vector<23x128xi32>
    %384 = arith.select %382, %319, %383 : vector<23x128xi1>, vector<23x128xi32>
    %cst_135 = arith.constant dense<2147483647> : vector<128xi32>
    %385 = vector.multi_reduction <minsi>, %384, %cst_135 [0] : vector<23x128xi32> to vector<128xi32>
    %386 = vector.shape_cast %385 : vector<128xi32> to vector<1x128xi32>
    %387 = arith.addf %380, %376 : vector<1x128xf32>
    %c4_136 = arith.constant 4 : index
    %c0_137 = arith.constant 0 : index
    %388 = vector.load %arg18[%c4_136, %c0_137] : memref<8x128xf32, #tpu.memory_space<vmem>>, vector<1x128xf32>
    %cst_138 = arith.constant 0.000000e+00 : f32
    %389 = vector.shape_cast %388 : vector<1x128xf32> to vector<1x128xf32>
    %390 = vector.broadcast %389 : vector<1x128xf32> to vector<23x128xf32>
    %391 = vector.broadcast %cst_138 : f32 to vector<23x128xf32>
    %392 = arith.select %320, %390, %391 : vector<23x128xi1>, vector<23x128xf32>
    %cst_139 = arith.constant dense<0.000000e+00> : vector<23xf32>
    %393 = vector.multi_reduction <add>, %392, %cst_139 [1] : vector<23x128xf32> to vector<23xf32>
    %394 = vector.shape_cast %393 : vector<23xf32> to vector<23x1xf32>
    %395 = vector.broadcast %387 : vector<1x128xf32> to vector<23x128xf32>
    %396 = arith.addf %395, %316 : vector<23x128xf32>
    %cst_140 = arith.constant dense<0xFF800000> : vector<23xf32>
    %397 = vector.multi_reduction <maximumf>, %396, %cst_140 [1] : vector<23x128xf32> to vector<23xf32>
    %398 = vector.shape_cast %397 : vector<23xf32> to vector<23x1xf32>
    %399 = vector.broadcast %398 : vector<23x1xf32> to vector<23x128xf32>
    %400 = arith.cmpf oge, %396, %399 : vector<23x128xf32>
    %c128_i32_141 = arith.constant 128 : i32
    %401 = vector.broadcast %c128_i32_141 : i32 to vector<23x128xi32>
    %402 = arith.select %400, %318, %401 : vector<23x128xi1>, vector<23x128xi32>
    %cst_142 = arith.constant dense<2147483647> : vector<23xi32>
    %403 = vector.multi_reduction <minsi>, %402, %cst_142 [1] : vector<23x128xi32> to vector<23xi32>
    %404 = vector.shape_cast %403 : vector<23xi32> to vector<23x1xi32>
    %405 = arith.addf %398, %394 : vector<23x1xf32>
    %c5_143 = arith.constant 5 : index
    %c0_144 = arith.constant 0 : index
    %406 = vector.load %arg18[%c5_143, %c0_144] : memref<8x128xf32, #tpu.memory_space<vmem>>, vector<1x128xf32>
    %407 = vector.broadcast %405 : vector<23x1xf32> to vector<23x128xf32>
    %408 = arith.addf %407, %317 : vector<23x128xf32>
    %cst_145 = arith.constant dense<0xFF800000> : vector<128xf32>
    %409 = vector.multi_reduction <maximumf>, %408, %cst_145 [0] : vector<23x128xf32> to vector<128xf32>
    %410 = vector.shape_cast %409 : vector<128xf32> to vector<1x128xf32>
    %411 = vector.broadcast %410 : vector<1x128xf32> to vector<23x128xf32>
    %412 = arith.cmpf oge, %408, %411 : vector<23x128xf32>
    %c23_i32_146 = arith.constant 23 : i32
    %413 = vector.broadcast %c23_i32_146 : i32 to vector<23x128xi32>
    %414 = arith.select %412, %319, %413 : vector<23x128xi1>, vector<23x128xi32>
    %cst_147 = arith.constant dense<2147483647> : vector<128xi32>
    %415 = vector.multi_reduction <minsi>, %414, %cst_147 [0] : vector<23x128xi32> to vector<128xi32>
    %416 = vector.shape_cast %415 : vector<128xi32> to vector<1x128xi32>
    %417 = arith.addf %410, %406 : vector<1x128xf32>
    %c6_148 = arith.constant 6 : index
    %c0_149 = arith.constant 0 : index
    %418 = vector.load %arg18[%c6_148, %c0_149] : memref<8x128xf32, #tpu.memory_space<vmem>>, vector<1x128xf32>
    %cst_150 = arith.constant 0.000000e+00 : f32
    %419 = vector.shape_cast %418 : vector<1x128xf32> to vector<1x128xf32>
    %420 = vector.broadcast %419 : vector<1x128xf32> to vector<23x128xf32>
    %421 = vector.broadcast %cst_150 : f32 to vector<23x128xf32>
    %422 = arith.select %320, %420, %421 : vector<23x128xi1>, vector<23x128xf32>
    %cst_151 = arith.constant dense<0.000000e+00> : vector<23xf32>
    %423 = vector.multi_reduction <add>, %422, %cst_151 [1] : vector<23x128xf32> to vector<23xf32>
    %424 = vector.shape_cast %423 : vector<23xf32> to vector<23x1xf32>
    %425 = vector.broadcast %417 : vector<1x128xf32> to vector<23x128xf32>
    %426 = arith.addf %425, %316 : vector<23x128xf32>
    %cst_152 = arith.constant dense<0xFF800000> : vector<23xf32>
    %427 = vector.multi_reduction <maximumf>, %426, %cst_152 [1] : vector<23x128xf32> to vector<23xf32>
    %428 = vector.shape_cast %427 : vector<23xf32> to vector<23x1xf32>
    %429 = vector.broadcast %428 : vector<23x1xf32> to vector<23x128xf32>
    %430 = arith.cmpf oge, %426, %429 : vector<23x128xf32>
    %c128_i32_153 = arith.constant 128 : i32
    %431 = vector.broadcast %c128_i32_153 : i32 to vector<23x128xi32>
    %432 = arith.select %430, %318, %431 : vector<23x128xi1>, vector<23x128xi32>
    %cst_154 = arith.constant dense<2147483647> : vector<23xi32>
    %433 = vector.multi_reduction <minsi>, %432, %cst_154 [1] : vector<23x128xi32> to vector<23xi32>
    %434 = vector.shape_cast %433 : vector<23xi32> to vector<23x1xi32>
    %435 = arith.addf %428, %424 : vector<23x1xf32>
    %c7_155 = arith.constant 7 : index
    %c0_156 = arith.constant 0 : index
    %436 = vector.load %arg18[%c7_155, %c0_156] : memref<8x128xf32, #tpu.memory_space<vmem>>, vector<1x128xf32>
    %437 = vector.broadcast %435 : vector<23x1xf32> to vector<23x128xf32>
    %438 = arith.addf %437, %317 : vector<23x128xf32>
    %cst_157 = arith.constant dense<0xFF800000> : vector<128xf32>
    %439 = vector.multi_reduction <maximumf>, %438, %cst_157 [0] : vector<23x128xf32> to vector<128xf32>
    %440 = vector.shape_cast %439 : vector<128xf32> to vector<1x128xf32>
    %441 = vector.broadcast %440 : vector<1x128xf32> to vector<23x128xf32>
    %442 = arith.cmpf oge, %438, %441 : vector<23x128xf32>
    %c23_i32_158 = arith.constant 23 : i32
    %443 = vector.broadcast %c23_i32_158 : i32 to vector<23x128xi32>
    %444 = arith.select %442, %319, %443 : vector<23x128xi1>, vector<23x128xi32>
    %cst_159 = arith.constant dense<2147483647> : vector<128xi32>
    %445 = vector.multi_reduction <minsi>, %444, %cst_159 [0] : vector<23x128xi32> to vector<128xi32>
    %446 = vector.shape_cast %445 : vector<128xi32> to vector<1x128xi32>
    %447 = arith.addf %440, %436 : vector<1x128xf32>
    %c0_160 = arith.constant 0 : index
    %c0_161 = arith.constant 0 : index
    %448 = vector.load %arg11[%c0_160, %c0_161] : memref<1x128xf32, #tpu.memory_space<vmem>>, vector<1x128xf32>
    %449 = arith.addf %447, %448 : vector<1x128xf32>
    %cst_162 = arith.constant dense<0xFF800000> : vector<1xf32>
    %450 = vector.multi_reduction <maximumf>, %449, %cst_162 [1] : vector<1x128xf32> to vector<1xf32>
    %451 = vector.shape_cast %450 : vector<1xf32> to vector<1x1xf32>
    %452 = vector.broadcast %451 : vector<1x1xf32> to vector<1x128xf32>
    %453 = arith.cmpf oge, %449, %452 : vector<1x128xf32>
    %c128_i32_163 = arith.constant 128 : i32
    %454 = vector.broadcast %c128_i32_163 : i32 to vector<1x128xi32>
    %455 = arith.select %453, %321, %454 : vector<1x128xi1>, vector<1x128xi32>
    %cst_164 = arith.constant dense<2147483647> : vector<1xi32>
    %456 = vector.multi_reduction <minsi>, %455, %cst_164 [1] : vector<1x128xi32> to vector<1xi32>
    %457 = vector.shape_cast %456 : vector<1xi32> to vector<1x1xi32>
    %c0_165 = arith.constant 0 : index
    %c0_166 = arith.constant 0 : index
    %458 = vector.load %arg13[%c0_165, %c0_166] : memref<1x1xf32, #tpu.memory_space<vmem>>, vector<1x1xf32>
    tpu.vector_store %arg13[%c0_165, %c0_166], %451 {strides = array<i32>} : memref<1x1xf32, #tpu.memory_space<vmem>>, vector<1x1xf32>,
    %459 = tpu.iota {dimensions = array<i32: 1>} : vector<1x8xi32>
    %c0_i32 = arith.constant 0 : i32
    %460 = vector.broadcast %c0_i32 : i32 to vector<1x8xi32>
    %c7_i32 = arith.constant 7 : i32
    %461 = vector.broadcast %c7_i32 : i32 to vector<1x8xi32>
    %462 = arith.cmpi eq, %459, %461 : vector<1x8xi32>
    %463 = vector.shape_cast %457 : vector<1x1xi32> to vector<1x1xi32>
    %464 = vector.broadcast %463 : vector<1x1xi32> to vector<1x8xi32>
    %465 = arith.select %462, %464, %460 : vector<1x8xi1>, vector<1x8xi32>
    %466 = vector.broadcast %457 : vector<1x1xi32> to vector<1x128xi32>
    %467 = arith.cmpi eq, %321, %466 : vector<1x128xi32>
    %c0_i32_167 = arith.constant 0 : i32
    %468 = vector.broadcast %c0_i32_167 : i32 to vector<1x128xi32>
    %469 = arith.select %467, %446, %468 : vector<1x128xi1>, vector<1x128xi32>
    %cst_168 = arith.constant dense<-2147483648> : vector<1xi32>
    %470 = vector.multi_reduction <maxsi>, %469, %cst_168 [1] : vector<1x128xi32> to vector<1xi32>
    %471 = vector.shape_cast %470 : vector<1xi32> to vector<1x1xi32>
    %c6_i32 = arith.constant 6 : i32
    %472 = vector.broadcast %c6_i32 : i32 to vector<1x8xi32>
    %473 = arith.cmpi eq, %459, %472 : vector<1x8xi32>
    %474 = vector.shape_cast %471 : vector<1x1xi32> to vector<1x1xi32>
    %475 = vector.broadcast %474 : vector<1x1xi32> to vector<1x8xi32>
    %476 = arith.select %473, %475, %465 : vector<1x8xi1>, vector<1x8xi32>
    %477 = vector.broadcast %471 : vector<1x1xi32> to vector<23x1xi32>
    %478 = arith.cmpi eq, %322, %477 : vector<23x1xi32>
    %c0_i32_169 = arith.constant 0 : i32
    %479 = vector.broadcast %c0_i32_169 : i32 to vector<23x1xi32>
    %480 = arith.select %478, %434, %479 : vector<23x1xi1>, vector<23x1xi32>
    %cst_170 = arith.constant dense<-2147483648> : vector<1xi32>
    %481 = vector.multi_reduction <maxsi>, %480, %cst_170 [0] : vector<23x1xi32> to vector<1xi32>
    %482 = vector.shape_cast %481 : vector<1xi32> to vector<1x1xi32>
    %c5_i32 = arith.constant 5 : i32
    %483 = vector.broadcast %c5_i32 : i32 to vector<1x8xi32>
    %484 = arith.cmpi eq, %459, %483 : vector<1x8xi32>
    %485 = vector.shape_cast %482 : vector<1x1xi32> to vector<1x1xi32>
    %486 = vector.broadcast %485 : vector<1x1xi32> to vector<1x8xi32>
    %487 = arith.select %484, %486, %476 : vector<1x8xi1>, vector<1x8xi32>
    %488 = vector.broadcast %482 : vector<1x1xi32> to vector<1x128xi32>
    %489 = arith.cmpi eq, %321, %488 : vector<1x128xi32>
    %c0_i32_171 = arith.constant 0 : i32
    %490 = vector.broadcast %c0_i32_171 : i32 to vector<1x128xi32>
    %491 = arith.select %489, %416, %490 : vector<1x128xi1>, vector<1x128xi32>
    %cst_172 = arith.constant dense<-2147483648> : vector<1xi32>
    %492 = vector.multi_reduction <maxsi>, %491, %cst_172 [1] : vector<1x128xi32> to vector<1xi32>
    %493 = vector.shape_cast %492 : vector<1xi32> to vector<1x1xi32>
    %c4_i32 = arith.constant 4 : i32
    %494 = vector.broadcast %c4_i32 : i32 to vector<1x8xi32>
    %495 = arith.cmpi eq, %459, %494 : vector<1x8xi32>
    %496 = vector.shape_cast %493 : vector<1x1xi32> to vector<1x1xi32>
    %497 = vector.broadcast %496 : vector<1x1xi32> to vector<1x8xi32>
    %498 = arith.select %495, %497, %487 : vector<1x8xi1>, vector<1x8xi32>
    %499 = vector.broadcast %493 : vector<1x1xi32> to vector<23x1xi32>
    %500 = arith.cmpi eq, %322, %499 : vector<23x1xi32>
    %c0_i32_173 = arith.constant 0 : i32
    %501 = vector.broadcast %c0_i32_173 : i32 to vector<23x1xi32>
    %502 = arith.select %500, %404, %501 : vector<23x1xi1>, vector<23x1xi32>
    %cst_174 = arith.constant dense<-2147483648> : vector<1xi32>
    %503 = vector.multi_reduction <maxsi>, %502, %cst_174 [0] : vector<23x1xi32> to vector<1xi32>
    %504 = vector.shape_cast %503 : vector<1xi32> to vector<1x1xi32>
    %c3_i32 = arith.constant 3 : i32
    %505 = vector.broadcast %c3_i32 : i32 to vector<1x8xi32>
    %506 = arith.cmpi eq, %459, %505 : vector<1x8xi32>
    %507 = vector.shape_cast %504 : vector<1x1xi32> to vector<1x1xi32>
    %508 = vector.broadcast %507 : vector<1x1xi32> to vector<1x8xi32>
    %509 = arith.select %506, %508, %498 : vector<1x8xi1>, vector<1x8xi32>
    %510 = vector.broadcast %504 : vector<1x1xi32> to vector<1x128xi32>
    %511 = arith.cmpi eq, %321, %510 : vector<1x128xi32>
    %c0_i32_175 = arith.constant 0 : i32
    %512 = vector.broadcast %c0_i32_175 : i32 to vector<1x128xi32>
    %513 = arith.select %511, %386, %512 : vector<1x128xi1>, vector<1x128xi32>
    %cst_176 = arith.constant dense<-2147483648> : vector<1xi32>
    %514 = vector.multi_reduction <maxsi>, %513, %cst_176 [1] : vector<1x128xi32> to vector<1xi32>
    %515 = vector.shape_cast %514 : vector<1xi32> to vector<1x1xi32>
    %c2_i32 = arith.constant 2 : i32
    %516 = vector.broadcast %c2_i32 : i32 to vector<1x8xi32>
    %517 = arith.cmpi eq, %459, %516 : vector<1x8xi32>
    %518 = vector.shape_cast %515 : vector<1x1xi32> to vector<1x1xi32>
    %519 = vector.broadcast %518 : vector<1x1xi32> to vector<1x8xi32>
    %520 = arith.select %517, %519, %509 : vector<1x8xi1>, vector<1x8xi32>
    %521 = vector.broadcast %515 : vector<1x1xi32> to vector<23x1xi32>
    %522 = arith.cmpi eq, %322, %521 : vector<23x1xi32>
    %c0_i32_177 = arith.constant 0 : i32
    %523 = vector.broadcast %c0_i32_177 : i32 to vector<23x1xi32>
    %524 = arith.select %522, %374, %523 : vector<23x1xi1>, vector<23x1xi32>
    %cst_178 = arith.constant dense<-2147483648> : vector<1xi32>
    %525 = vector.multi_reduction <maxsi>, %524, %cst_178 [0] : vector<23x1xi32> to vector<1xi32>
    %526 = vector.shape_cast %525 : vector<1xi32> to vector<1x1xi32>
    %c1_i32 = arith.constant 1 : i32
    %527 = vector.broadcast %c1_i32 : i32 to vector<1x8xi32>
    %528 = arith.cmpi eq, %459, %527 : vector<1x8xi32>
    %529 = vector.shape_cast %526 : vector<1x1xi32> to vector<1x1xi32>
    %530 = vector.broadcast %529 : vector<1x1xi32> to vector<1x8xi32>
    %531 = arith.select %528, %530, %520 : vector<1x8xi1>, vector<1x8xi32>
    %532 = vector.broadcast %526 : vector<1x1xi32> to vector<1x128xi32>
    %533 = arith.cmpi eq, %321, %532 : vector<1x128xi32>
    %c0_i32_179 = arith.constant 0 : i32
    %534 = vector.broadcast %c0_i32_179 : i32 to vector<1x128xi32>
    %535 = arith.select %533, %356, %534 : vector<1x128xi1>, vector<1x128xi32>
    %cst_180 = arith.constant dense<-2147483648> : vector<1xi32>
    %536 = vector.multi_reduction <maxsi>, %535, %cst_180 [1] : vector<1x128xi32> to vector<1xi32>
    %537 = vector.shape_cast %536 : vector<1xi32> to vector<1x1xi32>
    %c0_i32_181 = arith.constant 0 : i32
    %538 = vector.broadcast %c0_i32_181 : i32 to vector<1x8xi32>
    %539 = arith.cmpi eq, %459, %538 : vector<1x8xi32>
    %540 = vector.shape_cast %537 : vector<1x1xi32> to vector<1x1xi32>
    %541 = vector.broadcast %540 : vector<1x1xi32> to vector<1x8xi32>
    %542 = arith.select %539, %541, %531 : vector<1x8xi1>, vector<1x8xi32>
    %543 = vector.broadcast %537 : vector<1x1xi32> to vector<23x1xi32>
    %544 = arith.cmpi eq, %322, %543 : vector<23x1xi32>
    %c0_i32_182 = arith.constant 0 : i32
    %545 = vector.broadcast %c0_i32_182 : i32 to vector<23x1xi32>
    %546 = arith.select %544, %344, %545 : vector<23x1xi1>, vector<23x1xi32>
    %cst_183 = arith.constant dense<-2147483648> : vector<1xi32>
    %547 = vector.multi_reduction <maxsi>, %546, %cst_183 [0] : vector<23x1xi32> to vector<1xi32>
    %548 = vector.shape_cast %547 : vector<1xi32> to vector<1x1xi32>
    %c0_184 = arith.constant 0 : index
    %c0_185 = arith.constant 0 : index
    %549 = vector.load %arg12[%c0_184, %c0_185] : memref<1x8xi32, #tpu.memory_space<vmem>>, vector<1x8xi32>
    tpu.vector_store %arg12[%c0_184, %c0_185], %542 {strides = array<i32>} : memref<1x8xi32, #tpu.memory_space<vmem>>, vector<1x8xi32>,
    %c0_186 = arith.constant 0 : index
    %c0_187 = arith.constant 0 : index
    %550 = vector.load %arg14[%c0_186, %c0_187] : memref<1x1xi32, #tpu.memory_space<vmem>>, vector<1x1xi32>
    tpu.vector_store %arg14[%c0_186, %c0_187], %548 {strides = array<i32>} : memref<1x1xi32, #tpu.memory_space<vmem>>, vector<1x1xi32>,
    return
  }
}

</mosaic_0001>

<bundles_post_ra>
// kernel: tpu_custom_call.1
= control target key start
LH: loop header
LB: loop body
LE: loop exit
PB: predicated region body
PF: predicated region fallthrough
CT: control target
= control target key end

     0   :  { %20 = vsyncpa [#allocation7], 0  ;;  %s2519_s0 = inlined_call_operand.hbm [shape: bf16[8,32], index: 0, kind: input, shape index: {}]   ;;  %s2520_s1 = inlined_call_operand.hbm [shape: bf16[32,128], index: 1, kind: input, shape index: {}]   ;;  %s2521_s2 = inlined_call_operand.vmem [shape: f32[1,128], index: 2, kind: input, shape index: {}]   ;;  %s2522_s3 = inlined_call_operand.hbm [shape: bf16[32,128], index: 3, kind: input, shape index: {}]   ;;  %s2523_s4 = inlined_call_operand.vmem [shape: bf16[1,32], index: 4, kind: input, shape index: {}]   ;;  %s2524_s5 = inlined_call_operand.vmem [shape: f32[1,32], index: 5, kind: input, shape index: {}]   ;;  %s2525_s6 = inlined_call_operand.hbm [shape: bf16[16,128], index: 6, kind: input, shape index: {}]   ;;  %s2526_s7 = inlined_call_operand.hbm [shape: bf16[16,128], index: 7, kind: input, shape index: {}]   ;;  %s2527_s8 = inlined_call_operand.vmem [shape: f32[1,128], index: 8, kind: input, shape index: {}]   ;;  %s2528_s9 = inlined_call_operand.hbm [shape: f32[23,128], index: 9, kind: input, shape index: {}]   ;;  %s2529_s10 = inlined_call_operand.hbm [shape: f32[23,128], index: 10, kind: input, shape index: {}]   ;;  %s2530_s11 = inlined_call_operand.vmem [shape: f32[1,128], index: 11, kind: input, shape index: {}]   ;;  %s2531_s12 = inlined_call_operand.hbm [shape: s32[1,8], index: 12, kind: output, shape index: {0}]   ;;  %s2532_s13 = inlined_call_operand.hbm [shape: f32[1,1], index: 13, kind: output, shape index: {1}]   ;;  %s2533_s14 = inlined_call_operand.hbm [shape: s32[1,1], index: 14, kind: output, shape index: {2}]  }
   0x1   :  { %21 = vsyncpa [#allocation10], 0 }
   0x2   :  { %22 = vsyncpa [#allocation13], 0 }
   0x3   :  { %23 = vsyncpa [#allocation16], 0 }
   0x4   :  { %24 = vsyncpa [#allocation8], 0  ;;  %s41_s15 = sshll.u32 %s2520_s1, 4  ;;  %s42_s15 = int_to_ptr.hbm [resolvable:$true] %s41_s15 }
   0x5   :  { %25 = vsyncpa [#allocation20], 0  ;;  %s1851_s16 = smov [#allocation9]   ;;  %s73_s20 = sshll.u32 %s2525_s6, 4  ;;  %s74_s20 = int_to_ptr.hbm [resolvable:$true] %s73_s20 }
   0x6   :  { %s43_s17 = sshll.u32 %s1851_s16, 4  ;;  %s1852_s21 = smov 64   ;;  %s44_s17 = int_to_ptr.vmem [resolvable:$true] %s43_s17 }
   0x7   :  { %s1853_s22 = smov 4   ;;  %s1854_s23 = smov [#allocation12]  }
   0x8   :  { %49 = dma.hbm_to_vmem [thread:$0]  %s42_s15, 256, %s44_s17, [#allocation10], %s1852_s21, %s1852_s21, %s1853_s22  }
   0x9   :  { %s75_s24 = sshll.u32 %s1854_s23, 4  ;;  %s101_s26 = sshll.u32 %s2528_s9, 4  ;;  %s76_s24 = int_to_ptr.vmem [resolvable:$true] %s75_s24  ;;  %s102_s26 = int_to_ptr.hbm [resolvable:$true] %s101_s26 }
   0xa   :  { %81 = dma.hbm_to_vmem [thread:$0]  %s74_s20, 128, %s76_s24, [#allocation13], %s1852_s21, %s1852_s21, %s1853_s22  }
   0xb   :  { %s1855_s6 = smov [#allocation15]   ;;  %s31_s30 = sshll.u32 %s2519_s0, 4  ;;  %s32_s30 = int_to_ptr.hbm [resolvable:$true] %s31_s30 }
   0xc   :  { %s103_s27 = sshll.u32 %s1855_s6, 4  ;;  %s1856_s15 = smov 128   ;;  %s104_s27 = int_to_ptr.vmem [resolvable:$true] %s103_s27 }
   0xd   :  { %s1857_s16 = smov 8   ;;  %s1858_s17 = smov [#allocation6]  }
   0xe   :  { %109 = dma.hbm_to_vmem [thread:$0]  %s102_s26, 384, %s104_s27, [#allocation16], %s1856_s15, %s1856_s15, %s1857_s16  }
   0xf   :  { %s33_s18 = sshll.u32 %s1858_s17, 4  ;;  %s56_s23 = sshll.u32 %s2522_s3, 4  ;;  %s34_s18 = int_to_ptr.vmem [resolvable:$true] %s33_s18  ;;  %s57_s23 = int_to_ptr.hbm [resolvable:$true] %s56_s23 }
  0x10   :  { %36 = dma.hbm_to_vmem [thread:$0]  %s32_s30, 64, %s34_s18, [#allocation7]  }
  0x11   :  { %s86_s25 = sshll.u32 %s2526_s7, 4  ;;  %s1859_s1 = smov [#allocation11]   ;;  %s87_s25 = int_to_ptr.hbm [resolvable:$true] %s86_s25 }
  0x12   :  { %s58_s6 = sshll.u32 %s1859_s1, 4  ;;  %s1860_s0 = smov [#allocation14]   ;;  %s59_s6 = int_to_ptr.vmem [resolvable:$true] %s58_s6 }
  0x13   :  { %64 = dma.hbm_to_vmem [thread:$0]  %s57_s23, 256, %s59_s6, [#allocation10], %s1852_s21, %s1852_s21, %s1853_s22  }
  0x14   :  { %s88_s26 = sshll.u32 %s1860_s0, 4  ;;  %s114_s3 = sshll.u32 %s2529_s10, 4  ;;  %s89_s26 = int_to_ptr.vmem [resolvable:$true] %s88_s26  ;;  %s115_s3 = int_to_ptr.hbm [resolvable:$true] %s114_s3 }
  0x15   :  { %94 = dma.hbm_to_vmem [thread:$0]  %s87_s25, 128, %s89_s26, [#allocation13], %s1852_s21, %s1852_s21, %s1853_s22  }
  0x16   :  { %s1861_s7 = smov [#allocation17]  }
  0x17   :  { %s116_s29 = sshll.u32 %s1861_s7, 4  ;;  %s117_s29 = int_to_ptr.vmem [resolvable:$true] %s116_s29 }
  0x18   :  { %122 = dma.hbm_to_vmem [thread:$0]  %s115_s3, 384, %s117_s29, [#allocation16], %s1856_s15, %s1856_s15, %s1857_s16  }
  0x19   :  { %1839 = dma.done.wait [#allocation7], 64  }
  0x1a   :  { %1840 = vsyncadd [#allocation7], 4294967232 }
  0x1b   :  { %1841 = dma.done.wait [#allocation10], 512  }
  0x1c   :  { %1842 = vsyncadd [#allocation10], 4294966784 }
  0x1d   :  { %1843 = dma.done.wait [#allocation13], 256  }
  0x1e   :  { %1844 = vsyncadd [#allocation13], 4294967040 }
  0x1f   :  { %1845 = dma.done.wait [#allocation16], 768  }
  0x20   :  { %1846 = vsyncadd [#allocation16], 4294966528  ;;  %v1504_v0 = vld [vmem:[#allocation9 + $0x8] sm:$0xff]  ;;  %v1506_v1 = vld [vmem:[#allocation11 + $0x8] sm:$0xff]  ;;  %vm175_vm0 = vcmask 261120   ;;  %v197_v8 = vlaneseq  ;;  %s1864_s16 = smov 32  }
  0x21   :  { %v1503_v2 = vld [vmem:[#allocation9] sm:$0xff]  ;;  %185 = vmatpush.bf16.msra.mxu0 %v1504_v0  ;;  %233 = vmatpush.bf16.msra.mxu1 %v1506_v1  ;;  %v1505_v3 = vld [vmem:[#allocation11] sm:$0xff]  ;;  %v154_v4 = vld [vmem:[#allocation6] sm:$0xf]  ;;  %s1865_s17 = smov 96   ;;  %s1866_s18 = smov 112  }
  0x22   :  { %297 = vmatpush.bf16.msra.mxu2 %v1506_v1  ;;  %359 = vmatpush.bf16.msra.mxu3 %v1506_v1  ;;  %v207_v5 = vld [vmem:[%s2523_s4] sm:$0x1]  ;;  %v1988_v11 = vand.u32 127, %v197_v8  ;;  %s1863_s4 = smov 80   ;;  %vm252_vm9 = vcmask 130048   ;;  %vm277_vm10 = vcmask 122880  }
  0x23   :  { %v1529_v6 = vld [vmem:[%s2521_s2] ss:$0 sm:$0xff]  ;;  %s1862_s2 = smov 48   ;;  %vm800_vm15 = vcmask 1046528   ;;  %s1435_s24 = sshll.u32 %s2532_s13, 4  ;;  %s1436_s24 = int_to_ptr.hbm [resolvable:$true] %s1435_s24 }
  0x24   :  { %vm199_vm1 = vcmp.lt.s32.totalorder %v1988_v11, 64  ;;  %vm200_vm2 = vcmp.ge.s32.totalorder %v1988_v11, 32  ;;  %vm201_vm3 = vcmp.lt.s32.totalorder %v1988_v11, 48  ;;  %vm203_vm4 = vcmp.ge.s32.totalorder %v1988_v11, 96  ;;  %v208_v30 = vld [vmem:[%s2524_s5] sm:$0x1] }
  0x25   :  { %186 = vmatpush.bf16.msra.mxu0 %v1503_v2  ;;  %234 = vmatpush.bf16.msra.mxu1 %v1505_v3  ;;  %vm204_vm5 = vcmp.lt.s32.totalorder %v1988_v11, 112  ;;  %vm202_vm6 = vmand %vm200_vm2, %vm201_vm3  ;;  %vm789_vm11 = vcmp.eq.s32.totalorder %v1988_v11, 21  ;;  %s1868_s25 = smov [#allocation19]   ;;  %s1869_s6 = smov [#allocation18]  }
  0x26   :  { %298 = vmatpush.bf16.msra.mxu2 %v1505_v3  ;;  %360 = vmatpush.bf16.msra.mxu3 %v1505_v3  ;;  %vm205_vm7 = vmand %vm203_vm4, %vm204_vm5  ;;  %s1433_s1 = sshll.u32 %s1868_s25, 4  ;;  %s1422_s0 = sshll.u32 %s1869_s6, 4  ;;  %s1434_s1 = int_to_ptr.vmem [resolvable:$true] %s1433_s1  ;;  %s1423_s0 = int_to_ptr.vmem [resolvable:$true] %s1422_s0 }
  0x27   :  { %vm1997_vm8 = vmor %vm202_vm6, %vm205_vm7  ;;  %s1424_s27 = sshll.u32 %s2531_s12, 4  ;;  %s1870_s12 = smov [#allocation21]   ;;  %s1425_s27 = int_to_ptr.hbm [resolvable:$true] %s1424_s27 }
  0x28   :  { %1476 = vmatmul.msk.bf16.vlgmr.msra.gmra.mxu0 %vm175_vm0, %v154_v4  ;;  %1485 = vmatmul.msk.bf16.vlgmr.msra.gmra.mxu1 %vm175_vm0, %v207_v5  ;;  %s1444_s28 = sshll.u32 %s1870_s12, 4  ;;  %s1446_s29 = sshll.u32 %s2533_s14, 4  ;;  %s1445_s28 = int_to_ptr.vmem [resolvable:$true] %s1444_s28  ;;  %s1447_s29 = int_to_ptr.hbm [resolvable:$true] %s1446_s29 }
  0x29   :  { %421 = vmatpush.bf16.msrb.mxu0 %v1506_v1  ;;  %483 = vmatpush.bf16.msrb.mxu1 %v1506_v1 }
  0x2a   :  { %545 = vmatpush.bf16.msrb.mxu2 %v1506_v1  ;;  %607 = vmatpush.bf16.msrb.mxu3 %v1506_v1 }
  0x2d   :  { %422 = vmatpush.bf16.msrb.mxu0 %v1505_v3  ;;  %484 = vmatpush.bf16.msrb.mxu1 %v1505_v3 }
  0x2e   :  { %546 = vmatpush.bf16.msrb.mxu2 %v1505_v3  ;;  %608 = vmatpush.bf16.msrb.mxu3 %v1505_v3 }
  0x31   :  { %669 = vmatpush.bf16.msra.mxu0 %v1506_v1 }
  0x35   :  { %670 = vmatpush.bf16.msra.mxu0 %v1505_v3 }
  0xa5   :  { %v188_v7 = vpop.f32.mrf.mxu0  ;;  %v236_v9 = vpop.f32.mrf.mxu1 }
  0xa6   :  { %v189_v10 = vadd.f32 %v1529_v6, %v188_v7 }
  0xa8   :  { %192 = vst [vmem:[#allocation2] sm:$0xff] %v189_v10 }
  0xad   :  { %v190_v12 = vpop.f32.mrf.mxu0  ;;  %v238_v13 = vpop.f32.mrf.mxu1 }
  0xaf   :  { %v209_v14 = vld [vmem:[#allocation2] sm:$0x1]  ;;  %v210_v15 = vld [vmem:[#allocation2 + $0x7] sm:$0x1]  ;;  %v285_v43 = vld [vmem:[#allocation2 + $0x1] sm:$0x1] }
  0xb0   :  { %v211_v16 = vsel %vm199_vm1, %v209_v14, %v210_v15  ;;  %v286_v44 = vld [vmem:[#allocation2 + $0x6] sm:$0x1]  ;;  %v348_v10 = vld [vmem:[#allocation2 + $0x5] sm:$0x1] }
  0xb1   :  { %v240_v17 = vadd.f32 %v236_v9, %v211_v16  ;;  %v287_v45 = vsel %vm199_vm1, %v285_v43, %v286_v44  ;;  %v347_v9 = vld [vmem:[#allocation2 + $0x2] sm:$0x1] }
  0xb2   :  { %v349_v12 = vsel %vm199_vm1, %v347_v9, %v348_v10  ;;  %v472_v9 = vld [vmem:[#allocation2 + $0x3] sm:$0x1] }
  0xb3   :  { %v241_v18 = vsub.f32 0.0, %v240_v17 }
  0xb5   :  { %v242_v19 = vmul.f32 1.442695, %v241_v18 }
  0xb7   :  { %1535 = vpow2.f32 %v242_v19 }
  0xb8   :  { %1537 = vtanh.f32 %v240_v17 }
  0xbd   :  { %v1536_v20 = vpop.eup %1535 }
  0xbe   :  { %v244_v21 = vadd.f32 1.0, %v1536_v20  ;;  %v1538_v23 = vpop.eup %1537 }
  0xc0   :  { %1539 = vrcp.f32 %v244_v21 }
  0xc6   :  { %v1540_v24 = vpop.eup %1539 }
  0xc7   :  { %v247_v25 = vsel %vm1997_vm8, %v1538_v23, %v1540_v24 }
  0xc8   :  { %264 = vrot.lane.b32.xlu2 %v247_v25, %s1862_s2  ;;  %257 = vrot.lane.b32.xlu1 %v247_v25, %s1852_s21 }
  0xc9   :  { %249 = vrot.lane.b32.xlu0 %v247_v25, %s1863_s4 }
  0xd0   :  { %268 = vrot.lane.b32.xlu2 %v247_v25, %s1864_s16  ;;  %261 = vrot.lane.b32.xlu1 %v247_v25, %s1865_s17 }
  0xd1   :  { %254 = vrot.lane.b32.xlu0 %v247_v25, %s1866_s18 }
 0x122   :  { %v265_v28 = vpop.permute.xlu2 %264 }
 0x12a   :  { %v269_v38 = vpop.permute.xlu2 %268 }
 0x13a   :  { %v258_v26 = vpop.permute.xlu1 %257 }
 0x13b   :  { %v250_v27 = vpop.permute.xlu0 %249 }
 0x13c   :  { %v253_v31 = vsel %vm252_vm9, %v247_v25, %v250_v27  ;;  %v271_v40 = vsel %vm252_vm9, %v250_v27, %v269_v38 }
 0x142   :  { %v262_v29 = vpop.permute.xlu1 %261 }
 0x143   :  { %v267_v32 = vsel %vm252_vm9, %v262_v29, %v265_v28  ;;  %v255_v33 = vpop.permute.xlu0 %254 }
 0x144   :  { %v273_v34 = vmul.f32 %v267_v32, %v253_v31  ;;  %v260_v35 = vsel %vm252_vm9, %v255_v33, %v258_v26 }
 0x145   :  { %v272_v36 = vmul.f32 %v260_v35, %v208_v30 }
 0x147   :  { %v274_v37 = vadd.f32 %v273_v34, %v272_v36 }
 0x149   :  { %1541 = vtanh.f32 %v274_v37 }
 0x14f   :  { %v1542_v39 = vpop.eup %1541 }
 0x150   :  { %v2016_v41 = vmul.f32 %v1542_v39, %v271_v40  ;;  %v409_v40 = vld [vmem:[#allocation2 + $0x3] sm:$0x1] }
 0x152   :  { %278 = vst.msk [vmem:[#allocation3] sm:$0x1] %vm277_vm10, %v2016_v41  ;;  %v284_v42 = vpack.c.bf16 %v2016_v41, %v2016_v41 }
 0x154   :  { %1486 = vmatmul.msk.bf16.vlgmr.msra.gmra.mxu2 %vm175_vm0, %v284_v42  ;;  %v410_v42 = vld [vmem:[#allocation2 + $0x4] sm:$0x1] }
 0x155   :  { %v411_v43 = vsel %vm199_vm1, %v409_v40, %v410_v42  ;;  %v533_v40 = vld [vmem:[#allocation2 + $0x5] sm:$0x1]  ;;  %v534_v42 = vld [vmem:[#allocation2 + $0x2] sm:$0x1] }
 0x1d7   :  { %v300_v46 = vpop.f32.mrf.mxu2 }
 0x1d8   :  { %v304_v47 = vadd.f32 %v300_v46, %v287_v45 }
 0x1da   :  { %v305_v48 = vsub.f32 0.0, %v304_v47 }
 0x1dc   :  { %v306_v49 = vmul.f32 1.442695, %v305_v48 }
 0x1de   :  { %1543 = vpow2.f32 %v306_v49 }
 0x1df   :  { %v302_v50 = vpop.f32.mrf.mxu2  ;;  %1545 = vtanh.f32 %v304_v47 }
 0x1e4   :  { %v1544_v51 = vpop.eup %1543 }
 0x1e5   :  { %v308_v52 = vadd.f32 1.0, %v1544_v51  ;;  %v1546_v53 = vpop.eup %1545 }
 0x1e7   :  { %1547 = vrcp.f32 %v308_v52 }
 0x1ed   :  { %v1548_v54 = vpop.eup %1547 }
 0x1ee   :  { %v311_v55 = vsel %vm1997_vm8, %v1546_v53, %v1548_v54 }
 0x1ef   :  { %320 = vrot.lane.b32.xlu2 %v311_v55, %s1852_s21  ;;  %317 = vrot.lane.b32.xlu1 %v311_v55, %s1866_s18 }
 0x1f0   :  { %313 = vrot.lane.b32.xlu0 %v311_v55, %s1863_s4 }
 0x1f7   :  { %331 = vrot.lane.b32.xlu2 %v311_v55, %s1864_s16  ;;  %327 = vrot.lane.b32.xlu1 %v311_v55, %s1862_s2 }
 0x1f8   :  { %324 = vrot.lane.b32.xlu0 %v311_v55, %s1865_s17 }
 0x249   :  { %v321_v58 = vpop.permute.xlu2 %320 }
 0x251   :  { %v332_v3 = vpop.permute.xlu2 %331 }
 0x261   :  { %v318_v56 = vpop.permute.xlu1 %317 }
 0x262   :  { %v314_v57 = vpop.permute.xlu0 %313  ;;  %v323_v59 = vsel %vm252_vm9, %v318_v56, %v321_v58 }
 0x263   :  { %v316_v62 = vsel %vm252_vm9, %v311_v55, %v314_v57  ;;  %v335_v0 = vmul.f32 %v323_v59, %v274_v37  ;;  %v334_v5 = vsel %vm252_vm9, %v314_v57, %v332_v3 }
 0x269   :  { %v328_v60 = vpop.permute.xlu1 %327 }
 0x26a   :  { %v325_v61 = vpop.permute.xlu0 %324 }
 0x26b   :  { %v330_v63 = vsel %vm252_vm9, %v325_v61, %v328_v60 }
 0x26c   :  { %v336_v1 = vmul.f32 %v330_v63, %v316_v62 }
 0x26e   :  { %v337_v2 = vadd.f32 %v336_v1, %v335_v0 }
 0x270   :  { %1549 = vtanh.f32 %v337_v2 }
 0x276   :  { %v1550_v4 = vpop.eup %1549 }
 0x277   :  { %v2037_v6 = vmul.f32 %v1550_v4, %v334_v5 }
 0x279   :  { %340 = vst.msk [vmem:[#allocation3 + $0x1] sm:$0x1] %vm277_vm10, %v2037_v6  ;;  %v346_v7 = vpack.c.bf16 %v2037_v6, %v2037_v6 }
 0x27b   :  { %1487 = vmatmul.msk.bf16.vlgmr.msra.gmra.mxu3 %vm175_vm0, %v346_v7  ;;  %v471_v7 = vld [vmem:[#allocation2 + $0x4] sm:$0x1] }
 0x27c   :  { %v473_v10 = vsel %vm199_vm1, %v471_v7, %v472_v9  ;;  %v595_v9 = vld [vmem:[#allocation2 + $0x6] sm:$0x1] }
 0x2fe   :  { %v362_v13 = vpop.f32.mrf.mxu3 }
 0x2ff   :  { %v366_v14 = vadd.f32 %v362_v13, %v349_v12 }
 0x301   :  { %v367_v15 = vsub.f32 0.0, %v366_v14 }
 0x303   :  { %v368_v16 = vmul.f32 1.442695, %v367_v15 }
 0x305   :  { %1551 = vpow2.f32 %v368_v16 }
 0x306   :  { %v364_v17 = vpop.f32.mrf.mxu3  ;;  %1553 = vtanh.f32 %v366_v14 }
 0x30b   :  { %v1552_v18 = vpop.eup %1551 }
 0x30c   :  { %v370_v19 = vadd.f32 1.0, %v1552_v18  ;;  %v1554_v20 = vpop.eup %1553 }
 0x30e   :  { %1555 = vrcp.f32 %v370_v19 }
 0x314   :  { %v1556_v21 = vpop.eup %1555 }
 0x315   :  { %v373_v23 = vsel %vm1997_vm8, %v1554_v20, %v1556_v21 }
 0x316   :  { %382 = vrot.lane.b32.xlu2 %v373_v23, %s1852_s21  ;;  %379 = vrot.lane.b32.xlu1 %v373_v23, %s1866_s18 }
 0x317   :  { %375 = vrot.lane.b32.xlu0 %v373_v23, %s1863_s4 }
 0x31e   :  { %393 = vrot.lane.b32.xlu2 %v373_v23, %s1864_s16  ;;  %389 = vrot.lane.b32.xlu1 %v373_v23, %s1862_s2 }
 0x31f   :  { %386 = vrot.lane.b32.xlu0 %v373_v23, %s1865_s17 }
 0x370   :  { %v383_v26 = vpop.permute.xlu2 %382 }
 0x378   :  { %v394_v35 = vpop.permute.xlu2 %393 }
 0x388   :  { %v380_v24 = vpop.permute.xlu1 %379 }
 0x389   :  { %v376_v25 = vpop.permute.xlu0 %375  ;;  %v385_v27 = vsel %vm252_vm9, %v380_v24, %v383_v26 }
 0x38a   :  { %v378_v30 = vsel %vm252_vm9, %v373_v23, %v376_v25  ;;  %v397_v32 = vmul.f32 %v385_v27, %v337_v2  ;;  %v396_v37 = vsel %vm252_vm9, %v376_v25, %v394_v35 }
 0x390   :  { %v390_v28 = vpop.permute.xlu1 %389 }
 0x391   :  { %v387_v29 = vpop.permute.xlu0 %386 }
 0x392   :  { %v392_v31 = vsel %vm252_vm9, %v387_v29, %v390_v28 }
 0x393   :  { %v398_v33 = vmul.f32 %v392_v31, %v378_v30 }
 0x395   :  { %v399_v34 = vadd.f32 %v398_v33, %v397_v32 }
 0x397   :  { %1557 = vtanh.f32 %v399_v34 }
 0x39d   :  { %v1558_v36 = vpop.eup %1557 }
 0x39e   :  { %v2058_v38 = vmul.f32 %v1558_v36, %v396_v37 }
 0x3a0   :  { %402 = vst.msk [vmem:[#allocation3 + $0x2] sm:$0x1] %vm277_vm10, %v2058_v38  ;;  %v408_v39 = vpack.c.bf16 %v2058_v38, %v2058_v38 }
 0x3a2   :  { %1488 = vmatmul.msk.bf16.vlgmr.msrb.gmra.mxu0 %vm175_vm0, %v408_v39 }
 0x41f   :  { %v424_v44 = vpop.f32.mrf.mxu0 }
 0x420   :  { %v428_v45 = vadd.f32 %v424_v44, %v411_v43  ;;  %v535_v43 = vsel %vm199_vm1, %v533_v40, %v534_v42 }
 0x422   :  { %v429_v46 = vsub.f32 0.0, %v428_v45 }
 0x424   :  { %v430_v47 = vmul.f32 1.442695, %v429_v46 }
 0x426   :  { %1559 = vpow2.f32 %v430_v47 }
 0x427   :  { %v426_v48 = vpop.f32.mrf.mxu0  ;;  %1561 = vtanh.f32 %v428_v45 }
 0x42c   :  { %v1560_v49 = vpop.eup %1559 }
 0x42d   :  { %v432_v50 = vadd.f32 1.0, %v1560_v49  ;;  %v1562_v51 = vpop.eup %1561 }
 0x42f   :  { %1563 = vrcp.f32 %v432_v50 }
 0x435   :  { %v1564_v52 = vpop.eup %1563 }
 0x436   :  { %v435_v53 = vsel %vm1997_vm8, %v1562_v51, %v1564_v52 }
 0x437   :  { %444 = vrot.lane.b32.xlu2 %v435_v53, %s1852_s21  ;;  %441 = vrot.lane.b32.xlu1 %v435_v53, %s1866_s18 }
 0x438   :  { %437 = vrot.lane.b32.xlu0 %v435_v53, %s1863_s4 }
 0x43f   :  { %455 = vrot.lane.b32.xlu2 %v435_v53, %s1864_s16  ;;  %451 = vrot.lane.b32.xlu1 %v435_v53, %s1862_s2 }
 0x440   :  { %448 = vrot.lane.b32.xlu0 %v435_v53, %s1865_s17 }
 0x491   :  { %v445_v56 = vpop.permute.xlu2 %444 }
 0x499   :  { %v456_v1 = vpop.permute.xlu2 %455 }
 0x4a9   :  { %v442_v54 = vpop.permute.xlu1 %441 }
 0x4aa   :  { %v438_v55 = vpop.permute.xlu0 %437  ;;  %v447_v57 = vsel %vm252_vm9, %v442_v54, %v445_v56 }
 0x4ab   :  { %v440_v60 = vsel %vm252_vm9, %v435_v53, %v438_v55  ;;  %v459_v62 = vmul.f32 %v447_v57, %v399_v34  ;;  %v458_v3 = vsel %vm252_vm9, %v438_v55, %v456_v1 }
 0x4b1   :  { %v452_v58 = vpop.permute.xlu1 %451 }
 0x4b2   :  { %v449_v59 = vpop.permute.xlu0 %448 }
 0x4b3   :  { %v454_v61 = vsel %vm252_vm9, %v449_v59, %v452_v58 }
 0x4b4   :  { %v460_v63 = vmul.f32 %v454_v61, %v440_v60 }
 0x4b6   :  { %v461_v0 = vadd.f32 %v460_v63, %v459_v62 }
 0x4b8   :  { %1565 = vtanh.f32 %v461_v0 }
 0x4be   :  { %v1566_v2 = vpop.eup %1565 }
 0x4bf   :  { %v2079_v4 = vmul.f32 %v1566_v2, %v458_v3 }
 0x4c1   :  { %464 = vst.msk [vmem:[#allocation3 + $0x3] sm:$0x1] %vm277_vm10, %v2079_v4  ;;  %v470_v5 = vpack.c.bf16 %v2079_v4, %v2079_v4 }
 0x4c3   :  { %1489 = vmatmul.msk.bf16.vlgmr.msrb.gmra.mxu1 %vm175_vm0, %v470_v5 }
 0x540   :  { %v486_v12 = vpop.f32.mrf.mxu1 }
 0x541   :  { %v490_v13 = vadd.f32 %v486_v12, %v473_v10  ;;  %v596_v10 = vld [vmem:[#allocation2 + $0x1] sm:$0x1] }
 0x542   :  { %v597_v12 = vsel %vm199_vm1, %v595_v9, %v596_v10 }
 0x543   :  { %v491_v14 = vsub.f32 0.0, %v490_v13 }
 0x545   :  { %v492_v15 = vmul.f32 1.442695, %v491_v14 }
 0x547   :  { %1567 = vpow2.f32 %v492_v15 }
 0x548   :  { %v488_v16 = vpop.f32.mrf.mxu1  ;;  %1569 = vtanh.f32 %v490_v13 }
 0x54d   :  { %v1568_v17 = vpop.eup %1567 }
 0x54e   :  { %v494_v18 = vadd.f32 1.0, %v1568_v17  ;;  %v1570_v19 = vpop.eup %1569 }
 0x550   :  { %1571 = vrcp.f32 %v494_v18 }
 0x556   :  { %v1572_v20 = vpop.eup %1571 }
 0x557   :  { %v497_v21 = vsel %vm1997_vm8, %v1570_v19, %v1572_v20 }
 0x558   :  { %506 = vrot.lane.b32.xlu2 %v497_v21, %s1852_s21  ;;  %503 = vrot.lane.b32.xlu1 %v497_v21, %s1866_s18 }
 0x559   :  { %499 = vrot.lane.b32.xlu0 %v497_v21, %s1863_s4 }
 0x560   :  { %517 = vrot.lane.b32.xlu2 %v497_v21, %s1864_s16  ;;  %513 = vrot.lane.b32.xlu1 %v497_v21, %s1862_s2 }
 0x561   :  { %510 = vrot.lane.b32.xlu0 %v497_v21, %s1865_s17 }
 0x5b2   :  { %v507_v25 = vpop.permute.xlu2 %506 }
 0x5ba   :  { %v518_v34 = vpop.permute.xlu2 %517 }
 0x5ca   :  { %v504_v23 = vpop.permute.xlu1 %503 }
 0x5cb   :  { %v500_v24 = vpop.permute.xlu0 %499  ;;  %v509_v26 = vsel %vm252_vm9, %v504_v23, %v507_v25 }
 0x5cc   :  { %v502_v29 = vsel %vm252_vm9, %v497_v21, %v500_v24  ;;  %v521_v31 = vmul.f32 %v509_v26, %v461_v0  ;;  %v520_v36 = vsel %vm252_vm9, %v500_v24, %v518_v34 }
 0x5d2   :  { %v514_v27 = vpop.permute.xlu1 %513 }
 0x5d3   :  { %v511_v28 = vpop.permute.xlu0 %510 }
 0x5d4   :  { %v516_v30 = vsel %vm252_vm9, %v511_v28, %v514_v27 }
 0x5d5   :  { %v522_v32 = vmul.f32 %v516_v30, %v502_v29 }
 0x5d7   :  { %v523_v33 = vadd.f32 %v522_v32, %v521_v31 }
 0x5d9   :  { %1573 = vtanh.f32 %v523_v33 }
 0x5df   :  { %v1574_v35 = vpop.eup %1573 }
 0x5e0   :  { %v2100_v37 = vmul.f32 %v1574_v35, %v520_v36 }
 0x5e2   :  { %526 = vst.msk [vmem:[#allocation3 + $0x4] sm:$0x1] %vm277_vm10, %v2100_v37  ;;  %v532_v39 = vpack.c.bf16 %v2100_v37, %v2100_v37 }
 0x5e4   :  { %1490 = vmatmul.msk.bf16.vlgmr.msrb.gmra.mxu2 %vm175_vm0, %v532_v39 }
 0x667   :  { %v548_v44 = vpop.f32.mrf.mxu2 }
 0x668   :  { %v552_v45 = vadd.f32 %v548_v44, %v535_v43  ;;  %v657_v43 = vld [vmem:[#allocation2 + $0x7] sm:$0x1]  ;;  %v658_v44 = vld [vmem:[#allocation2] sm:$0x1] }
 0x66a   :  { %v553_v46 = vsub.f32 0.0, %v552_v45 }
 0x66c   :  { %v554_v47 = vmul.f32 1.442695, %v553_v46 }
 0x66e   :  { %1575 = vpow2.f32 %v554_v47 }
 0x66f   :  { %v550_v48 = vpop.f32.mrf.mxu2  ;;  %1577 = vtanh.f32 %v552_v45  ;;  %v659_v45 = vsel %vm199_vm1, %v657_v43, %v658_v44 }
 0x674   :  { %v1576_v49 = vpop.eup %1575 }
 0x675   :  { %v556_v50 = vadd.f32 1.0, %v1576_v49  ;;  %v1578_v51 = vpop.eup %1577 }
 0x677   :  { %1579 = vrcp.f32 %v556_v50 }
 0x67d   :  { %v1580_v52 = vpop.eup %1579 }
 0x67e   :  { %v559_v53 = vsel %vm1997_vm8, %v1578_v51, %v1580_v52 }
 0x67f   :  { %568 = vrot.lane.b32.xlu2 %v559_v53, %s1852_s21  ;;  %565 = vrot.lane.b32.xlu1 %v559_v53, %s1866_s18 }
 0x680   :  { %561 = vrot.lane.b32.xlu0 %v559_v53, %s1863_s4 }
 0x687   :  { %579 = vrot.lane.b32.xlu2 %v559_v53, %s1864_s16  ;;  %575 = vrot.lane.b32.xlu1 %v559_v53, %s1862_s2 }
 0x688   :  { %572 = vrot.lane.b32.xlu0 %v559_v53, %s1865_s17 }
 0x6d9   :  { %v569_v56 = vpop.permute.xlu2 %568 }
 0x6e1   :  { %v580_v1 = vpop.permute.xlu2 %579 }
 0x6f1   :  { %v566_v54 = vpop.permute.xlu1 %565 }
 0x6f2   :  { %v562_v55 = vpop.permute.xlu0 %561  ;;  %v571_v57 = vsel %vm252_vm9, %v566_v54, %v569_v56 }
 0x6f3   :  { %v564_v60 = vsel %vm252_vm9, %v559_v53, %v562_v55  ;;  %v583_v62 = vmul.f32 %v571_v57, %v523_v33  ;;  %v582_v3 = vsel %vm252_vm9, %v562_v55, %v580_v1 }
 0x6f9   :  { %v576_v58 = vpop.permute.xlu1 %575 }
 0x6fa   :  { %v573_v59 = vpop.permute.xlu0 %572 }
 0x6fb   :  { %v578_v61 = vsel %vm252_vm9, %v573_v59, %v576_v58  ;;  %v1508_v59 = vld [vmem:[#allocation14] sm:$0xff] }
 0x6fc   :  { %v584_v63 = vmul.f32 %v578_v61, %v564_v60  ;;  %742 = vmatpush.bf16.msra.mxu1 %v1508_v59 }
 0x6fe   :  { %v585_v0 = vadd.f32 %v584_v63, %v583_v62 }
 0x700   :  { %1581 = vtanh.f32 %v585_v0 }
 0x706   :  { %v1582_v2 = vpop.eup %1581 }
 0x707   :  { %v2121_v5 = vmul.f32 %v1582_v2, %v582_v3 }
 0x709   :  { %588 = vst.msk [vmem:[#allocation3 + $0x5] sm:$0x1] %vm277_vm10, %v2121_v5  ;;  %v594_v7 = vpack.c.bf16 %v2121_v5, %v2121_v5 }
 0x70b   :  { %1491 = vmatmul.msk.bf16.vlgmr.msrb.gmra.mxu3 %vm175_vm0, %v594_v7 }
 0x78e   :  { %v610_v13 = vpop.f32.mrf.mxu3 }
 0x78f   :  { %v614_v14 = vadd.f32 %v610_v13, %v597_v12 }
 0x791   :  { %v615_v15 = vsub.f32 0.0, %v614_v14 }
 0x793   :  { %v616_v16 = vmul.f32 1.442695, %v615_v15 }
 0x795   :  { %1583 = vpow2.f32 %v616_v16 }
 0x796   :  { %v612_v17 = vpop.f32.mrf.mxu3  ;;  %1585 = vtanh.f32 %v614_v14 }
 0x79b   :  { %v1584_v18 = vpop.eup %1583 }
 0x79c   :  { %v618_v19 = vadd.f32 1.0, %v1584_v18  ;;  %v1586_v20 = vpop.eup %1585 }
 0x79e   :  { %1587 = vrcp.f32 %v618_v19 }
 0x7a4   :  { %v1588_v21 = vpop.eup %1587 }
 0x7a5   :  { %v621_v23 = vsel %vm1997_vm8, %v1586_v20, %v1588_v21  ;;  %v2184_v21 = vld [vmem:[#allocation15 + $0x8] sm:$0xff] }
 0x7a6   :  { %630 = vrot.lane.b32.xlu2 %v621_v23, %s1852_s21  ;;  %627 = vrot.lane.b32.xlu1 %v621_v23, %s1866_s18 }
 0x7a7   :  { %623 = vrot.lane.b32.xlu0 %v621_v23, %s1863_s4 }
 0x7ae   :  { %641 = vrot.lane.b32.xlu2 %v621_v23, %s1864_s16  ;;  %637 = vrot.lane.b32.xlu1 %v621_v23, %s1862_s2 }
 0x7af   :  { %634 = vrot.lane.b32.xlu0 %v621_v23, %s1865_s17 }
 0x800   :  { %v631_v26 = vpop.permute.xlu2 %630 }
 0x808   :  { %v642_v35 = vpop.permute.xlu2 %641 }
 0x818   :  { %v628_v24 = vpop.permute.xlu1 %627 }
 0x819   :  { %v624_v25 = vpop.permute.xlu0 %623  ;;  %v633_v27 = vsel %vm252_vm9, %v628_v24, %v631_v26 }
 0x81a   :  { %v626_v30 = vsel %vm252_vm9, %v621_v23, %v624_v25  ;;  %v645_v32 = vmul.f32 %v633_v27, %v585_v0  ;;  %v644_v39 = vsel %vm252_vm9, %v624_v25, %v642_v35  ;;  %v1867_v23 = vmov -10000.0   ;;  %v2186_v25 = vld [vmem:[#allocation15] sm:$0xff] }
 0x81b   :  { %v790_v24 = vsel %vm789_vm11, 0.0, %v1867_v23 }
 0x81c   :  { %v2189_v26 = vadd.f32 %v790_v24, %v2184_v21  ;;  %v2192_v27 = vadd.f32 %v790_v24, %v2186_v25 }
 0x820   :  { %v638_v28 = vpop.permute.xlu1 %637 }
 0x821   :  { %v635_v29 = vpop.permute.xlu0 %634 }
 0x822   :  { %v640_v31 = vsel %vm252_vm9, %v635_v29, %v638_v28  ;;  %v1530_v28 = vld [vmem:[%s2527_s8] ss:$0 sm:$0xff] }
 0x823   :  { %v646_v33 = vmul.f32 %v640_v31, %v626_v30 }
 0x825   :  { %v647_v34 = vadd.f32 %v646_v33, %v645_v32  ;;  %v2200_v32 = vshrl.u32 %v197_v8, 7 }
 0x827   :  { %1589 = vtanh.f32 %v647_v34  ;;  %vm786_vm12 = vcmp.eq.s32.totalorder %v1988_v11, %v2200_v32  ;;  %v2208_v35 = vadd.s32 16, %v2200_v32 }
 0x829   :  { %vm788_vm14 = vcmp.eq.s32.totalorder %v1988_v11, %v2208_v35 }
 0x82d   :  { %v1590_v36 = vpop.eup %1589 }
 0x82e   :  { %v649_v40 = vmul.f32 %v1590_v36, %v644_v39 }
 0x830   :  { %650 = vst.msk [vmem:[#allocation3 + $0x6] sm:$0x1] %vm277_vm10, %v649_v40  ;;  %v656_v42 = vpack.c.bf16 %v649_v40, %v649_v40 }
 0x832   :  { %1492 = vmatmul.msk.bf16.vlgmr.msra.gmra.mxu0 %vm175_vm0, %v656_v42  ;;  %v2215_v42 = vld [vmem:[#allocation15 + $0x10] sm:$0x7f] }
 0x8af   :  { %v672_v46 = vpop.f32.mrf.mxu0 }
 0x8b0   :  { %v676_v47 = vadd.f32 %v672_v46, %v659_v45 }
 0x8b2   :  { %v677_v48 = vsub.f32 0.0, %v676_v47 }
 0x8b4   :  { %v678_v49 = vmul.f32 1.442695, %v677_v48 }
 0x8b6   :  { %1591 = vpow2.f32 %v678_v49 }
 0x8b7   :  { %v674_v50 = vpop.f32.mrf.mxu0  ;;  %1593 = vtanh.f32 %v676_v47  ;;  %v2229_v47 = vadd.f32 %v790_v24, %v2215_v42 }
 0x8b9   :  { %v811_v50 = vsel %vm800_vm15, %v2229_v47, -inf }
 0x8bc   :  { %v1592_v51 = vpop.eup %1591 }
 0x8bd   :  { %v680_v52 = vadd.f32 1.0, %v1592_v51  ;;  %v1594_v53 = vpop.eup %1593 }
 0x8bf   :  { %1595 = vrcp.f32 %v680_v52 }
 0x8c5   :  { %v1596_v54 = vpop.eup %1595 }
 0x8c6   :  { %v683_v55 = vsel %vm1997_vm8, %v1594_v53, %v1596_v54 }
 0x8c7   :  { %692 = vrot.lane.b32.xlu2 %v683_v55, %s1852_s21  ;;  %689 = vrot.lane.b32.xlu1 %v683_v55, %s1866_s18 }
 0x8c8   :  { %685 = vrot.lane.b32.xlu0 %v683_v55, %s1863_s4 }
 0x8cf   :  { %703 = vrot.lane.b32.xlu2 %v683_v55, %s1864_s16  ;;  %699 = vrot.lane.b32.xlu1 %v683_v55, %s1862_s2 }
 0x8d0   :  { %696 = vrot.lane.b32.xlu0 %v683_v55, %s1865_s17 }
 0x8d7   :  { %404 = vrot.lane.b32.xlu2 %v2058_v38, %s1866_s18  ;;  %342 = vrot.lane.b32.xlu1 %v2037_v6, %s1866_s18  ;;  %v1507_v6 = vld [vmem:[#allocation12] sm:$0xff] }
 0x8d8   :  { %280 = vrot.lane.b32.xlu0 %v2016_v41, %s1866_s18  ;;  %764 = vmatpush.bf16.msra.mxu2 %v1507_v6 }
 0x8df   :  { %590 = vrot.lane.b32.xlu2 %v2121_v5, %s1866_s18  ;;  %528 = vrot.lane.b32.xlu1 %v2100_v37, %s1866_s18 }
 0x8e0   :  { %466 = vrot.lane.b32.xlu0 %v2079_v4, %s1866_s18 }
 0x8e8   :  { %652 = vrot.lane.b32.xlu0 %v649_v40, %s1866_s18 }
 0x908   :  { %809 = vmax.xlane.f32.xlu2 %v2189_v26 }
 0x921   :  { %v693_v22 = vpop.permute.xlu2 %692 }
 0x929   :  { %v704_v56 = vpop.permute.xlu2 %703 }
 0x931   :  { %v405_v38 = vpop.permute.xlu2 %404 }
 0x932   :  { %407 = vst.msk [vmem:[#allocation4 + $0x5] sm:$0x1] %vm277_vm10, %v405_v38 }
 0x939   :  { %v591_v57 = vpop.permute.xlu2 %590  ;;  %v690_v41 = vpop.permute.xlu1 %689 }
 0x93a   :  { %593 = vst.msk [vmem:[#allocation4 + $0x2] sm:$0x1] %vm277_vm10, %v591_v57  ;;  %v686_v58 = vpop.permute.xlu0 %685  ;;  %v695_v37 = vsel %vm252_vm9, %v690_v41, %v693_v22 }
 0x93b   :  { %v688_v61 = vsel %vm252_vm9, %v683_v55, %v686_v58  ;;  %v707_v63 = vmul.f32 %v695_v37, %v647_v34  ;;  %v706_v7 = vsel %vm252_vm9, %v686_v58, %v704_v56  ;;  %v2203_v34 = vadd.s32 8, %v2200_v32 }
 0x93d   :  { %vm787_vm13 = vcmp.eq.s32.totalorder %v1988_v11, %v2203_v34 }
 0x941   :  { %v700_v60 = vpop.permute.xlu1 %699 }
 0x942   :  { %v697_v4 = vpop.permute.xlu0 %696 }
 0x943   :  { %v702_v62 = vsel %vm252_vm9, %v697_v4, %v700_v60 }
 0x944   :  { %v708_v0 = vmul.f32 %v702_v62, %v688_v61  ;;  %v2271_v61 = vld [vmem:[#allocation17 + $0x8] sm:$0xff]  ;;  %v2273_v62 = vld [vmem:[#allocation17] sm:$0xff] }
 0x946   :  { %v709_v1 = vadd.f32 %v708_v0, %v707_v63 }
 0x948   :  { %1597 = vtanh.f32 %v709_v1 }
 0x949   :  { %v343_v2 = vpop.permute.xlu1 %342 }
 0x94a   :  { %345 = vst.msk [vmem:[#allocation4 + $0x6] sm:$0x1] %vm277_vm10, %v343_v2  ;;  %v281_v3 = vpop.permute.xlu0 %280  ;;  %v2279_v2 = vld [vmem:[#allocation17 + $0x10] sm:$0x7f] }
 0x94b   :  { %283 = vst.msk [vmem:[#allocation4 + $0x7] sm:$0x1] %vm277_vm10, %v281_v3 }
 0x94e   :  { %v1598_v5 = vpop.eup %1597 }
 0x94f   :  { %v711_v9 = vmul.f32 %v1598_v5, %v706_v7 }
 0x951   :  { %714 = vrot.lane.b32.xlu1 %v711_v9, %s1866_s18  ;;  %712 = vst.msk [vmem:[#allocation3 + $0x7] sm:$0x1] %vm277_vm10, %v711_v9  ;;  %v529_v10 = vpop.permute.xlu1 %528 }
 0x952   :  { %531 = vst.msk [vmem:[#allocation4 + $0x3] sm:$0x1] %vm277_vm10, %v529_v10  ;;  %v467_v12 = vpop.permute.xlu0 %466 }
 0x953   :  { %469 = vst.msk [vmem:[#allocation4 + $0x4] sm:$0x1] %vm277_vm10, %v467_v12 }
 0x958   :  { %v718_v13 = vld [vmem:[#allocation3] sm:$0xff] }
 0x959   :  { %v719_v14 = vpack.c.bf16 %v718_v13, %v718_v13 }
 0x95a   :  { %v653_v15 = vpop.permute.xlu0 %652 }
 0x95b   :  { %655 = vst.msk [vmem:[#allocation4 + $0x1] sm:$0x1] %vm277_vm10, %v653_v15  ;;  %1502 = vmatmul.msk.bf16.vlgmr.msra.gmra.mxu2 %vm252_vm9, %v719_v14 }
 0x97b   :  { %807 = vmax.xlane.f32.xlu1 %v2192_v27  ;;  %v2265_v41 = vpop.xlane.xlu2 %809 }
 0x9c3   :  { %v715_v16 = vpop.permute.xlu1 %714 }
 0x9c4   :  { %717 = vst.msk [vmem:[#allocation4] sm:$0x1] %vm277_vm10, %v715_v16 }
 0x9cb   :  { %v722_v17 = vld [vmem:[#allocation4] sm:$0xff] }
 0x9cc   :  { %v723_v18 = vpack.c.bf16 %v722_v17, %v722_v17 }
 0x9ce   :  { %1497 = vmatmul.msk.bf16.vlgmr.msra.gmra.mxu1 %vm252_vm9, %v723_v18 }
 0x9de   :  { %v766_v19 = vpop.f32.mrf.mxu2 }
 0x9e6   :  { %v768_v20 = vpop.f32.mrf.mxu2 }
 0x9ee   :  { %v2267_v37 = vpop.xlane.xlu1 %807 }
 0xa4b   :  { %v744_v29 = vpop.f32.mrf.mxu1 }
 0xa4c   :  { %v767_v30 = vadd.f32 %v766_v19, %v744_v29 }
 0xa4e   :  { %v774_v31 = vadd.f32 %v1530_v28, %v767_v30 }
 0xa50   :  { %775 = vst [vmem:[#allocation5] sm:$0xff] %v774_v31 }
 0xa53   :  { %v746_v33 = vpop.f32.mrf.mxu1 }
 0xa57   :  { %v1531_v36 = vld [vmem:[#allocation5 + $0x2] ss:$0 sm:$0xff]  ;;  %v1532_v39 = vld [vmem:[#allocation5] ss:$0 sm:$0xff]  ;;  %v1533_v40 = vld [vmem:[#allocation5 + $0x4] ss:$0 sm:$0xff] }
 0xa58   :  { %v902_v8 = vsel %vm786_vm12, %v1531_v36, 0.0  ;;  %v794_v43 = vsel %vm787_vm13, %v1532_v39, 0.0  ;;  %v793_v44 = vsel %vm786_vm12, %v1532_v39, 0.0  ;;  %v1534_v45 = vld [vmem:[#allocation5 + $0x6] ss:$0 sm:$0xff]  ;;  %v2226_v46 = vsel %vm786_vm12, %v1533_v40, 0.0 }
 0xa59   :  { %905 = vadd.xlane.f32.xlu1 %v902_v8  ;;  %798 = vadd.xlane.f32.xlu0 %v794_v43  ;;  %v2236_v48 = vsel %vm786_vm12, %v1534_v45, 0.0  ;;  %v795_v49 = vsel %vm788_vm14, %v1532_v39, 0.0  ;;  %v903_v52 = vsel %vm787_vm13, %v1531_v36, 0.0  ;;  %v904_v53 = vsel %vm788_vm14, %v1531_v36, 0.0  ;;  %v866_v19 = vld [vmem:[#allocation5 + $0x1] sm:$0x1] }
 0xa5a   :  { %796 = vadd.xlane.f32.xlu2 %v793_v44  ;;  %v801_v51 = vsel %vm800_vm15, %v795_v49, 0.0  ;;  %v909_v54 = vsel %vm800_vm15, %v904_v53, 0.0  ;;  %v1012_v55 = vsel %vm787_vm13, %v1533_v40, 0.0  ;;  %v1013_v22 = vsel %vm788_vm14, %v1533_v40, 0.0 }
 0xa5b   :  { %v1018_v56 = vsel %vm800_vm15, %v1013_v22, 0.0  ;;  %v1121_v38 = vsel %vm787_vm13, %v1534_v45, 0.0  ;;  %v1122_v6 = vsel %vm788_vm14, %v1534_v45, 0.0 }
 0xa5c   :  { %v1127_v57 = vsel %vm800_vm15, %v1122_v6, 0.0 }
 0xa61   :  { %812 = vmax.xlane.f32.xlu0 %v811_v50 }
 0xa62   :  { %802 = vadd.xlane.f32.xlu2 %v801_v51 }
 0xa6a   :  { %907 = vadd.xlane.f32.xlu2 %v903_v52 }
 0xa72   :  { %910 = vadd.xlane.f32.xlu2 %v909_v54 }
 0xa7a   :  { %1016 = vadd.xlane.f32.xlu2 %v1012_v55 }
 0xa82   :  { %1019 = vadd.xlane.f32.xlu2 %v1018_v56 }
 0xa8a   :  { %1125 = vadd.xlane.f32.xlu2 %v1121_v38 }
 0xa92   :  { %1128 = vadd.xlane.f32.xlu2 %v1127_v57 }
 0xacc   :  { %v799_v58 = vpop.xlane.xlu0 %798  ;;  %v906_v43 = vpop.xlane.xlu1 %905 }
 0xacd   :  { %v797_v59 = vpop.xlane.xlu2 %796  ;;  %v864_v60 = vadd.f32 %v2265_v41, %v799_v58 }
 0xace   :  { %v863_v4 = vadd.f32 %v2267_v37, %v797_v59 }
 0xacf   :  { %v868_v63 = vadd.f32 %v864_v60, %v2271_v61 }
 0xad0   :  { %v867_v0 = vadd.f32 %v863_v4, %v2273_v62 }
 0xad2   :  { %v871_v9 = vmax.f32 %v867_v0, %v868_v63 }
 0xad4   :  { %v2277_v1 = vpop.xlane.xlu0 %812 }
 0xad5   :  { %v803_v3 = vpop.xlane.xlu2 %802 }
 0xad6   :  { %v865_v5 = vadd.f32 %v2277_v1, %v803_v3 }
 0xad8   :  { %v869_v7 = vadd.f32 %v865_v5, %v2279_v2 }
 0xada   :  { %v870_v10 = vsel %vm800_vm15, %v869_v7, -inf }
 0xadb   :  { %v872_v12 = vmax.f32 %v871_v9, %v870_v10 }
 0xadd   :  { %v873_v13 = vrot.slane %v872_v12, 4  ;;  %v908_v44 = vpop.xlane.xlu2 %907 }
 0xadf   :  { %v874_v14 = vmax.f32 %v872_v12, %v873_v13 }
 0xae1   :  { %v875_v15 = vrot.slane %v874_v14, 2 }
 0xae3   :  { %v876_v16 = vmax.f32 %v874_v14, %v875_v15 }
 0xae5   :  { %v877_v17 = vrot.slane %v876_v16, 1  ;;  %v911_v52 = vpop.xlane.xlu2 %910 }
 0xae7   :  { %v878_v18 = vmax.f32 %v876_v16, %v877_v17 }
 0xae9   :  { %vm879_vm0 = vcmp.ge.f32.partialorder %v867_v0, %v878_v18  ;;  %vm880_vm1 = vcmp.ge.f32.partialorder %v868_v63, %v878_v18  ;;  %vm881_vm2 = vcmp.ge.f32.partialorder %v869_v7, %v878_v18  ;;  %v899_v20 = vadd.f32 %v878_v18, %v866_v19  ;;  %v975_v0 = vld [vmem:[#allocation5 + $0x3] sm:$0x1] }
 0xaea   :  { %v882_v23 = vsel %vm879_vm0, %v2200_v32, 23  ;;  %v883_v24 = vsel %vm880_vm1, %v2203_v34, 23  ;;  %v884_v28 = vsel %vm881_vm2, %v2208_v35, 23 }
 0xaeb   :  { %v885_v29 = vsel %vm800_vm15, %v884_v28, 2147483647  ;;  %vm886_vm3 = vcmp.lt.s32.totalorder %v882_v23, %v883_v24  ;;  %v912_v30 = vperm.slane %v899_v20, 0 }
 0xaec   :  { %v887_v31 = vsel %vm886_vm3, %v882_v23, %v883_v24  ;;  %vm1229_vm3 = vcmask 1040384  }
 0xaed   :  { %vm888_vm4 = vcmp.lt.s32.totalorder %v887_v31, %v885_v29  ;;  %v2289_v33 = vadd.f32 %v912_v30, %v2184_v21  ;;  %v2292_v36 = vadd.f32 %v912_v30, %v2186_v25  ;;  %v2299_v40 = vadd.f32 %v912_v30, %v2215_v42  ;;  %v1017_v20 = vpop.xlane.xlu2 %1016 }
 0xaee   :  { %v2294_v39 = vsel %vm888_vm4, %v887_v31, %v885_v29 }
 0xaef   :  { %918 = vmax.xlane.f32.xlu1 %v2289_v33  ;;  %916 = vmax.xlane.f32.xlu0 %v2292_v36  ;;  %v920_v8 = vsel %vm800_vm15, %v2299_v40, -inf }
 0xaf5   :  { %v1020_v30 = vpop.xlane.xlu2 %1019 }
 0xaf7   :  { %1014 = vadd.xlane.f32.xlu1 %v2226_v46  ;;  %921 = vmax.xlane.f32.xlu0 %v920_v8 }
 0xb62   :  { %v2304_v45 = vpop.xlane.xlu0 %916  ;;  %v2306_v49 = vpop.xlane.xlu1 %918 }
 0xb63   :  { %v973_v50 = vadd.f32 %v2306_v49, %v908_v44  ;;  %v972_v51 = vadd.f32 %v2304_v45, %v906_v43 }
 0xb65   :  { %v977_v53 = vadd.f32 %v973_v50, %v2271_v61  ;;  %v976_v54 = vadd.f32 %v972_v51, %v2273_v62 }
 0xb67   :  { %v980_v56 = vmax.f32 %v976_v54, %v977_v53 }
 0xb6a   :  { %v2312_v55 = vpop.xlane.xlu0 %921  ;;  %v1015_v19 = vpop.xlane.xlu1 %1014 }
 0xb6b   :  { %v974_v46 = vadd.f32 %v2312_v55, %v911_v52 }
 0xb6d   :  { %v978_v22 = vadd.f32 %v974_v46, %v2279_v2 }
 0xb6f   :  { %v979_v38 = vsel %vm800_vm15, %v978_v22, -inf }
 0xb70   :  { %v981_v6 = vmax.f32 %v980_v56, %v979_v38 }
 0xb72   :  { %v982_v57 = vrot.slane %v981_v6, 4 }
 0xb74   :  { %v983_v58 = vmax.f32 %v981_v6, %v982_v57  ;;  %v1084_v6 = vld [vmem:[#allocation5 + $0x5] sm:$0x1] }
 0xb76   :  { %v984_v59 = vrot.slane %v983_v58, 2 }
 0xb78   :  { %v985_v60 = vmax.f32 %v983_v58, %v984_v59 }
 0xb7a   :  { %v986_v4 = vrot.slane %v985_v60, 1 }
 0xb7c   :  { %v987_v63 = vmax.f32 %v985_v60, %v986_v4 }
 0xb7e   :  { %vm988_vm5 = vcmp.ge.f32.partialorder %v976_v54, %v987_v63  ;;  %vm989_vm6 = vcmp.ge.f32.partialorder %v977_v53, %v987_v63  ;;  %vm990_vm7 = vcmp.ge.f32.partialorder %v978_v22, %v987_v63  ;;  %v1008_v3 = vadd.f32 %v987_v63, %v975_v0 }
 0xb7f   :  { %v991_v5 = vsel %vm988_vm5, %v2200_v32, 23  ;;  %v992_v7 = vsel %vm989_vm6, %v2203_v34, 23  ;;  %v993_v9 = vsel %vm990_vm7, %v2208_v35, 23  ;;  %vm1250_vm6 = vcmask 0  }
 0xb80   :  { %v994_v10 = vsel %vm800_vm15, %v993_v9, 2147483647  ;;  %vm995_vm8 = vcmp.lt.s32.totalorder %v991_v5, %v992_v7  ;;  %v1021_v12 = vperm.slane %v1008_v3, 0 }
 0xb81   :  { %v996_v13 = vsel %vm995_vm8, %v991_v5, %v992_v7 }
 0xb82   :  { %vm997_vm9 = vcmp.lt.s32.totalorder %v996_v13, %v994_v10  ;;  %v2322_v14 = vadd.f32 %v1021_v12, %v2184_v21  ;;  %v2325_v15 = vadd.f32 %v1021_v12, %v2186_v25  ;;  %v2332_v17 = vadd.f32 %v1021_v12, %v2215_v42 }
 0xb83   :  { %v2327_v16 = vsel %vm997_vm9, %v996_v13, %v994_v10  ;;  %v1126_v13 = vpop.xlane.xlu2 %1125 }
 0xb84   :  { %1027 = vmax.xlane.f32.xlu1 %v2322_v14  ;;  %1025 = vmax.xlane.f32.xlu0 %v2325_v15  ;;  %v1029_v18 = vsel %vm800_vm15, %v2332_v17, -inf }
 0xb8c   :  { %1123 = vadd.xlane.f32.xlu1 %v2236_v48  ;;  %1030 = vmax.xlane.f32.xlu0 %v1029_v18 }
 0xbf7   :  { %v2337_v23 = vpop.xlane.xlu0 %1025  ;;  %v2339_v24 = vpop.xlane.xlu1 %1027 }
 0xbf8   :  { %v1082_v28 = vadd.f32 %v2339_v24, %v1017_v20  ;;  %v1081_v29 = vadd.f32 %v2337_v23, %v1015_v19 }
 0xbfa   :  { %v1086_v31 = vadd.f32 %v1082_v28, %v2271_v61  ;;  %v1085_v8 = vadd.f32 %v1081_v29, %v2273_v62  ;;  %v1129_v28 = vpop.xlane.xlu2 %1128 }
 0xbfc   :  { %v1089_v50 = vmax.f32 %v1085_v8, %v1086_v31 }
 0xbff   :  { %v2345_v43 = vpop.xlane.xlu0 %1030  ;;  %v1124_v12 = vpop.xlane.xlu1 %1123 }
 0xc00   :  { %v1083_v48 = vadd.f32 %v2345_v43, %v1020_v30 }
 0xc02   :  { %v1087_v44 = vadd.f32 %v1083_v48, %v2279_v2 }
 0xc04   :  { %v1088_v51 = vsel %vm800_vm15, %v1087_v44, -inf }
 0xc05   :  { %v1090_v52 = vmax.f32 %v1089_v50, %v1088_v51 }
 0xc07   :  { %v1091_v53 = vrot.slane %v1090_v52, 4 }
 0xc09   :  { %v1092_v54 = vmax.f32 %v1090_v52, %v1091_v53 }
 0xc0b   :  { %v1093_v46 = vrot.slane %v1092_v54, 2 }
 0xc0d   :  { %v1094_v22 = vmax.f32 %v1092_v54, %v1093_v46 }
 0xc0f   :  { %v1095_v56 = vrot.slane %v1094_v22, 1 }
 0xc11   :  { %v1096_v38 = vmax.f32 %v1094_v22, %v1095_v56  ;;  %v1193_v22 = vld [vmem:[#allocation5 + $0x7] sm:$0x1] }
 0xc13   :  { %vm1097_vm10 = vcmp.ge.f32.partialorder %v1085_v8, %v1096_v38  ;;  %vm1098_vm11 = vcmp.ge.f32.partialorder %v1086_v31, %v1096_v38  ;;  %vm1099_vm12 = vcmp.ge.f32.partialorder %v1087_v44, %v1096_v38  ;;  %v1117_v57 = vadd.f32 %v1096_v38, %v1084_v6 }
 0xc14   :  { %v1100_v58 = vsel %vm1097_vm10, %v2200_v32, 23  ;;  %v1101_v59 = vsel %vm1098_vm11, %v2203_v34, 23  ;;  %v1102_v60 = vsel %vm1099_vm12, %v2208_v35, 23 }
 0xc15   :  { %v1103_v4 = vsel %vm800_vm15, %v1102_v60, 2147483647  ;;  %vm1104_vm13 = vcmp.lt.s32.totalorder %v1100_v58, %v1101_v59  ;;  %v1130_v63 = vperm.slane %v1117_v57, 0 }
 0xc16   :  { %v1105_v0 = vsel %vm1104_vm13, %v1100_v58, %v1101_v59 }
 0xc17   :  { %vm1106_vm14 = vcmp.lt.s32.totalorder %v1105_v0, %v1103_v4  ;;  %v2355_v3 = vadd.f32 %v1130_v63, %v2184_v21  ;;  %v1131_v5 = vadd.f32 %v1130_v63, %v2186_v25  ;;  %v2362_v9 = vadd.f32 %v1130_v63, %v2215_v42 }
 0xc18   :  { %v2358_v7 = vsel %vm1106_vm14, %v1105_v0, %v1103_v4 }
 0xc19   :  { %1136 = vmax.xlane.f32.xlu1 %v2355_v3  ;;  %1134 = vmax.xlane.f32.xlu0 %v1131_v5  ;;  %v1138_v10 = vsel %vm800_vm15, %v2362_v9, -inf }
 0xc21   :  { %1139 = vmax.xlane.f32.xlu0 %v1138_v10 }
 0xc8c   :  { %v1135_v18 = vpop.xlane.xlu0 %1134  ;;  %v1137_v19 = vpop.xlane.xlu1 %1136 }
 0xc8d   :  { %v1191_v21 = vadd.f32 %v1137_v19, %v1126_v13  ;;  %v1190_v20 = vadd.f32 %v1135_v18, %v1124_v12  ;;  %vm1141_vm8 = vcmp.ge.f32.partialorder %v1131_v5, %v1135_v18  ;;  %vm1142_vm9 = vcmp.ge.f32.partialorder %v2355_v3, %v1137_v19 }
 0xc8e   :  { %v1144_v13 = vsel %vm1141_vm8, %v1988_v11, 128 }
 0xc8f   :  { %v1195_v25 = vadd.f32 %v1191_v21, %v2271_v61  ;;  %v1194_v29 = vadd.f32 %v1190_v20, %v2273_v62  ;;  %v1227_v61 = vld [vmem:[%s2530_s11] sm:$0x1]  ;;  %v1148_v21 = vshra.s32 %v1144_v13, 16 }
 0xc91   :  { %v1198_v8 = vmax.f32 %v1194_v29, %v1195_v25  ;;  %v1150_v20 = vcvt.s32.f32 %v1148_v21 }
 0xc94   :  { %v2368_v30 = vpop.xlane.xlu0 %1139 }
 0xc95   :  { %v1192_v42 = vadd.f32 %v2368_v30, %v1129_v28 }
 0xc97   :  { %v1196_v31 = vadd.f32 %v1192_v42, %v2279_v2  ;;  %v1145_v42 = vsel %vm1142_vm9, %v1988_v11, 128  ;;  %vm1252_vm9 = vcmp.eq.s32.totalorder %v1988_v11, 7 }
 0xc99   :  { %v1197_v48 = vsel %vm800_vm15, %v1196_v31, -inf }
 0xc9a   :  { %v1199_v44 = vmax.f32 %v1198_v8, %v1197_v48  ;;  %v1162_v8 = vshra.s32 %v1145_v42, 16  ;;  %v1147_v48 = vand.u32 65535, %v1144_v13 }
 0xc9c   :  { %v1200_v50 = vrot.slane %v1199_v44, 4  ;;  %v1164_v5 = vcvt.s32.f32 %v1162_v8 }
 0xc9e   :  { %v1201_v51 = vmax.f32 %v1199_v44, %v1200_v50  ;;  %v1149_v44 = vcvt.s32.f32 %v1147_v48 }
 0xca0   :  { %v1202_v52 = vrot.slane %v1201_v51, 2 }
 0xca2   :  { %v1203_v53 = vmax.f32 %v1201_v51, %v1202_v52 }
 0xca4   :  { %v1204_v54 = vrot.slane %v1203_v53, 1 }
 0xca6   :  { %v1205_v46 = vmax.f32 %v1203_v53, %v1204_v54 }
 0xca8   :  { %vm1206_vm0 = vcmp.ge.f32.partialorder %v1194_v29, %v1205_v46  ;;  %vm1207_vm1 = vcmp.ge.f32.partialorder %v1195_v25, %v1205_v46  ;;  %vm1208_vm2 = vcmp.ge.f32.partialorder %v1196_v31, %v1205_v46  ;;  %v1226_v62 = vadd.f32 %v1205_v46, %v1193_v22 }
 0xca9   :  { %v1209_v2 = vsel %vm1206_vm0, %v2200_v32, 23  ;;  %v1210_v56 = vsel %vm1207_vm1, %v2203_v34, 23  ;;  %v1211_v38 = vsel %vm1208_vm2, %v2208_v35, 23  ;;  %vm1143_vm0 = vcmp.ge.f32.partialorder %v2362_v9, %v2368_v30 }
 0xcaa   :  { %v1212_v6 = vsel %vm800_vm15, %v1211_v38, 2147483647  ;;  %vm1213_vm4 = vcmp.lt.s32.totalorder %v1209_v2, %v1210_v56  ;;  %v1228_v57 = vadd.f32 %v1227_v61, %v1226_v62  ;;  %vm1032_vm2 = vcmp.ge.f32.partialorder %v2325_v15, %v2337_v23 }
 0xcab   :  { %v1214_v58 = vsel %vm1213_vm4, %v1209_v2, %v1210_v56  ;;  %v1035_v30 = vsel %vm1032_vm2, %v1988_v11, 128 }
 0xcac   :  { %vm1215_vm5 = vcmp.lt.s32.totalorder %v1214_v58, %v1212_v6  ;;  %v1230_v59 = vsel %vm1229_vm3, %v1228_v57, -inf }
 0xcad   :  { %v1216_v60 = vsel %vm1215_vm5, %v1214_v58, %v1212_v6  ;;  %1231 = vmax.xlane.f32.xlu1 %v1230_v59  ;;  %v1146_v6 = vsel %vm1143_vm0, %v1988_v11, 128  ;;  %vm1033_vm5 = vcmp.ge.f32.partialorder %v2322_v14, %v2339_v24  ;;  %v1038_v14 = vand.u32 65535, %v1035_v30 }
 0xcae   :  { %v1217_v51 = vrot.slane %v1216_v60, 4  ;;  %v1175_v59 = vsel %vm800_vm15, %v1146_v6, 2147483647 }
 0xcb0   :  { %vm1218_vm12 = vcmp.lt.s32.totalorder %v1216_v60, %v1217_v51 }
 0xcb1   :  { %v1219_v3 = vsel %vm1218_vm12, %v1216_v60, %v1217_v51  ;;  %v1177_v60 = vshra.s32 %v1175_v59, 16 }
 0xcb2   :  { %v1220_v19 = vrot.slane %v1219_v3, 2 }
 0xcb4   :  { %vm1221_vm13 = vcmp.lt.s32.totalorder %v1219_v3, %v1220_v19 }
 0xcb5   :  { %v1222_v52 = vsel %vm1221_vm13, %v1219_v3, %v1220_v19  ;;  %v1040_v19 = vcvt.s32.f32 %v1038_v14 }
 0xcb6   :  { %v1223_v54 = vrot.slane %v1222_v52, 1 }
 0xcb8   :  { %vm1224_vm14 = vcmp.lt.s32.totalorder %v1222_v52, %v1223_v54 }
 0xcb9   :  { %v1225_v2 = vsel %vm1224_vm14, %v1222_v52, %v1223_v54 }
 0xd20   :  { %v1232_v4 = vpop.xlane.xlu1 %1231 }
 0xd21   :  { %vm1233_vm7 = vcmp.ge.f32.partialorder %v1228_v57, %v1232_v4  ;;  %1251 = vst.msk [vmem:[#allocation19] sm:$0x1] %vm1250_vm6, %v1232_v4  ;;  %v1179_v4 = vcvt.s32.f32 %v1177_v60 }
 0xd22   :  { %v1234_v63 = vsel %vm1233_vm7, %v1988_v11, 128  ;;  %1438 = dma.vmem_to_hbm [thread:$0]  %s1434_s1, 16, %s1436_s24, [#allocation20]  }
 0xd23   :  { %v1235_v0 = vsel %vm1229_vm3, %v1234_v63, 2147483647 }
 0xd24   :  { %v1237_v10 = vshra.s32 %v1235_v0, 16  ;;  %v1236_v28 = vand.u32 65535, %v1235_v0  ;;  %v1161_v0 = vand.u32 65535, %v1145_v42  ;;  %v2405_v42 = vsel %vm1033_vm5, %v1988_v11, 128 }
 0xd26   :  { %v1239_v12 = vcvt.s32.f32 %v1237_v10  ;;  %v1238_v29 = vcvt.s32.f32 %v1236_v28  ;;  %v1163_v9 = vcvt.s32.f32 %v1161_v0 }
 0xd28   :  { %1240 = vmin.xlane.f32.xlu2 %v1239_v12 }
 0xd30   :  { %1151 = vmin.xlane.f32.xlu2 %v1150_v20 }
 0xd9b   :  { %v1241_v25 = vpop.xlane.xlu2 %1240 }
 0xd9c   :  { %vm1242_vm10 = vcmp.eq.f32.partialorder %v1239_v12, %v1241_v25  ;;  %v1247_v53 = vcvt.f32.s32 %v1241_v25  ;;  %v1039_v12 = vshra.s32 %v1035_v30, 16 }
 0xd9d   :  { %v1243_v31 = vsel %vm1242_vm10, %v1238_v29, inf  ;;  %v1176_v29 = vand.u32 65535, %v1175_v59  ;;  %vm1271_vm10 = vcmp.eq.s32.totalorder %v1988_v11, 6 }
 0xd9e   :  { %1244 = vmin.xlane.f32.xlu0 %v1243_v31  ;;  %v1248_v22 = vshll.u32 %v1247_v53, 16  ;;  %v1041_v13 = vcvt.s32.f32 %v1039_v12 }
 0xd9f   :  { %v1178_v23 = vcvt.s32.f32 %v1176_v29 }
 0xda3   :  { %v2387_v18 = vpop.xlane.xlu2 %1151 }
 0xda4   :  { %vm1153_vm11 = vcmp.eq.f32.partialorder %v1150_v20, %v2387_v18 }
 0xda5   :  { %v1154_v50 = vsel %vm1153_vm11, %v1149_v44, inf }
 0xda6   :  { %1165 = vmin.xlane.f32.xlu0 %v1164_v5 }
 0xdae   :  { %1155 = vmin.xlane.f32.xlu0 %v1154_v50 }
 0xe11   :  { %v1245_v46 = vpop.xlane.xlu0 %1244 }
 0xe12   :  { %v1246_v61 = vcvt.f32.s32 %v1245_v46  ;;  %v1158_v46 = vcvt.f32.s32 %v2387_v18 }
 0xe14   :  { %v2390_v62 = vadd.s32 %v1248_v22, %v1246_v61 }
 0xe16   :  { %vm1254_vm1 = vcmp.eq.s32.totalorder %v1988_v11, %v2390_v62 }
 0xe17   :  { %v1255_v56 = vsel %vm1254_vm1, %v1225_v2, 0 }
 0xe18   :  { %v1256_v38 = vsel %vm1229_vm3, %v1255_v56, 2147483648  ;;  %v1108_v56 = vrot.slane %v2358_v7, 4 }
 0xe19   :  { %v1258_v57 = vshra.s32 %v1256_v38, 16  ;;  %v1166_v63 = vpop.xlane.xlu0 %1165  ;;  %v1257_v21 = vand.u32 65535, %v1256_v38 }
 0xe1a   :  { %vm1167_vm4 = vcmp.eq.f32.partialorder %v1164_v5, %v1166_v63  ;;  %v1172_v8 = vcvt.f32.s32 %v1166_v63  ;;  %v1053_v5 = vshra.s32 %v2405_v42, 16  ;;  %vm1109_vm11 = vcmp.lt.s32.totalorder %v2358_v7, %v1108_v56 }
 0xe1b   :  { %v1260_v58 = vcvt.s32.f32 %v1258_v57  ;;  %v1168_v10 = vsel %vm1167_vm4, %v1163_v9, inf  ;;  %v1259_v28 = vcvt.s32.f32 %v1257_v21  ;;  %v1159_v57 = vshll.u32 %v1158_v46, 16 }
 0xe1c   :  { %v1173_v44 = vshll.u32 %v1172_v8, 16  ;;  %v2408_v51 = vcvt.s32.f32 %v1053_v5  ;;  %v1110_v12 = vsel %vm1109_vm11, %v2358_v7, %v1108_v56  ;;  %vm923_vm11 = vcmp.ge.f32.partialorder %v2292_v36, %v2304_v45 }
 0xe1d   :  { %1261 = vmax.xlane.f32.xlu1 %v1260_v58  ;;  %v1111_v21 = vrot.slane %v1110_v12, 2 }
 0xe1f   :  { %vm1112_vm2 = vcmp.lt.s32.totalorder %v1110_v12, %v1111_v21 }
 0xe21   :  { %v1156_v54 = vpop.xlane.xlu0 %1155 }
 0xe22   :  { %v1157_v38 = vcvt.f32.s32 %v1156_v54 }
 0xe24   :  { %v1160_v63 = vadd.s32 %v1159_v57, %v1157_v38 }
 0xe25   :  { %1180 = vmin.xlane.f32.xlu1 %v1179_v4 }
 0xe2d   :  { %1169 = vmin.xlane.f32.xlu1 %v1168_v10 }
 0xe35   :  { %1042 = vmin.xlane.f32.xlu1 %v1041_v13 }
 0xe90   :  { %v1262_v20 = vpop.xlane.xlu1 %1261 }
 0xe91   :  { %vm1263_vm3 = vcmp.eq.f32.partialorder %v1260_v58, %v1262_v20  ;;  %v1268_v53 = vcvt.f32.s32 %v1262_v20  ;;  %v1253_v58 = vsel %vm1252_vm9, %v2390_v62, 0  ;;  %vm1034_vm9 = vcmp.ge.f32.partialorder %v2332_v17, %v2345_v43 }
 0xe92   :  { %v1264_v25 = vsel %vm1263_vm3, %v1259_v28, -inf  ;;  %v1037_v14 = vsel %vm1034_vm9, %v1988_v11, 128  ;;  %v1052_v17 = vand.u32 65535, %v2405_v42 }
 0xe93   :  { %1265 = vmax.xlane.f32.xlu2 %v1264_v25  ;;  %v1269_v61 = vshll.u32 %v1268_v53, 16  ;;  %v1066_v53 = vsel %vm800_vm15, %v1037_v14, 2147483647 }
 0xe94   :  { %v1068_v54 = vshra.s32 %v1066_v53, 16  ;;  %v1054_v43 = vcvt.s32.f32 %v1052_v17  ;;  %v1067_v42 = vand.u32 65535, %v1066_v53 }
 0xe96   :  { %v1070_v46 = vcvt.s32.f32 %v1068_v54  ;;  %v1069_v45 = vcvt.s32.f32 %v1067_v42 }
 0xe98   :  { %v1181_v15 = vpop.xlane.xlu1 %1180 }
 0xe99   :  { %vm1182_vm7 = vcmp.eq.f32.partialorder %v1179_v4, %v1181_v15  ;;  %v1187_v59 = vcvt.f32.s32 %v1181_v15  ;;  %v1113_v15 = vsel %vm1112_vm2, %v1110_v12, %v1111_v21  ;;  %vm1312_vm2 = vcmp.eq.s32.totalorder %v1988_v11, 4 }
 0xe9a   :  { %v1183_v31 = vsel %vm1182_vm7, %v1178_v23, inf  ;;  %v1114_v8 = vrot.slane %v1113_v15, 1  ;;  %vm1294_vm7 = vcmp.eq.s32.totalorder %v1988_v11, 5 }
 0xe9b   :  { %1184 = vmin.xlane.f32.xlu2 %v1183_v31  ;;  %v1188_v30 = vshll.u32 %v1187_v59, 16 }
 0xe9c   :  { %vm1115_vm5 = vcmp.lt.s32.totalorder %v1113_v15, %v1114_v8 }
 0xea0   :  { %v1170_v48 = vpop.xlane.xlu1 %1169 }
 0xea1   :  { %v1171_v50 = vcvt.f32.s32 %v1170_v48 }
 0xea3   :  { %v1174_v3 = vadd.s32 %v1173_v44, %v1171_v50  ;;  %1056 = vmin.xlane.f32.xlu2 %v2408_v51  ;;  %v1116_v44 = vsel %vm1115_vm5, %v1113_v15, %v1114_v8 }
 0xea8   :  { %v2411_v24 = vpop.xlane.xlu1 %1042 }
 0xea9   :  { %vm1044_vm8 = vcmp.eq.f32.partialorder %v1041_v13, %v2411_v24 }
 0xeaa   :  { %v1045_v52 = vsel %vm1044_vm8, %v1040_v19, inf }
 0xeab   :  { %1046 = vmin.xlane.f32.xlu2 %v1045_v52 }
 0xf06   :  { %v1266_v22 = vpop.xlane.xlu2 %1265 }
 0xf07   :  { %v1267_v2 = vcvt.f32.s32 %v1266_v22 }
 0xf09   :  { %v1270_v6 = vadd.s32 %v1269_v61, %v1267_v2  ;;  %v926_v61 = vsel %vm923_vm11, %v1988_v11, 128 }
 0xf0a   :  { %v930_v56 = vshra.s32 %v926_v61, 16 }
 0xf0b   :  { %v1272_v60 = vsel %vm1271_vm10, %v1270_v6, %v1253_v58  ;;  %v1273_v4 = vperm.slane %v1270_v6, 0 }
 0xf0c   :  { %v932_v38 = vcvt.s32.f32 %v930_v56 }
 0xf0d   :  { %vm1274_vm12 = vcmp.eq.s32.totalorder %v2200_v32, %v1273_v4  ;;  %vm1275_vm13 = vcmp.eq.s32.totalorder %v2203_v34, %v1273_v4  ;;  %vm1276_vm0 = vcmp.eq.s32.totalorder %v2208_v35, %v1273_v4 }
 0xf0e   :  { %v1277_v18 = vsel %vm1274_vm12, %v1160_v63, 0  ;;  %v1278_v0 = vsel %vm1275_vm13, %v1174_v3, 0  ;;  %v1185_v9 = vpop.xlane.xlu2 %1184 }
 0xf0f   :  { %vm1281_vm14 = vcmp.gt.s32.totalorder %v1277_v18, %v1278_v0  ;;  %v1186_v10 = vcvt.f32.s32 %v1185_v9 }
 0xf10   :  { %v1282_v13 = vsel %vm1281_vm14, %v1277_v18, %v1278_v0  ;;  %vm924_vm14 = vcmp.ge.f32.partialorder %v2289_v33, %v2306_v49  ;;  %v929_v33 = vand.u32 65535, %v926_v61 }
 0xf11   :  { %v1189_v62 = vadd.s32 %v1188_v30, %v1186_v10 }
 0xf12   :  { %v931_v12 = vcvt.s32.f32 %v929_v33 }
 0xf13   :  { %v1279_v20 = vsel %vm1276_vm0, %v1189_v62, 0 }
 0xf14   :  { %v1280_v28 = vsel %vm800_vm15, %v1279_v20, 2147483648  ;;  %v1049_v20 = vcvt.f32.s32 %v2411_v24 }
 0xf15   :  { %vm1283_vm1 = vcmp.gt.s32.totalorder %v1282_v13, %v1280_v28 }
 0xf16   :  { %v1284_v25 = vsel %vm1283_vm1, %v1282_v13, %v1280_v28  ;;  %v1057_v22 = vpop.xlane.xlu2 %1056 }
 0xf17   :  { %v1285_v29 = vrot.slane %v1284_v25, 4  ;;  %vm1058_vm12 = vcmp.eq.f32.partialorder %v2408_v51, %v1057_v22  ;;  %v2441_v51 = vsel %vm924_vm14, %v1988_v11, 128  ;;  %v1063_v4 = vcvt.f32.s32 %v1057_v22 }
 0xf18   :  { %v1059_v2 = vsel %vm1058_vm12, %v1054_v43, inf  ;;  %v944_v63 = vshra.s32 %v2441_v51, 16  ;;  %vm1334_vm14 = vcmp.eq.s32.totalorder %v1988_v11, 3 }
 0xf19   :  { %vm1286_vm4 = vcmp.gt.s32.totalorder %v1284_v25, %v1285_v29  ;;  %v1064_v0 = vshll.u32 %v1063_v4, 16 }
 0xf1a   :  { %v1287_v23 = vsel %vm1286_vm4, %v1284_v25, %v1285_v29  ;;  %v2444_v30 = vcvt.s32.f32 %v944_v63 }
 0xf1b   :  { %v1288_v31 = vrot.slane %v1287_v23, 2 }
 0xf1d   :  { %vm1289_vm3 = vcmp.gt.s32.totalorder %v1287_v23, %v1288_v31 }
 0xf1e   :  { %v1290_v5 = vsel %vm1289_vm3, %v1287_v23, %v1288_v31  ;;  %v1047_v62 = vpop.xlane.xlu2 %1046  ;;  %v999_v23 = vrot.slane %v2327_v16, 4  ;;  %v1050_v31 = vshll.u32 %v1049_v20, 16 }
 0xf1f   :  { %v1291_v7 = vrot.slane %v1290_v5, 1  ;;  %v1048_v28 = vcvt.f32.s32 %v1047_v62 }
 0xf20   :  { %vm1000_vm5 = vcmp.lt.s32.totalorder %v2327_v16, %v999_v23 }
 0xf21   :  { %vm1292_vm8 = vcmp.gt.s32.totalorder %v1290_v5, %v1291_v7  ;;  %v1001_v53 = vsel %vm1000_vm5, %v2327_v16, %v999_v23 }
 0xf22   :  { %v1293_v48 = vsel %vm1292_vm8, %v1290_v5, %v1291_v7  ;;  %v1051_v5 = vadd.s32 %v1050_v31, %v1048_v28 }
 0xf23   :  { %vm1296_vm10 = vcmp.eq.s32.totalorder %v1988_v11, %v1293_v48  ;;  %v2429_v50 = vsel %vm1294_vm7, %v1293_v48, %v1272_v60 }
 0xf24   :  { %v1297_v3 = vsel %vm1296_vm10, %v1116_v44, 0 }
 0xf25   :  { %v1299_v19 = vshra.s32 %v1297_v3, 16  ;;  %v1298_v6 = vand.u32 65535, %v1297_v3 }
 0xf27   :  { %v1301_v52 = vcvt.s32.f32 %v1299_v19  ;;  %v1300_v58 = vcvt.s32.f32 %v1298_v6 }
 0xf29   :  { %1302 = vmax.xlane.f32.xlu0 %v1301_v52 }
 0xf31   :  { %1071 = vmin.xlane.f32.xlu0 %v1070_v46 }
 0xf39   :  { %1060 = vmin.xlane.f32.xlu0 %v1059_v2 }
 0xf41   :  { %933 = vmin.xlane.f32.xlu0 %v932_v38 }
 0xf9c   :  { %v1303_v57 = vpop.xlane.xlu0 %1302 }
 0xf9d   :  { %vm1304_vm13 = vcmp.eq.f32.partialorder %v1301_v52, %v1303_v57  ;;  %v1309_v21 = vcvt.f32.s32 %v1303_v57 }
 0xf9e   :  { %v1305_v59 = vsel %vm1304_vm13, %v1300_v58, -inf }
 0xf9f   :  { %1306 = vmax.xlane.f32.xlu1 %v1305_v59  ;;  %v1310_v29 = vshll.u32 %v1309_v21, 16 }
 0xfa4   :  { %v1072_v36 = vpop.xlane.xlu0 %1071 }
 0xfa5   :  { %vm1073_vm0 = vcmp.eq.f32.partialorder %v1070_v46, %v1072_v36  ;;  %v1078_v7 = vcvt.f32.s32 %v1072_v36  ;;  %v1002_v46 = vrot.slane %v1001_v53, 2 }
 0xfa6   :  { %v1074_v60 = vsel %vm1073_vm0, %v1069_v45, inf }
 0xfa7   :  { %1075 = vmin.xlane.f32.xlu1 %v1074_v60  ;;  %v1079_v19 = vshll.u32 %v1078_v7, 16  ;;  %vm1003_vm10 = vcmp.lt.s32.totalorder %v1001_v53, %v1002_v46 }
 0xfa8   :  { %v1004_v61 = vsel %vm1003_vm10, %v1001_v53, %v1002_v46  ;;  %vm1352_vm10 = vcmp.eq.s32.totalorder %v1988_v11, 2 }
 0xfac   :  { %v1061_v18 = vpop.xlane.xlu0 %1060 }
 0xfad   :  { %v1062_v9 = vcvt.f32.s32 %v1061_v18 }
 0xfaf   :  { %v1065_v10 = vadd.s32 %v1064_v0, %v1062_v9  ;;  %947 = vmin.xlane.f32.xlu1 %v2444_v30 }
 0xfb4   :  { %v2447_v49 = vpop.xlane.xlu0 %933 }
 0xfb5   :  { %vm935_vm1 = vcmp.eq.f32.partialorder %v932_v38, %v2447_v49  ;;  %v1005_v38 = vrot.slane %v1004_v61, 1 }
 0xfb6   :  { %v936_v13 = vsel %vm935_vm1, %v931_v12, inf  ;;  %vm925_vm1 = vcmp.ge.f32.partialorder %v2299_v40, %v2312_v55  ;;  %v943_v40 = vand.u32 65535, %v2441_v51 }
 0xfb7   :  { %937 = vmin.xlane.f32.xlu1 %v936_v13  ;;  %vm1006_vm13 = vcmp.lt.s32.totalorder %v1004_v61, %v1005_v38  ;;  %v928_v36 = vsel %vm925_vm1, %v1988_v11, 128 }
 0xfb8   :  { %v1007_v58 = vsel %vm1006_vm13, %v1004_v61, %v1005_v38  ;;  %v957_v4 = vsel %vm800_vm15, %v928_v36, 2147483647  ;;  %v945_v55 = vcvt.s32.f32 %v943_v40 }
 0xfb9   :  { %v959_v63 = vshra.s32 %v957_v4, 16  ;;  %v958_v51 = vand.u32 65535, %v957_v4 }
 0xfbb   :  { %v961_v18 = vcvt.s32.f32 %v959_v63 }
0x1012   :  { %v1307_v25 = vpop.xlane.xlu1 %1306 }
0x1013   :  { %v1308_v15 = vcvt.f32.s32 %v1307_v25 }
0x1015   :  { %v1311_v8 = vadd.s32 %v1310_v29, %v1308_v15 }
0x1017   :  { %vm1314_vm4 = vcmp.eq.s32.totalorder %v2200_v32, %v1311_v8  ;;  %vm1315_vm3 = vcmp.eq.s32.totalorder %v2203_v34, %v1311_v8  ;;  %v1313_v48 = vsel %vm1312_vm2, %v1311_v8, %v2429_v50  ;;  %vm1316_vm8 = vcmp.eq.s32.totalorder %v2208_v35, %v1311_v8 }
0x1018   :  { %v1317_v44 = vsel %vm1314_vm4, %v1051_v5, 0  ;;  %v1318_v24 = vsel %vm1315_vm3, %v1065_v10, 0  ;;  %vm814_vm4 = vcmp.ge.f32.partialorder %v2192_v27, %v2267_v37  ;;  %v960_v37 = vcvt.s32.f32 %v958_v51 }
0x1019   :  { %vm1321_vm7 = vcmp.gt.s32.totalorder %v1317_v44, %v1318_v24  ;;  %v817_v9 = vsel %vm814_vm4, %v1988_v11, 128 }
0x101a   :  { %v1076_v3 = vpop.xlane.xlu1 %1075  ;;  %v1322_v14 = vsel %vm1321_vm7, %v1317_v44, %v1318_v24  ;;  %v821_v33 = vshra.s32 %v817_v9, 16  ;;  %vm815_vm7 = vcmp.ge.f32.partialorder %v2189_v26, %v2265_v41  ;;  %v820_v26 = vand.u32 65535, %v817_v9 }
0x101b   :  { %v1077_v52 = vcvt.f32.s32 %v1076_v3  ;;  %v940_v3 = vcvt.f32.s32 %v2447_v49 }
0x101c   :  { %v823_v12 = vcvt.s32.f32 %v821_v33  ;;  %v822_v7 = vcvt.s32.f32 %v820_v26 }
0x101d   :  { %v1080_v54 = vadd.s32 %v1079_v19, %v1077_v52  ;;  %v941_v46 = vshll.u32 %v940_v3, 16 }
0x101f   :  { %v1319_v22 = vsel %vm1316_vm8, %v1080_v54, 0  ;;  %v890_v54 = vrot.slane %v2294_v39, 4 }
0x1020   :  { %v1320_v17 = vsel %vm800_vm15, %v1319_v22, 2147483648 }
0x1021   :  { %vm1323_vm9 = vcmp.gt.s32.totalorder %v1322_v14, %v1320_v17  ;;  %vm891_vm13 = vcmp.lt.s32.totalorder %v2294_v39, %v890_v54 }
0x1022   :  { %v1324_v50 = vsel %vm1323_vm9, %v1322_v14, %v1320_v17  ;;  %v948_v0 = vpop.xlane.xlu1 %947 }
0x1023   :  { %v1325_v43 = vrot.slane %v1324_v50, 4  ;;  %vm949_vm3 = vcmp.eq.f32.partialorder %v2444_v30, %v948_v0  ;;  %v2476_v30 = vsel %vm815_vm7, %v1988_v11, 128  ;;  %v954_v25 = vcvt.f32.s32 %v948_v0 }
0x1024   :  { %v950_v10 = vsel %vm949_vm3, %v945_v55, inf  ;;  %v835_v29 = vshra.s32 %v2476_v30, 16  ;;  %vm1374_vm7 = vcmp.eq.s32.totalorder %v1988_v11, 1 }
0x1025   :  { %vm1326_vm11 = vcmp.gt.s32.totalorder %v1324_v50, %v1325_v43  ;;  %v955_v23 = vshll.u32 %v954_v25, 16 }
0x1026   :  { %v1327_v2 = vsel %vm1326_vm11, %v1324_v50, %v1325_v43  ;;  %v2479_v8 = vcvt.s32.f32 %v835_v29 }
0x1027   :  { %v1328_v56 = vrot.slane %v1327_v2, 2 }
0x1029   :  { %vm1329_vm12 = vcmp.gt.s32.totalorder %v1327_v2, %v1328_v56 }
0x102a   :  { %v1330_v6 = vsel %vm1329_vm12, %v1327_v2, %v1328_v56  ;;  %v938_v44 = vpop.xlane.xlu1 %937 }
0x102b   :  { %v1331_v57 = vrot.slane %v1330_v6, 1  ;;  %v939_v14 = vcvt.f32.s32 %v938_v44 }
0x102d   :  { %vm1332_vm0 = vcmp.gt.s32.totalorder %v1330_v6, %v1331_v57  ;;  %v942_v17 = vadd.s32 %v941_v46, %v939_v14 }
0x102e   :  { %v1333_v16 = vsel %vm1332_vm0, %v1330_v6, %v1331_v57  ;;  %v892_v57 = vsel %vm891_vm13, %v2294_v39, %v890_v54 }
0x102f   :  { %vm1336_vm2 = vcmp.eq.s32.totalorder %v1988_v11, %v1333_v16  ;;  %v2464_v59 = vsel %vm1334_vm14, %v1333_v16, %v1313_v48 }
0x1030   :  { %v1337_v42 = vsel %vm1336_vm2, %v1007_v58, 0  ;;  %v893_v58 = vrot.slane %v892_v57, 2 }
0x1031   :  { %v1339_v45 = vshra.s32 %v1337_v42, 16  ;;  %v1338_v13 = vand.u32 65535, %v1337_v42 }
0x1032   :  { %vm894_vm2 = vcmp.lt.s32.totalorder %v892_v57, %v893_v58 }
0x1033   :  { %v1341_v60 = vcvt.s32.f32 %v1339_v45  ;;  %v1340_v21 = vcvt.s32.f32 %v1338_v13 }
0x1035   :  { %1342 = vmax.xlane.f32.xlu2 %v1341_v60 }
0x103d   :  { %962 = vmin.xlane.f32.xlu2 %v961_v18 }
0x1045   :  { %951 = vmin.xlane.f32.xlu2 %v950_v10 }
0x104d   :  { %824 = vmin.xlane.f32.xlu2 %v823_v12 }
0x10a8   :  { %v1343_v62 = vpop.xlane.xlu2 %1342 }
0x10a9   :  { %vm1344_vm5 = vcmp.eq.f32.partialorder %v1341_v60, %v1343_v62  ;;  %v1349_v24 = vcvt.f32.s32 %v1343_v62  ;;  %v895_v60 = vsel %vm894_vm2, %v892_v57, %v893_v58 }
0x10aa   :  { %v1345_v20 = vsel %vm1344_vm5, %v1340_v21, -inf }
0x10ab   :  { %1346 = vmax.xlane.f32.xlu0 %v1345_v20  ;;  %v1350_v52 = vshll.u32 %v1349_v24, 16 }
0x10b0   :  { %v963_v27 = vpop.xlane.xlu2 %962 }
0x10b1   :  { %vm964_vm8 = vcmp.eq.f32.partialorder %v961_v18, %v963_v27  ;;  %v969_v50 = vcvt.f32.s32 %v963_v27  ;;  %v896_v18 = vrot.slane %v895_v60, 1  ;;  %v834_v27 = vand.u32 65535, %v2476_v30 }
0x10b2   :  { %v965_v28 = vsel %vm964_vm8, %v960_v37, inf }
0x10b3   :  { %966 = vmin.xlane.f32.xlu0 %v965_v28  ;;  %v970_v38 = vshll.u32 %v969_v50, 16  ;;  %vm897_vm5 = vcmp.lt.s32.totalorder %v895_v60, %v896_v18 }
0x10b4   :  { %v898_v55 = vsel %vm897_vm5, %v895_v60, %v896_v18 }
0x10b8   :  { %v952_v15 = vpop.xlane.xlu2 %951 }
0x10b9   :  { %v953_v31 = vcvt.f32.s32 %v952_v15 }
0x10bb   :  { %v956_v5 = vadd.s32 %v955_v23, %v953_v31  ;;  %838 = vmin.xlane.f32.xlu0 %v2479_v8 }
0x10c0   :  { %v2482_v41 = vpop.xlane.xlu2 %824 }
0x10c1   :  { %vm826_vm9 = vcmp.eq.f32.partialorder %v823_v12, %v2482_v41 }
0x10c2   :  { %v827_v48 = vsel %vm826_vm9, %v822_v7, inf  ;;  %vm816_vm9 = vcmp.ge.f32.partialorder %v2229_v47, %v2277_v1  ;;  %v836_v47 = vcvt.s32.f32 %v834_v27  ;;  %v831_v7 = vcvt.f32.s32 %v2482_v41 }
0x10c3   :  { %828 = vmin.xlane.f32.xlu0 %v827_v48  ;;  %v819_v33 = vsel %vm816_vm9, %v1988_v11, 128 }
0x10c4   :  { %v848_v62 = vsel %vm800_vm15, %v819_v33, 2147483647 }
0x10c5   :  { %v850_v21 = vshra.s32 %v848_v62, 16  ;;  %v849_v15 = vand.u32 65535, %v848_v62 }
0x10c7   :  { %v852_v20 = vcvt.s32.f32 %v850_v21  ;;  %v851_v31 = vcvt.s32.f32 %v849_v15 }
0x111e   :  { %v1347_v19 = vpop.xlane.xlu0 %1346 }
0x111f   :  { %v1348_v53 = vcvt.f32.s32 %v1347_v19 }
0x1121   :  { %v1351_v22 = vadd.s32 %v1350_v52, %v1348_v53  ;;  %v832_v52 = vshll.u32 %v831_v7, 16 }
0x1123   :  { %vm1354_vm11 = vcmp.eq.s32.totalorder %v2200_v32, %v1351_v22  ;;  %vm1355_vm12 = vcmp.eq.s32.totalorder %v2203_v34, %v1351_v22  ;;  %v1353_v43 = vsel %vm1352_vm10, %v1351_v22, %v2464_v59  ;;  %vm1356_vm0 = vcmp.eq.s32.totalorder %v2208_v35, %v1351_v22 }
0x1124   :  { %v1357_v61 = vsel %vm1354_vm11, %v942_v17, 0  ;;  %v1358_v49 = vsel %vm1355_vm12, %v956_v5, 0 }
0x1125   :  { %vm1361_vm14 = vcmp.gt.s32.totalorder %v1357_v61, %v1358_v49 }
0x1126   :  { %v1362_v2 = vsel %vm1361_vm14, %v1357_v61, %v1358_v49  ;;  %v967_v56 = vpop.xlane.xlu0 %966  ;;  %vm1392_vm14 = vcmp.eq.s32.totalorder %v1988_v11, 0 }
0x1127   :  { %v968_v6 = vcvt.f32.s32 %v967_v56 }
0x1129   :  { %v971_v16 = vadd.s32 %v970_v38, %v968_v6 }
0x112b   :  { %v1359_v42 = vsel %vm1356_vm0, %v971_v16, 0  ;;  %vm1414_vm0 = vcmask 57344  }
0x112c   :  { %v1360_v36 = vsel %vm800_vm15, %v1359_v42, 2147483648 }
0x112d   :  { %vm1363_vm1 = vcmp.gt.s32.totalorder %v1362_v2, %v1360_v36 }
0x112e   :  { %v1364_v59 = vsel %vm1363_vm1, %v1362_v2, %v1360_v36  ;;  %v839_v51 = vpop.xlane.xlu0 %838 }
0x112f   :  { %v1365_v45 = vrot.slane %v1364_v59, 4  ;;  %vm840_vm11 = vcmp.eq.f32.partialorder %v2479_v8, %v839_v51  ;;  %v845_v48 = vcvt.f32.s32 %v839_v51 }
0x1130   :  { %v841_v1 = vsel %vm840_vm11, %v836_v47, inf }
0x1131   :  { %vm1366_vm4 = vcmp.gt.s32.totalorder %v1364_v59, %v1365_v45  ;;  %v846_v53 = vshll.u32 %v845_v48, 16 }
0x1132   :  { %v1367_v4 = vsel %vm1366_vm4, %v1364_v59, %v1365_v45 }
0x1133   :  { %v1368_v63 = vrot.slane %v1367_v4, 2 }
0x1135   :  { %vm1369_vm3 = vcmp.gt.s32.totalorder %v1367_v4, %v1368_v63 }
0x1136   :  { %v1370_v0 = vsel %vm1369_vm3, %v1367_v4, %v1368_v63  ;;  %v829_v30 = vpop.xlane.xlu0 %828 }
0x1137   :  { %v1371_v40 = vrot.slane %v1370_v0, 1  ;;  %v830_v44 = vcvt.f32.s32 %v829_v30 }
0x1139   :  { %vm1372_vm8 = vcmp.gt.s32.totalorder %v1370_v0, %v1371_v40  ;;  %v833_v46 = vadd.s32 %v832_v52, %v830_v44 }
0x113a   :  { %v1373_v39 = vsel %vm1372_vm8, %v1370_v0, %v1371_v40 }
0x113b   :  { %vm1376_vm10 = vcmp.eq.s32.totalorder %v1988_v11, %v1373_v39  ;;  %v1375_v9 = vsel %vm1374_vm7, %v1373_v39, %v1353_v43 }
0x113c   :  { %v1377_v10 = vsel %vm1376_vm10, %v898_v55, 0 }
0x113d   :  { %v1379_v12 = vshra.s32 %v1377_v10, 16  ;;  %v1378_v37 = vand.u32 65535, %v1377_v10 }
0x113f   :  { %v1381_v13 = vcvt.s32.f32 %v1379_v12  ;;  %v1380_v25 = vcvt.s32.f32 %v1378_v37 }
0x1141   :  { %1382 = vmax.xlane.f32.xlu1 %v1381_v13 }
0x1149   :  { %853 = vmin.xlane.f32.xlu1 %v852_v20 }
0x1151   :  { %842 = vmin.xlane.f32.xlu1 %v841_v1 }
0x11b4   :  { %v1383_v28 = vpop.xlane.xlu1 %1382 }
0x11b5   :  { %vm1384_vm12 = vcmp.eq.f32.partialorder %v1381_v13, %v1383_v28  ;;  %v1389_v8 = vcvt.f32.s32 %v1383_v28 }
0x11b6   :  { %v1385_v29 = vsel %vm1384_vm12, %v1380_v25, -inf }
0x11b7   :  { %1386 = vmax.xlane.f32.xlu2 %v1385_v29  ;;  %v1390_v14 = vshll.u32 %v1389_v8, 16 }
0x11bc   :  { %v854_v23 = vpop.xlane.xlu1 %853 }
0x11bd   :  { %vm855_vm13 = vcmp.eq.f32.partialorder %v852_v20, %v854_v23  ;;  %v860_v22 = vcvt.f32.s32 %v854_v23 }
0x11be   :  { %v856_v5 = vsel %vm855_vm13, %v851_v31, inf }
0x11bf   :  { %857 = vmin.xlane.f32.xlu2 %v856_v5  ;;  %v861_v11 = vshll.u32 %v860_v22, 16 }
0x11c4   :  { %v843_v26 = vpop.xlane.xlu1 %842 }
0x11c5   :  { %v844_v24 = vcvt.f32.s32 %v843_v26 }
0x11c7   :  { %v847_v41 = vadd.s32 %v846_v53, %v844_v24 }
0x122a   :  { %v1387_v3 = vpop.xlane.xlu2 %1386 }
0x122b   :  { %v1388_v19 = vcvt.f32.s32 %v1387_v3 }
0x122d   :  { %v1391_v54 = vadd.s32 %v1390_v14, %v1388_v19 }
0x122f   :  { %vm1394_vm1 = vcmp.eq.s32.totalorder %v2200_v32, %v1391_v54  ;;  %vm1395_vm2 = vcmp.eq.s32.totalorder %v2203_v34, %v1391_v54  ;;  %v1393_v17 = vsel %vm1392_vm14, %v1391_v54, %v1375_v9  ;;  %vm1396_vm3 = vcmp.eq.s32.totalorder %v2208_v35, %v1391_v54 }
0x1230   :  { %v1397_v50 = vsel %vm1394_vm1, %v833_v46, 0  ;;  %v1398_v43 = vsel %vm1395_vm2, %v847_v41, 0  ;;  %1415 = vst.msk [vmem:[#allocation18] sm:$0x1] %vm1414_vm0, %v1393_v17 }
0x1231   :  { %vm1401_vm4 = vcmp.gt.s32.totalorder %v1397_v50, %v1398_v43  ;;  %1427 = dma.vmem_to_hbm [thread:$0]  %s1423_s0, 16, %s1425_s27, [#allocation8]  }
0x1232   :  { %v858_v61 = vpop.xlane.xlu2 %857  ;;  %v1402_v49 = vsel %vm1401_vm4, %v1397_v50, %v1398_v43 }
0x1233   :  { %v859_v2 = vcvt.f32.s32 %v858_v61 }
0x1235   :  { %v862_v56 = vadd.s32 %v861_v11, %v859_v2 }
0x1237   :  { %v1399_v38 = vsel %vm1396_vm3, %v862_v56, 0 }
0x1238   :  { %v1400_v6 = vsel %vm800_vm15, %v1399_v38, 2147483648 }
0x1239   :  { %vm1403_vm5 = vcmp.gt.s32.totalorder %v1402_v49, %v1400_v6 }
0x123a   :  { %v1404_v32 = vsel %vm1403_vm5, %v1402_v49, %v1400_v6 }
0x123b   :  { %v1405_v57 = vrot.slane %v1404_v32, 4 }
0x123d   :  { %vm1406_vm7 = vcmp.gt.s32.totalorder %v1404_v32, %v1405_v57 }
0x123e   :  { %v1407_v34 = vsel %vm1406_vm7, %v1404_v32, %v1405_v57 }
0x123f   :  { %v1408_v16 = vrot.slane %v1407_v34, 2 }
0x1241   :  { %vm1409_vm8 = vcmp.gt.s32.totalorder %v1407_v34, %v1408_v16 }
0x1242   :  { %v1410_v58 = vsel %vm1409_vm8, %v1407_v34, %v1408_v16 }
0x1243   :  { %v1411_v42 = vrot.slane %v1410_v58, 1 }
0x1245   :  { %vm1412_vm9 = vcmp.gt.s32.totalorder %v1410_v58, %v1411_v42 }
0x1246   :  { %v1413_v35 = vsel %vm1412_vm9, %v1410_v58, %v1411_v42 }
0x1247   :  { %1416 = vst.msk [vmem:[#allocation21] sm:$0x1] %vm1250_vm6, %v1413_v35 }
0x1248   :  { %1449 = dma.vmem_to_hbm [thread:$0]  %s1445_s28, 16, %s1447_s29, [#allocation20]  }
0x1249   :  { %1847 = dma.done.wait [#allocation8], 16  }
0x124a   :  { %1848 = vsyncadd [#allocation8], 4294967280 }
0x124b   :  { %1849 = dma.done.wait [#allocation20], 32  }
0x124c   :  { %1850 = vsyncadd [#allocation20], 4294967264 }
0x124d   :  { %1462 = vsyncpa [#allocation7], 1 }
0x124e   :  { %1463 = vsyncpa [#allocation10], 1 }
0x124f   :  { %1464 = vsyncpa [#allocation13], 1 }
0x1250   :  { %1465 = vsyncpa [#allocation16], 1 }
0x1251   :  { %1466 = vsyncpa [#allocation8], 1 }
0x1252   :  { %1467 = vsyncpa [#allocation20], 1 }

</bundles_post_ra>
